<compile_context>
chip_gen: v7x
topology: tpu7x:2x2x1
jax: 0.10.0
libtpu: 0.0.40
codegen_flags: <defaults>
</compile_context>

<pallas_src>
import functools
import math

import jax
import jax.numpy as jnp
from jax.experimental import pallas as pl
from jax.experimental.pallas import tpu as pltpu


def _conv3x3_refl(x_bf16, w_ref):
    """ReflectionPad2d(1) + 3x3 Conv2d (no bias) as ONE im2col matmul.

    x_bf16: [H, W, C]  bf16 activations (channels-last).
    w_ref : [9*C, C]   bf16 weights, row order = dy*3*C + dx*C + c_in.
    returns [H*W, C]   f32 conv output.
    """
    H, W, C = x_bf16.shape
    # Reflection pad along H (outer-dim concat of whole planes: cheap).
    xh = jnp.concatenate([x_bf16[1:2], x_bf16, x_bf16[H - 2:H - 1]], axis=0)  # [H+2, W, C]
    # Three dx-shifted column windows of the (virtually) width-padded frame,
    # built directly from xh: the only sublane-shuffle copies per conv.
    left = jnp.concatenate([xh[:, 1:2, :], xh[:, 0:W - 1, :]], axis=1)       # pad cols [0 : W)
    center = xh                                                              # pad cols [1 : W+1)
    right = jnp.concatenate([xh[:, 1:W, :], xh[:, W - 2:W - 1, :]], axis=1)  # pad cols [2 : W+2)
    wide = jnp.concatenate([left, center, right], axis=-1)                   # [H+2, W, 3C] lane-aligned
    # dy taps: free outer-dim slices; reshape layout-free (W % 8 == 0);
    # lane-axis concat at 3C-multiple (=> 128-multiple) offsets.
    cols = jnp.concatenate(
        [wide[dy:dy + H].reshape(H * W, 3 * C) for dy in range(3)], axis=-1)  # [H*W, 9C] bf16
    # Single MXU matmul, f32 accumulation.
    return jnp.dot(cols, w_ref[...], preferred_element_type=jnp.float32)      # [H*W, C] f32


def _instance_norm(acc, *, eps, relu):
    """InstanceNorm2d(affine=False): per-channel stats over the flattened spatial axis."""
    mean = jnp.mean(acc, axis=0, keepdims=True)        # [1, C]
    cen = acc - mean
    var = jnp.mean(cen * cen, axis=0, keepdims=True)   # biased variance (PyTorch semantics)
    y = cen * jax.lax.rsqrt(var + eps)
    if relu:
        y = jnp.maximum(y, 0.0)
    return y


def residual_block_kernel(x_ref, w1_ref, w2_ref, o_ref, *, eps):
    x = x_ref[0]                                       # [H, W, C] f32
    H, W, C = x.shape
    # Cast once per conv input (not per tap). Conv bias omitted on purpose:
    # it cancels exactly under InstanceNorm (mean/var are shift-invariant).
    h = _instance_norm(_conv3x3_refl(x.astype(jnp.bfloat16), w1_ref), eps=eps, relu=True)
    h = h.reshape(H, W, C)
    y = _instance_norm(_conv3x3_refl(h.astype(jnp.bfloat16), w2_ref), eps=eps, relu=False)
    o_ref[0] = (x + y.reshape(H, W, C)).astype(o_ref.dtype)   # residual skip in f32


def prepare_params(params):
    """One-time weight prep (do this at parameter-load time, NOT per forward).

    PyTorch Conv2d weight [C_out, C_in, 3, 3] -> im2col matrix [9*C_in, C_out]
    with row order dy*3*C + dx*C + c_in, stored bf16 for the MXU. Conv biases
    are dropped: InstanceNorm(affine=False) cancels them exactly.
    """
    C = params["w1"].shape[0]

    def prep_w(w):
        return jnp.transpose(w, (2, 3, 1, 0)).reshape(9 * C, C).astype(jnp.bfloat16)

    return {"w1": prep_w(params["w1"]), "w2": prep_w(params["w2"])}


def residual_block_forward_nhwc(x_nhwc, prepped, *, eps=1e-5):
    """Core forward on channels-last activations: [B, H, W, C] -> [B, H, W, C]."""
    B, H, W, C = x_nhwc.shape
    assert H >= 2 and W >= 2, "ReflectionPad2d(1) needs spatial dims >= 2"
    assert W % 8 == 0, "W must be a multiple of 8 (layout-free reshapes)"
    assert C % 128 == 0, "C must be a multiple of 128 (lane-dense layout)"

    return pl.pallas_call(
        functools.partial(residual_block_kernel, eps=eps),
        out_shape=jax.ShapeDtypeStruct((B, H, W, C), jnp.float32),
        grid=(B,),
        in_specs=[
            pl.BlockSpec((1, H, W, C), lambda b: (b, 0, 0, 0)),   # per-sample activations
            pl.BlockSpec((9 * C, C), lambda b: (0, 0)),           # conv1 weights (VMEM-resident)
            pl.BlockSpec((9 * C, C), lambda b: (0, 0)),           # conv2 weights (VMEM-resident)
        ],
        out_specs=pl.BlockSpec((1, H, W, C), lambda b: (b, 0, 0, 0)),
        compiler_params=pltpu.CompilerParams(
            dimension_semantics=("parallel",),    # batch steps shard across v7x's 2 TCs
        ),
    )(x_nhwc, prepped["w1"], prepped["w2"])


def residual_block_forward(x_nchw, prepped, *, eps=1e-5):
    """PyTorch-layout wrapper ([B, C, H, W]). In a full network keep activations
    NHWC across layers and call residual_block_forward_nhwc to avoid these
    two HBM-round-trip transposes."""
    x_cl = jnp.transpose(x_nchw, (0, 2, 3, 1))
    out = residual_block_forward_nhwc(x_cl, prepped, eps=eps)
    return jnp.transpose(out, (0, 3, 1, 2))


def init_params(key, features):
    """PyTorch Conv2d default init: U(-1/sqrt(fan_in), 1/sqrt(fan_in)), fan_in = 9*C."""
    ks = jax.random.split(key, 4)
    fan_in = features * 3 * 3
    bound = 1.0 / math.sqrt(fan_in)
    wshape = (features, features, 3, 3)
    return {
        "w1": jax.random.uniform(ks[0], wshape, jnp.float32, -bound, bound),
        "b1": jax.random.uniform(ks[1], (features,), jnp.float32, -bound, bound),
        "w2": jax.random.uniform(ks[2], wshape, jnp.float32, -bound, bound),
        "b2": jax.random.uniform(ks[3], (features,), jnp.float32, -bound, bound),
    }


def residual_block_reference(x, params, *, eps=1e-5, bf16_matmul=False):
    """Pure-JAX reference of the PyTorch module (optionally bf16 conv inputs).
    Keeps the conv bias to verify that dropping it in the kernel is exact."""
    def conv(t, w, b):
        tp = jnp.pad(t, ((0, 0), (0, 0), (1, 1), (1, 1)), mode="reflect")
        if bf16_matmul:
            tp = tp.astype(jnp.bfloat16)
            w = w.astype(jnp.bfloat16)
        y = jax.lax.conv_general_dilated(
            tp, w, window_strides=(1, 1), padding="VALID",
            dimension_numbers=("NCHW", "OIHW", "NCHW"),
            preferred_element_type=jnp.float32)
        return y + b[None, :, None, None]

    def inorm(t):  # InstanceNorm2d(affine=False, track_running_stats=False)
        m = jnp.mean(t, axis=(2, 3), keepdims=True)
        v = jnp.mean(jnp.square(t - m), axis=(2, 3), keepdims=True)
        return (t - m) * jax.lax.rsqrt(v + eps)

    h = jnp.maximum(inorm(conv(x, params["w1"], params["b1"])), 0.0)
    return x + inorm(conv(h, params["w2"], params["b2"]))


if __name__ == "__main__":
    # ResidualBlock(features=128) on a [2, 128, 16, 16] NCHW input.
    B, C, H, W = 2, 128, 16, 16
    key = jax.random.PRNGKey(0)
    kx, kp = jax.random.split(key)
    x = jax.random.normal(kx, (B, C, H, W), dtype=jnp.float32)
    params = init_params(kp, C)

    prepped = prepare_params(params)          # once, at parameter-load time
    fwd = jax.jit(residual_block_forward)

    out = jax.block_until_ready(fwd(x, prepped))
    assert out.shape == (B, C, H, W)

    # Tight check vs a bf16-matmul-matched JAX reference (same math, different schedule;
    # also verifies the exact conv-bias cancellation under InstanceNorm).
    ref_bf16 = residual_block_reference(x, params, bf16_matmul=True)
    assert jnp.allclose(out, ref_bf16, atol=5e-3, rtol=5e-3), "mismatch vs bf16-matched ref"

    # Fidelity check vs the full-f32 PyTorch-equivalent reference.
    ref_f32 = residual_block_reference(x, params, bf16_matmul=False)
    assert jnp.allclose(out, ref_f32, atol=1e-1, rtol=1e-1), "mismatch vs f32 reference"

    print("KERNEL_OK")
</pallas_src>

<mosaic_0001>
module attributes {stable_mosaic.version = 11 : i64} {
  func.func @residual_block_kernel(%arg0: i32, %arg1: memref<1x16x16x128xf32, #tpu.memory_space<vmem>>, %arg2: memref<1152x128xbf16, #tpu.memory_space<vmem>>, %arg3: memref<1152x128xbf16, #tpu.memory_space<vmem>>, %arg4: memref<1x16x16x128xf32, #tpu.memory_space<vmem>>) attributes {dimension_semantics = [#tpu.dimension_semantics<parallel>], iteration_bounds = array<i64: 2>, scalar_prefetch = 0 : i64, scratch_operands = 0 : i64, tpu.core_type = #tpu.core_type<tc>, window_params = [{transform_indices = @transform_0, window_bounds = array<i64: 1, 16, 16, 128>}, {pipeline_mode = #tpu.pipeline_mode<synchronous>, transform_indices = @transform_1, window_bounds = array<i64: 1152, 128>}, {pipeline_mode = #tpu.pipeline_mode<synchronous>, transform_indices = @transform_2, window_bounds = array<i64: 1152, 128>}, {transform_indices = @transform_3, window_bounds = array<i64: 1, 16, 16, 128>}]} {
    %c0 = arith.constant 0 : index
    %c0_0 = arith.constant 0 : index
    %c0_1 = arith.constant 0 : index
    %c0_2 = arith.constant 0 : index
    %0 = vector.load %arg1[%c0, %c0_0, %c0_1, %c0_2] : memref<1x16x16x128xf32, #tpu.memory_space<vmem>>, vector<1x16x16x128xf32>
    %1 = vector.shape_cast %0 : vector<1x16x16x128xf32> to vector<16x16x128xf32>
    %2 = arith.truncf %1 : vector<16x16x128xf32> to vector<16x16x128xbf16>
    %3 = vector.extract_strided_slice %2 {offsets = [1, 0, 0], sizes = [1, 16, 128], strides = [1, 1, 1]} : vector<16x16x128xbf16> to vector<1x16x128xbf16>
    %4 = vector.extract_strided_slice %2 {offsets = [14, 0, 0], sizes = [1, 16, 128], strides = [1, 1, 1]} : vector<16x16x128xbf16> to vector<1x16x128xbf16>
    %5 = tpu.concatenate %3, %2, %4 in 0 : vector<1x16x128xbf16>, vector<16x16x128xbf16>, vector<1x16x128xbf16> -> vector<18x16x128xbf16>
    %6 = vector.extract_strided_slice %5 {offsets = [0, 1, 0], sizes = [18, 1, 128], strides = [1, 1, 1]} : vector<18x16x128xbf16> to vector<18x1x128xbf16>
    %7 = vector.extract_strided_slice %5 {offsets = [0, 0, 0], sizes = [18, 15, 128], strides = [1, 1, 1]} : vector<18x16x128xbf16> to vector<18x15x128xbf16>
    %8 = tpu.concatenate %6, %7 in 1 : vector<18x1x128xbf16>, vector<18x15x128xbf16> -> vector<18x16x128xbf16>
    %9 = vector.extract_strided_slice %5 {offsets = [0, 1, 0], sizes = [18, 15, 128], strides = [1, 1, 1]} : vector<18x16x128xbf16> to vector<18x15x128xbf16>
    %10 = vector.extract_strided_slice %5 {offsets = [0, 14, 0], sizes = [18, 1, 128], strides = [1, 1, 1]} : vector<18x16x128xbf16> to vector<18x1x128xbf16>
    %11 = tpu.concatenate %9, %10 in 1 : vector<18x15x128xbf16>, vector<18x1x128xbf16> -> vector<18x16x128xbf16>
    %12 = tpu.concatenate %8, %5, %11 in 2 : vector<18x16x128xbf16>, vector<18x16x128xbf16>, vector<18x16x128xbf16> -> vector<18x16x384xbf16>
    %13 = vector.extract_strided_slice %12 {offsets = [0, 0, 0], sizes = [16, 16, 384], strides = [1, 1, 1]} : vector<18x16x384xbf16> to vector<16x16x384xbf16>
    %14 = vector.shape_cast %13 : vector<16x16x384xbf16> to vector<256x384xbf16>
    %15 = vector.extract_strided_slice %12 {offsets = [1, 0, 0], sizes = [16, 16, 384], strides = [1, 1, 1]} : vector<18x16x384xbf16> to vector<16x16x384xbf16>
    %16 = vector.shape_cast %15 : vector<16x16x384xbf16> to vector<256x384xbf16>
    %17 = vector.extract_strided_slice %12 {offsets = [2, 0, 0], sizes = [16, 16, 384], strides = [1, 1, 1]} : vector<18x16x384xbf16> to vector<16x16x384xbf16>
    %18 = vector.shape_cast %17 : vector<16x16x384xbf16> to vector<256x384xbf16>
    %19 = tpu.concatenate %14, %16, %18 in 1 : vector<256x384xbf16>, vector<256x384xbf16>, vector<256x384xbf16> -> vector<256x1152xbf16>
    %c0_3 = arith.constant 0 : index
    %c0_4 = arith.constant 0 : index
    %20 = vector.load %arg2[%c0_3, %c0_4] : memref<1152x128xbf16, #tpu.memory_space<vmem>>, vector<1152x128xbf16>
    %cst = arith.constant dense<0.000000e+00> : vector<256x128xf32>
    %21 = tpu.matmul %19, %20, %cst {dimension_numbers = #tpu.dot_dimension_numbers<[1], [0], [0], [1], [0, 0, 1, 1], [], []>} : vector<256x1152xbf16>, vector<1152x128xbf16>, vector<256x128xf32> -> vector<256x128xf32>
    %cst_5 = arith.constant dense<0.000000e+00> : vector<128xf32>
    %22 = vector.multi_reduction <add>, %21, %cst_5 [0] : vector<256x128xf32> to vector<128xf32>
    %23 = vector.shape_cast %22 : vector<128xf32> to vector<1x128xf32>
    %cst_6 = arith.constant 2.560000e+02 : f32
    %24 = vector.broadcast %cst_6 : f32 to vector<1x128xf32>
    %25 = arith.divf %23, %24 : vector<1x128xf32>
    %26 = vector.broadcast %25 : vector<1x128xf32> to vector<256x128xf32>
    %27 = arith.subf %21, %26 : vector<256x128xf32>
    %28 = arith.mulf %27, %27 : vector<256x128xf32>
    %cst_7 = arith.constant dense<0.000000e+00> : vector<128xf32>
    %29 = vector.multi_reduction <add>, %28, %cst_7 [0] : vector<256x128xf32> to vector<128xf32>
    %30 = vector.shape_cast %29 : vector<128xf32> to vector<1x128xf32>
    %cst_8 = arith.constant 2.560000e+02 : f32
    %31 = vector.broadcast %cst_8 : f32 to vector<1x128xf32>
    %32 = arith.divf %30, %31 : vector<1x128xf32>
    %cst_9 = arith.constant 9.99999974E-6 : f32
    %33 = vector.broadcast %cst_9 : f32 to vector<1x128xf32>
    %34 = arith.addf %32, %33 : vector<1x128xf32>
    %35 = math.rsqrt %34 : vector<1x128xf32>
    %36 = vector.broadcast %35 : vector<1x128xf32> to vector<256x128xf32>
    %37 = arith.mulf %27, %36 : vector<256x128xf32>
    %cst_10 = arith.constant 0.000000e+00 : f32
    %38 = vector.broadcast %cst_10 : f32 to vector<256x128xf32>
    %39 = arith.maximumf %37, %38 : vector<256x128xf32>
    %40 = vector.shape_cast %39 : vector<256x128xf32> to vector<16x16x128xf32>
    %41 = arith.truncf %40 : vector<16x16x128xf32> to vector<16x16x128xbf16>
    %42 = vector.extract_strided_slice %41 {offsets = [1, 0, 0], sizes = [1, 16, 128], strides = [1, 1, 1]} : vector<16x16x128xbf16> to vector<1x16x128xbf16>
    %43 = vector.extract_strided_slice %41 {offsets = [14, 0, 0], sizes = [1, 16, 128], strides = [1, 1, 1]} : vector<16x16x128xbf16> to vector<1x16x128xbf16>
    %44 = tpu.concatenate %42, %41, %43 in 0 : vector<1x16x128xbf16>, vector<16x16x128xbf16>, vector<1x16x128xbf16> -> vector<18x16x128xbf16>
    %45 = vector.extract_strided_slice %44 {offsets = [0, 1, 0], sizes = [18, 1, 128], strides = [1, 1, 1]} : vector<18x16x128xbf16> to vector<18x1x128xbf16>
    %46 = vector.extract_strided_slice %44 {offsets = [0, 0, 0], sizes = [18, 15, 128], strides = [1, 1, 1]} : vector<18x16x128xbf16> to vector<18x15x128xbf16>
    %47 = tpu.concatenate %45, %46 in 1 : vector<18x1x128xbf16>, vector<18x15x128xbf16> -> vector<18x16x128xbf16>
    %48 = vector.extract_strided_slice %44 {offsets = [0, 1, 0], sizes = [18, 15, 128], strides = [1, 1, 1]} : vector<18x16x128xbf16> to vector<18x15x128xbf16>
    %49 = vector.extract_strided_slice %44 {offsets = [0, 14, 0], sizes = [18, 1, 128], strides = [1, 1, 1]} : vector<18x16x128xbf16> to vector<18x1x128xbf16>
    %50 = tpu.concatenate %48, %49 in 1 : vector<18x15x128xbf16>, vector<18x1x128xbf16> -> vector<18x16x128xbf16>
    %51 = tpu.concatenate %47, %44, %50 in 2 : vector<18x16x128xbf16>, vector<18x16x128xbf16>, vector<18x16x128xbf16> -> vector<18x16x384xbf16>
    %52 = vector.extract_strided_slice %51 {offsets = [0, 0, 0], sizes = [16, 16, 384], strides = [1, 1, 1]} : vector<18x16x384xbf16> to vector<16x16x384xbf16>
    %53 = vector.shape_cast %52 : vector<16x16x384xbf16> to vector<256x384xbf16>
    %54 = vector.extract_strided_slice %51 {offsets = [1, 0, 0], sizes = [16, 16, 384], strides = [1, 1, 1]} : vector<18x16x384xbf16> to vector<16x16x384xbf16>
    %55 = vector.shape_cast %54 : vector<16x16x384xbf16> to vector<256x384xbf16>
    %56 = vector.extract_strided_slice %51 {offsets = [2, 0, 0], sizes = [16, 16, 384], strides = [1, 1, 1]} : vector<18x16x384xbf16> to vector<16x16x384xbf16>
    %57 = vector.shape_cast %56 : vector<16x16x384xbf16> to vector<256x384xbf16>
    %58 = tpu.concatenate %53, %55, %57 in 1 : vector<256x384xbf16>, vector<256x384xbf16>, vector<256x384xbf16> -> vector<256x1152xbf16>
    %c0_11 = arith.constant 0 : index
    %c0_12 = arith.constant 0 : index
    %59 = vector.load %arg3[%c0_11, %c0_12] : memref<1152x128xbf16, #tpu.memory_space<vmem>>, vector<1152x128xbf16>
    %cst_13 = arith.constant dense<0.000000e+00> : vector<256x128xf32>
    %60 = tpu.matmul %58, %59, %cst_13 {dimension_numbers = #tpu.dot_dimension_numbers<[1], [0], [0], [1], [0, 0, 1, 1], [], []>} : vector<256x1152xbf16>, vector<1152x128xbf16>, vector<256x128xf32> -> vector<256x128xf32>
    %cst_14 = arith.constant dense<0.000000e+00> : vector<128xf32>
    %61 = vector.multi_reduction <add>, %60, %cst_14 [0] : vector<256x128xf32> to vector<128xf32>
    %62 = vector.shape_cast %61 : vector<128xf32> to vector<1x128xf32>
    %cst_15 = arith.constant 2.560000e+02 : f32
    %63 = vector.broadcast %cst_15 : f32 to vector<1x128xf32>
    %64 = arith.divf %62, %63 : vector<1x128xf32>
    %65 = vector.broadcast %64 : vector<1x128xf32> to vector<256x128xf32>
    %66 = arith.subf %60, %65 : vector<256x128xf32>
    %67 = arith.mulf %66, %66 : vector<256x128xf32>
    %cst_16 = arith.constant dense<0.000000e+00> : vector<128xf32>
    %68 = vector.multi_reduction <add>, %67, %cst_16 [0] : vector<256x128xf32> to vector<128xf32>
    %69 = vector.shape_cast %68 : vector<128xf32> to vector<1x128xf32>
    %cst_17 = arith.constant 2.560000e+02 : f32
    %70 = vector.broadcast %cst_17 : f32 to vector<1x128xf32>
    %71 = arith.divf %69, %70 : vector<1x128xf32>
    %cst_18 = arith.constant 9.99999974E-6 : f32
    %72 = vector.broadcast %cst_18 : f32 to vector<1x128xf32>
    %73 = arith.addf %71, %72 : vector<1x128xf32>
    %74 = math.rsqrt %73 : vector<1x128xf32>
    %75 = vector.broadcast %74 : vector<1x128xf32> to vector<256x128xf32>
    %76 = arith.mulf %66, %75 : vector<256x128xf32>
    %77 = vector.shape_cast %76 : vector<256x128xf32> to vector<16x16x128xf32>
    %78 = arith.addf %1, %77 : vector<16x16x128xf32>
    %c0_19 = arith.constant 0 : index
    %c0_20 = arith.constant 0 : index
    %c0_21 = arith.constant 0 : index
    %c0_22 = arith.constant 0 : index
    %79 = vector.load %arg4[%c0_19, %c0_20, %c0_21, %c0_22] : memref<1x16x16x128xf32, #tpu.memory_space<vmem>>, vector<1x16x16x128xf32>
    %80 = vector.shape_cast %79 : vector<1x16x16x128xf32> to vector<16x16x128xf32>
    %81 = vector.shape_cast %78 : vector<16x16x128xf32> to vector<1x16x16x128xf32>
    tpu.vector_store %arg4[%c0_19, %c0_20, %c0_21, %c0_22], %81 {strides = array<i32>} : memref<1x16x16x128xf32, #tpu.memory_space<vmem>>, vector<1x16x16x128xf32>,
    return
  }
  func.func @transform_0(%arg0: i32) -> (i32, i32, i32, i32) {
    %c0_i32 = arith.constant 0 : i32
    %c0_i32_0 = arith.constant 0 : i32
    %c0_i32_1 = arith.constant 0 : i32
    %c0_i32_2 = arith.constant 0 : i32
    return %arg0, %c0_i32, %c0_i32_0, %c0_i32_1 : i32, i32, i32, i32
  }
  func.func @transform_1(%arg0: i32) -> (i32, i32) {
    %c0_i32 = arith.constant 0 : i32
    %c0_i32_0 = arith.constant 0 : i32
    %c0_i32_1 = arith.constant 0 : i32
    return %c0_i32, %c0_i32_0 : i32, i32
  }
  func.func @transform_2(%arg0: i32) -> (i32, i32) {
    %c0_i32 = arith.constant 0 : i32
    %c0_i32_0 = arith.constant 0 : i32
    %c0_i32_1 = arith.constant 0 : i32
    return %c0_i32, %c0_i32_0 : i32, i32
  }
  func.func @transform_3(%arg0: i32) -> (i32, i32, i32, i32) {
    %c0_i32 = arith.constant 0 : i32
    %c0_i32_0 = arith.constant 0 : i32
    %c0_i32_1 = arith.constant 0 : i32
    %c0_i32_2 = arith.constant 0 : i32
    return %arg0, %c0_i32, %c0_i32_0, %c0_i32_1 : i32, i32, i32, i32
  }
}

</mosaic_0001>

<bundles_post_ra>
// kernel: residual_block_forward.1
= control target key start
LH: loop header
LB: loop body
LE: loop exit
PB: predicated region body
PF: predicated region fallthrough
CT: control target
= control target key end

     0   :  { %8 = vsyncpa [#allocation3], 0  ;;  %s7899_s0 = inlined_call_operand.hbm [shape: f32[2,16,16,128], index: 0, kind: input, shape index: {}]   ;;  %s7900_s1 = inlined_call_operand.hbm [shape: bf16[1152,128], index: 1, kind: input, shape index: {}]   ;;  %s7901_s2 = inlined_call_operand.hbm [shape: bf16[1152,128], index: 2, kind: input, shape index: {}]   ;;  %s7902_s3 = inlined_call_operand.hbm [shape: f32[2,16,16,128], index: 3, kind: output, shape index: {}]  }
   0x1   :  { %10 = vsyncpa [#allocation3 + $0x1], 0 }
   0x2   :  { %11 = vsyncpa [#allocation6], 0 }
   0x3   :  { %12 = vsyncpa [#allocation4], 0 }
   0x4   :  { %14 = vsyncpa [#allocation4 + $0x1], 0  ;;  %s5727_s12 = smov 0   ;;  %s5729_s13 = smov 0  }
   0x5   :  { %s5731_s14 = smov 0   ;;  %s5733_s15 = smov 0  }
   0x6 LB: > { %s5748_s16 = sadd.s32 4294967295, %s5695_s15   ;;  %s4082_s17 = sadd.s32 4294967294, %s5695_s15   ;;  %s5695_s15 = sphi %s5733_s15, %s7926_s15   ;;  %s5691_s14 = sphi %s5731_s14, %s7925_s14   ;;  %s5687_s13 = sphi %s5729_s13, %s7924_s13   ;;  %s5683_s12 = sphi %s5727_s12, %s7923_s12  }
   0x7   : > { %p40_p0 = scmp.ne.s32.totalorder %s5687_s13, %s5683_s12  ;;  %p7903_p1 = scmp.eq.s32.totalorder %s5748_s16, 0 }
   0x8   : > { %p112_p3 = scmp.eq.s32.totalorder %s4082_s17, 1  ;;  %p4083_p5 = scmp.ge.s32.totalorder %s5695_s15, 1 }
   0x9   : > { %p5757_p4 = por %p7903_p1, %p40_p0  ;;  %p119_p7 = scmp.lt.s32.totalorder %s5695_s15, 3 }
   0xa   : > { %p5762_p6 = por %p112_p3, %p40_p0  ;;  %s5697_s21 = smov [#allocation5]  }
   0xb   : > { %s7906_s18 = scalar_select %p5757_p4, 1, 0 }
   0xc   : > { %s7907_s19 = scalar_select %p5762_p6, 1, 0 }
   0xd   : > { %p5767_p8 = pnand %p4083_p5, %p119_p7  ;;  %s131_s22 = sshll.u32 %s5697_s21, 4  ;;  %s5771_s22 = int_to_ptr.vmem [resolvable:$true] %s131_s22 }
   0xe   : > { %s5698_s24 = smov [#allocation7]   ;;  %s5539_s28 = scalar_lea.hbm %s7900_s1, 9216 }
   0xf   : > { %p5298_p9 = pneg %p5767_p8  ;;  %s144_s25 = sshll.u32 %s5698_s24, 4  ;;  %s5782_s25 = int_to_ptr.vmem [resolvable:$true] %s144_s25 }
  0x10   : > { %p5540_p12 = scmp.ne.s32.totalorder %s7900_s1, %s5539_s28  ;;  %p5546_p5 = scmp.lt.u32.totalorder %s5539_s28, %s7900_s1 }
  0x11   : > { %p5778_p11 = pnand %p5298_p9, %p7903_p1 }
  0x13   : > { %p5541_p13 = pneg %p5778_p11 }
  0x15   : > { %p5542_p0 = pnand %p5541_p13, %p5540_p12 }
  0x17   : > { %p5543_p3 = pneg %p5542_p0 }
  0x19   : > { %p5548_p7 = pnand %p5546_p5, %p5543_p3 }
  0x1b   : > { %5551 = shalt.err (!%p5548_p7)
}
  0x1c   : > { %s5552_s6 = scalar_lea.vmem %s5771_s22, 9216  ;;  %p5560_p2 = scmp.lt.s32.totalorder %s5771_s22, %s5771_s22 }
  0x1d   : > { %p5553_p9 = scmp.ne.s32.totalorder %s5771_s22, %s5552_s6  ;;  %p5561_p12 = scmp.lt.s32.totalorder %s5552_s6, %s5552_s6 }
  0x1f   : > { %p5555_p10 = pnand %p5553_p9, %p5541_p13  ;;  %p5562_p0 = por %p5561_p12, %p5560_p2 }
  0x21   : > { %p5556_p1 = pneg %p5555_p10 }
  0x23   : > { %p5563_p6 = pnand %p5562_p0, %p5556_p1 }
  0x25   : > { %5566 = shalt.err (!%p5563_p6)
}
  0x26   : > { %s5699_s7 = smov 64   ;;  %s5700_s8 = smov 4  }
  0x27   : > { %5301 = dma.hbm_to_vmem [thread:$0]  (!%p5778_p11), %s7900_s1, 9216, %s5771_s22, [#allocation6], %s5699_s7, %s5699_s7, %s5700_s8  }
  0x28   : > { %s5567_s21 = scalar_lea.hbm %s7901_s2, 9216 }
  0x29   : > { %p5568_p2 = scmp.ne.s32.totalorder %s7901_s2, %s5567_s21  ;;  %p5574_p10 = scmp.lt.u32.totalorder %s5567_s21, %s7901_s2 }
  0x2b   : > { %p5570_p1 = pnand %p5568_p2, %p5541_p13 }
  0x2d   : > { %p5571_p6 = pneg %p5570_p1 }
  0x2f   : > { %p5576_p3 = pnand %p5574_p10, %p5571_p6 }
  0x31   : > { %5579 = shalt.err (!%p5576_p3)
}
  0x32   : > { %s5580_s22 = scalar_lea.vmem %s5782_s25, 9216  ;;  %p5588_p12 = scmp.lt.s32.totalorder %s5782_s25, %s5782_s25 }
  0x33   : > { %p5581_p5 = scmp.ne.s32.totalorder %s5782_s25, %s5580_s22  ;;  %p5589_p0 = scmp.lt.s32.totalorder %s5580_s22, %s5580_s22 }
  0x35   : > { %p5583_p7 = pnand %p5581_p5, %p5541_p13  ;;  %p5590_p2 = por %p5589_p0, %p5588_p12 }
  0x37   : > { %p5584_p9 = pneg %p5583_p7 }
  0x39   : > { %p5591_p1 = pnand %p5590_p2, %p5584_p9 }
  0x3b   : > { %5594 = shalt.err (!%p5591_p1)
}
  0x3c   : > { %5304 = dma.hbm_to_vmem [thread:$0]  (!%p5778_p11), %s7901_s2, 9216, %s5782_s25, [#allocation6], %s5699_s7, %s5699_s7, %s5700_s8  }
  0x3d   : > { %s5837_s4 = sadd.s32 1, %s5695_s15   ;;  %s27_s23 = sadd.s32 1, %s5691_s14 }
  0x3e   : > { %s24_s5 = ssub.s32 %s5695_s15, %s5837_s4  ;;  %p34_p13 = scmp.ne.s32.totalorder %s5691_s14, %s5687_s13 }
  0x3f   : > { %p25_p6 = scmp.eq.s32.totalorder %s24_s5, 0  ;;  %p35_p10 = scmp.eq.s32.totalorder %s5695_s15, 0 }
  0x40   : > { %p7910_p3 = scmp.eq.s32.totalorder %s5748_s16, 1  ;;  %p5315_p7 = scmp.lt.s32.totalorder %s5695_s15, 2 }
  0x41   : > { %s5853_s9 = scalar_select %p25_p6, %s5691_s14, %s27_s23  }
  0x42   : > { %p5847_p5 = por %p7910_p3, %p34_p13  ;;  %p36_p9 = por %p35_p10, %p34_p13 }
  0x43   : > { %s158_s10 = sand.u32 1, %s5691_s14   ;;  %s4244_s25 = sshll.u32 %s5695_s15, 12 }
  0x44   : > { %s7911_s6 = scalar_select %p5847_p5, 1, 0 }
  0x45   : > { %s4087_s11 = sshll.u32 %s158_s10, 8  ;;  %s5860_s17 = scalar_lea.hbm %s7899_s0, %s4244_s25 }
  0x46   : > { %s162_s21 = scalar_lea.vmem [#allocation2], %s4087_s11  ;;  %p5864_p11 = pnand %p5315_p7, %p36_p9 }
  0x47   : > { %s169_s24 = sshll.u32 %s162_s21, 4  ;;  %s5868_s27 = scalar_lea.sflag [#allocation3], %s158_s10  ;;  %s5862_s24 = int_to_ptr.vmem [resolvable:$true] %s169_s24 }
  0x48   : > { %s5595_s28 = scalar_lea.hbm %s5860_s17, 4096  ;;  %p5597_p0 = pneg %p5864_p11 }
  0x49   : > { %p5596_p12 = scmp.ne.s32.totalorder %s5860_s17, %s5595_s28  ;;  %s5600_s30 = scalar_lea.hbm %s7899_s0, 8192 }
  0x4a   : > { %p5601_p13 = scmp.lt.u32.totalorder %s5860_s17, %s7899_s0  ;;  %p5602_p6 = scmp.lt.u32.totalorder %s5600_s30, %s5595_s28 }
  0x4b   : > { %p5598_p2 = pnand %p5597_p0, %p5596_p12  ;;  %p5604_p3 = scmp.lt.u32.totalorder %s5595_s28, %s5860_s17 }
  0x4c   : > { %p5603_p10 = por %p5602_p6, %p5601_p13 }
  0x4d   : > { %p5599_p1 = pneg %p5598_p2 }
  0x4e   : > { %p5605_p7 = por %p5604_p3, %p5603_p10 }
  0x50   : > { %p5606_p9 = pnand %p5605_p7, %p5599_p1 }
  0x52   : > { %5609 = shalt.err (!%p5606_p9)
}
  0x53   : > { %s5610_s10 = scalar_lea.vmem %s5862_s24, 4096  ;;  %s5701_s11 = smov [#allocation2]  }
  0x54   : > { %p5611_p12 = scmp.ne.s32.totalorder %s5862_s24, %s5610_s10  ;;  %s5615_s25 = sshll.u32 %s5701_s11, 4  ;;  %s5616_s25 = int_to_ptr.vmem [resolvable:$false] %s5615_s25 }
  0x55   : > { %s5617_s7 = scalar_lea.vmem %s5616_s25, 8192  ;;  %p5618_p4 = scmp.lt.s32.totalorder %s5862_s24, %s5616_s25 }
  0x56   : > { %p5613_p2 = pnand %p5611_p12, %p5597_p0  ;;  %p5619_p13 = scmp.lt.s32.totalorder %s5617_s7, %s5610_s10 }
  0x58   : > { %p5614_p5 = pneg %p5613_p2  ;;  %p5620_p6 = por %p5619_p13, %p5618_p4 }
  0x5a   : > { %p5621_p10 = pnand %p5620_p6, %p5614_p5 }
  0x5c   : > { %5624 = shalt.err (!%p5621_p10)
}
  0x5d   : > { %s5702_s8 = smov 128   ;;  %s5703_s21 = smov 8  }
  0x5e   : > { %5308 = dma.hbm_to_vmem [thread:$0]  (!%p5864_p11), %s5860_s17, 4096, %s5862_s24, %s5868_s27, %s5702_s8, %s5702_s8, %s5703_s21  }
  0x5f   : > { %181 = sbr.rel (%p5767_p8) target bundleno = 1489 (0x5d1), region = 32  ;;  %s5899_s28 = sand.u32 (!%p5767_p8), 1, %s5687_s13  }
  0x60   : > { %s4091_s22 = sshll.u32 (!%p5767_p8), %s5899_s28, 8  ;;  %s184_s29 = scalar_lea.sflag (!%p5767_p8), [#allocation3], %s5899_s28 }
  0x61   : > { %s5905_s30 = scalar_lea.vmem (!%p5767_p8), [#allocation2], %s4091_s22  ;;  %p7913_p4 = scmp.ne.s32.totalorder (!%p5767_p8), %s7906_s18, 0 }
  0x66   : > { %5670 = dma.done.wait (%p7913_p4), %s184_s29, 4096  }
  0x67   : > { %5672 = vsyncadd (%p7913_p4), %s184_s29, 4294963200  ;;  %p7914_p5 = scmp.eq.s32.totalorder %s5748_s16, 0 }
  0x69   : > { %5674 = dma.done.wait (%p7914_p5), [#allocation6], 18432   ;;  %p7915_p8 = pmov %p7914_p5 }
  0x6a   : > { %v5359_v0 = vld [vmem:[#allocation5 + $0x40] sm:$0xff]   ;;  %v5363_v4 = vld [vmem:[#allocation5 + $0x48] sm:$0xff]   ;;  %v5367_v8 = vld [vmem:[#allocation5 + $0x50] sm:$0xff]   ;;  %vm412_vm0 = vsmask.f32 256  ;;  %vm411_vm1 = vcmask 1040384  }
  0x6b   : > { %5676 = vsyncadd (%p7915_p8), [#allocation6], 4294948864  ;;  %v5360_v1 = vld [vmem:[#allocation5 + $0xc0] sm:$0xff]   ;;  %4246 = vmatprep.subr.bf16.mxu0 %v5359_v0  ;;  %v5364_v5 = vld [vmem:[#allocation5 + $0xc8] sm:$0xff]   ;;  %vm494_vm2 = vcmask 1047552   ;;  %s7726_s18 = scalar_lea.vmem [#allocation8], %s4091_s22 }
  0x6c   : > { %v5361_v2 = vld [vmem:[#allocation5] sm:$0xff]   ;;  %4358 = vmatprep.subr.bf16.mxu1 %v5360_v1  ;;  %v5365_v6 = vld [vmem:[#allocation5 + $0x8] sm:$0xff]   ;;  %v5368_v9 = vld [vmem:[#allocation5 + $0xd0] sm:$0xff]   ;;  %vm495_vm3 = vsmask.f32 7424  ;;  %s4245_s20 = sshll.u32 %s5748_s16, 12 }
  0x6d   : > { %v5362_v3 = vld [vmem:[#allocation5 + $0x80] sm:$0xff]   ;;  %4247 = vmatpush3.bf16.msra.mxu0 %v5361_v2  ;;  %v5366_v7 = vld [vmem:[#allocation5 + $0x88] sm:$0xff]   ;;  %v5369_v10 = vld [vmem:[#allocation5 + $0x10] sm:$0xff]   ;;  %s3990_s17 = sshll.u32 %s7726_s18, 4  ;;  %s7831_s27 = scalar_lea.hbm %s7902_s3, %s4245_s20  ;;  %s7835_s17 = int_to_ptr.vmem [resolvable:$true] %s3990_s17 }
  0x6e   : > { %4359 = vmatpush3.bf16.msra.mxu1 %v5362_v3  ;;  %4248 = vmatprep.subr.bf16.mxu0 %v5363_v4  ;;  %v5370_v11 = vld [vmem:[#allocation5 + $0x90] sm:$0xff]   ;;  %v5371_v12 = vld [vmem:[#allocation5 + $0x58] sm:$0xff]   ;;  %v5375_v16 = vld [vmem:[#allocation5 + $0x60] sm:$0xff]   ;;  %s3977_s16 = scalar_lea.sflag [#allocation4], %s5899_s28  ;;  %s5625_s23 = scalar_lea.vmem %s7835_s17, 4096 }
  0x6f   : > { %4360 = vmatprep.subr.bf16.mxu1 %v5364_v5  ;;  %v5372_v13 = vld [vmem:[#allocation5 + $0xd8] sm:$0xff]   ;;  %v5376_v17 = vld [vmem:[#allocation5 + $0xe0] sm:$0xff]   ;;  %v5379_v20 = vld [vmem:[#allocation5 + $0x68] sm:$0xff]   ;;  %p5626_p11 = scmp.ne.s32.totalorder %s7835_s17, %s5625_s23  ;;  %p7920_p0 = scmp.ne.s32.totalorder %s7911_s6, 0 }
  0x70   : > { %v5373_v14 = vld [vmem:[#allocation5 + $0x18] sm:$0xff]   ;;  %v5377_v18 = vld [vmem:[#allocation5 + $0x20] sm:$0xff]   ;;  %v5380_v21 = vld [vmem:[#allocation5 + $0xe8] sm:$0xff]   ;;  %s5704_s5 = smov [#allocation8]  }
  0x71   : > { %4249 = vmatpush3.bf16.msra.mxu0 %v5365_v6  ;;  %v5374_v15 = vld [vmem:[#allocation5 + $0x98] sm:$0xff]   ;;  %v5378_v19 = vld [vmem:[#allocation5 + $0xa0] sm:$0xff]   ;;  %v5381_v22 = vld [vmem:[#allocation5 + $0x28] sm:$0xff]   ;;  %p5627_p1 = pnand %p5626_p11, %p7920_p0  ;;  %s5629_s10 = sshll.u32 %s5704_s5, 4  ;;  %s5630_s10 = int_to_ptr.vmem [resolvable:$false] %s5629_s10 }
  0x72   : > { %4361 = vmatpush3.bf16.msra.mxu1 %v5366_v7  ;;  %4250 = vmatprep.subr.bf16.mxu0 %v5367_v8  ;;  %v5382_v23 = vld [vmem:[#allocation5 + $0xa8] sm:$0xff]   ;;  %v5383_v24 = vld [vmem:[#allocation5 + $0x70] sm:$0xff]   ;;  %v5387_v28 = vld [vmem:[#allocation5 + $0x78] sm:$0xff]   ;;  %s5631_s11 = scalar_lea.vmem %s5630_s10, 8192  ;;  %p5632_p7 = scmp.lt.s32.totalorder %s7835_s17, %s5630_s10 }
  0x73   : > { %4362 = vmatprep.subr.bf16.mxu1 %v5368_v9  ;;  %v5384_v25 = vld [vmem:[#allocation5 + $0xf0] sm:$0xff]   ;;  %v5388_v29 = vld [vmem:[#allocation5 + $0xf8] sm:$0xff]   ;;  %v219_v34 = vld [vmem:[%s5905_s30] sm:$0xff]  ;;  %p5628_p3 = pneg %p5627_p1  ;;  %p5633_p9 = scmp.lt.s32.totalorder %s5631_s11, %s5625_s23 }
  0x74   : > { %v5385_v26 = vld [vmem:[#allocation5 + $0x30] sm:$0xff]   ;;  %v5389_v30 = vld [vmem:[#allocation5 + $0x38] sm:$0xff]   ;;  %v220_v36 = vld [vmem:[%s5905_s30 + $0x8] sm:$0xff] }
  0x75   : > { %4251 = vmatpush3.bf16.msra.mxu0 %v5369_v10  ;;  %v5386_v27 = vld [vmem:[#allocation5 + $0xb0] sm:$0xff]   ;;  %v5390_v31 = vld [vmem:[#allocation5 + $0xb8] sm:$0xff]   ;;  %v5921_v37 = vpack.c.bf16 %v220_v36, %v219_v34  ;;  %v5391_v38 = vld [vmem:[#allocation5 + $0x140] sm:$0xff]   ;;  %p5634_p12 = por %p5633_p9, %p5632_p7 }
  0x76   : > { %4363 = vmatpush3.bf16.msra.mxu1 %v5370_v11  ;;  %4252 = vmatprep.subr.bf16.mxu0 %v5371_v12  ;;  %v221_v32 = vld [vmem:[%s5905_s30 + $0x10] sm:$0xff]  ;;  %v222_v33 = vld [vmem:[%s5905_s30 + $0x18] sm:$0xff]  ;;  %v223_v41 = vld [vmem:[%s5905_s30 + $0x20] sm:$0xff] }
  0x77   : > { %4364 = vmatprep.subr.bf16.mxu1 %v5372_v13  ;;  %v5918_v35 = vpack.c.bf16 %v222_v33, %v221_v32  ;;  %v224_v42 = vld [vmem:[%s5905_s30 + $0x28] sm:$0xff]  ;;  %v271_v43 = vshrl.u32 %v5921_v37, 16  ;;  %v336_v44 = vshll.u32 %v5921_v37, 16  ;;  %vm5933_vm4 = vmand %vm411_vm1, %vm412_vm0  ;;  %v5392_v54 = vld [vmem:[#allocation5 + $0x100] sm:$0xff]   ;;  %p5635_p2 = pnand %p5634_p12, %p5628_p3 }
  0x78   : > { %v5930_v45 = vpack.c.bf16 %v224_v42, %v223_v41  ;;  %vm5938_vm5 = vmand %vm494_vm2, %vm495_vm3  ;;  %v225_v55 = vld [vmem:[%s5905_s30 + $0x30] sm:$0xff]  ;;  %v226_v56 = vld [vmem:[%s5905_s30 + $0x38] sm:$0xff] }
  0x79   : > { %4253 = vmatpush3.bf16.msra.mxu0 %v5373_v14  ;;  %1121 = vmatprep.mubr.bf16.mxu0 %v5918_v35  ;;  %v268_v39 = vshrl.u32 %v5918_v35, 16  ;;  %v332_v40 = vshll.u32 %v5918_v35, 16  ;;  %v335_v49 = vrot.slane %v271_v43, 7  ;;  %v432_v60 = vrot.slane %v336_v44, 1  ;;  %v5393_v61 = vld [vmem:[#allocation5 + $0x148] sm:$0xff]   ;;  %v5395_v3 = vld [vmem:[#allocation5 + $0x150] sm:$0xff]  }
  0x7a   : > { %4365 = vmatpush3.bf16.msra.mxu1 %v5374_v15  ;;  %4254 = vmatprep.subr.bf16.mxu0 %v5375_v16  ;;  %v5943_v51 = vshrl.u32 %v5930_v45, 16  ;;  %v5960_v0 = vshll.u32 %v5930_v45, 16  ;;  %v5962_v1 = vpack.c.bf16 %v226_v56, %v225_v55  ;;  %v5394_v2 = vld [vmem:[#allocation5 + $0x108] sm:$0xff]   ;;  %v227_v7 = vld [vmem:[%s5905_s30 + $0x40] sm:$0xff]  ;;  %v5396_v9 = vld [vmem:[#allocation5 + $0x110] sm:$0xff]  }
  0x7b   : > { %4366 = vmatprep.subr.bf16.mxu1 %v5376_v17  ;;  %v331_v47 = vrot.slane %v268_v39, 7  ;;  %v430_v48 = vrot.slane %v332_v40, 1  ;;  %v338_v57 = vor.u32 %v336_v44, %v335_v49  ;;  %v433_v4 = vor.u32 %v432_v60, %v271_v43  ;;  %v228_v8 = vld [vmem:[%s5905_s30 + $0x48] sm:$0xff]  ;;  %v5397_v10 = vld [vmem:[#allocation5 + $0x158] sm:$0xff]   ;;  %v5400_v12 = vld [vmem:[#allocation5 + $0x1c0] sm:$0xff]  }
  0x7c   : > { %v339_v63 = vrot.slane %v5943_v51, 7  ;;  %v5969_v6 = vshrl.u32 %v5962_v1, 16  ;;  %v5984_v15 = vshll.u32 %v5962_v1, 16  ;;  %v5986_v16 = vpack.c.bf16 %v228_v8, %v227_v7  ;;  %v5398_v17 = vld [vmem:[#allocation5 + $0x118] sm:$0xff]   ;;  %v5407_v41 = vld [vmem:[#allocation5 + $0x170] sm:$0xff]   ;;  %v239_v7 = vld [vmem:[%s5905_s30 + $0xa0] sm:$0xff] }
  0x7d   : > { %4255 = vmatpush3.bf16.msra.mxu0 %v5377_v18  ;;  %v334_v52 = vor.u32 %v332_v40, %v331_v47  ;;  %v431_v53 = vor.u32 %v430_v48, %v268_v39  ;;  %v415_v62 = vsel %vm5933_vm4, %v271_v43, %v338_v57  ;;  %v5975_v11 = vsel %vm5938_vm5, %v433_v4, %v336_v44  ;;  %v5399_v18 = vld [vmem:[#allocation5 + $0x160] sm:$0xff]   ;;  %v5408_v44 = vld [vmem:[#allocation5 + $0x1d0] sm:$0xff]   ;;  %v240_v8 = vld [vmem:[%s5905_s30 + $0xa8] sm:$0xff] }
  0x7e   : > { %4367 = vmatpush3.bf16.msra.mxu1 %v5378_v19  ;;  %4256 = vmatprep.subr.bf16.mxu0 %v5379_v20  ;;  %v342_v5 = vor.u32 %v5960_v0, %v339_v63  ;;  %v343_v14 = vrot.slane %v5969_v6, 7  ;;  %v5402_v19 = vld [vmem:[#allocation5 + $0x180] sm:$0xff]   ;;  %v229_v20 = vld [vmem:[%s5905_s30 + $0x50] sm:$0xff]  ;;  %v6008_v33 = vshll.u32 %v5986_v16, 16  ;;  %v238_v63 = vld [vmem:[%s5905_s30 + $0x98] sm:$0xff] }
  0x7f   : > { %4368 = vmatprep.subr.bf16.mxu1 %v5380_v21  ;;  %v5949_v58 = vsel %vm5933_vm4, %v268_v39, %v334_v52  ;;  %v5953_v59 = vsel %vm5938_vm5, %v431_v53, %v332_v40  ;;  %1282 = vmatprep.mubr.bf16.mxu1 %v415_v62  ;;  %v230_v21 = vld [vmem:[%s5905_s30 + $0x58] sm:$0xff]  ;;  %v5405_v40 = vld [vmem:[#allocation5 + $0x128] sm:$0xff]   ;;  %v235_v43 = vld [vmem:[%s5905_s30 + $0x80] sm:$0xff] }
  0x80   : > { %v5980_v13 = vsel %vm5933_vm4, %v5943_v51, %v342_v5  ;;  %v6010_v34 = vpack.c.bf16 %v230_v21, %v229_v20  ;;  %v234_v39 = vld [vmem:[%s5905_s30 + $0x78] sm:$0xff]  ;;  %v236_v52 = vld [vmem:[%s5905_s30 + $0x88] sm:$0xff]  ;;  %v5410_v55 = vld [vmem:[#allocation5 + $0x190] sm:$0xff]   ;;  %v438_v56 = vrot.slane %v6008_v33, 1  ;;  %v6069_v20 = vpack.c.bf16 %v240_v8, %v239_v7 }
  0x81   : > { %4257 = vmatpush3.bf16.msra.mxu0 %v5381_v22  ;;  %v346_v22 = vor.u32 %v5984_v15, %v343_v14  ;;  %v237_v57 = vld [vmem:[%s5905_s30 + $0x90] sm:$0xff]  ;;  %v6056_v5 = vpack.c.bf16 %v236_v52, %v235_v43  ;;  %v5413_v14 = vld [vmem:[#allocation5 + $0x178] sm:$0xff]   ;;  %v5417_v43 = vld [vmem:[#allocation5 + $0x1e8] sm:$0xff]  }
  0x82   : > { %4369 = vmatpush3.bf16.msra.mxu1 %v5382_v23  ;;  %4258 = vmatprep.subr.bf16.mxu0 %v5383_v24  ;;  %v5995_v23 = vshrl.u32 %v5986_v16, 16  ;;  %v231_v24 = vld [vmem:[%s5905_s30 + $0x60] sm:$0xff]  ;;  %v6023_v48 = vshrl.u32 %v6010_v34, 16  ;;  %v5414_v21 = vld [vmem:[#allocation5 + $0x138] sm:$0xff]   ;;  %v5497_v46 = vld [vmem:[#allocation7 + $0x210] sm:$0xff]  }
  0x83   : > { %4370 = vmatprep.subr.bf16.mxu1 %v5384_v25  ;;  %v5404_v25 = vld [vmem:[#allocation5 + $0x1c8] sm:$0xff]   ;;  %v5498_v50 = vld [vmem:[#allocation7 + $0x218] sm:$0xff]  }
  0x84   : > { %v347_v32 = vrot.slane %v5995_v23, 7  ;;  %v351_v4 = vrot.slane %v6023_v48, 7 }
  0x85   : > { %4259 = vmatpush3.bf16.msra.mxu0 %v5385_v26  ;;  %v5401_v26 = vld [vmem:[#allocation5 + $0x120] sm:$0xff]  }
  0x86   : > { %4371 = vmatpush3.bf16.msra.mxu1 %v5386_v27  ;;  %4260 = vmatprep.subr.bf16.mxu0 %v5387_v28  ;;  %v232_v27 = vld [vmem:[%s5905_s30 + $0x68] sm:$0xff]  ;;  %v350_v47 = vor.u32 %v6008_v33, %v347_v32 }
  0x87   : > { %4372 = vmatprep.subr.bf16.mxu1 %v5388_v29  ;;  %v5403_v28 = vld [vmem:[#allocation5 + $0x168] sm:$0xff]   ;;  %v434_v29 = vrot.slane %v5960_v0, 1  ;;  %v6013_v36 = vpack.c.bf16 %v232_v27, %v231_v24  ;;  %v241_v27 = vld [vmem:[%s5905_s30 + $0xb0] sm:$0xff] }
  0x89   : > { %4261 = vmatpush3.bf16.msra.mxu0 %v5389_v30  ;;  %v5406_v30 = vld [vmem:[#allocation5 + $0x188] sm:$0xff]   ;;  %v435_v42 = vor.u32 %v434_v29, %v5943_v51  ;;  %v6029_v53 = vshrl.u32 %v6013_v36, 16  ;;  %v436_v51 = vrot.slane %v5984_v15, 1  ;;  %v6082_v29 = vshll.u32 %v6056_v5, 16 }
  0x8a   : > { %4373 = vmatpush3.bf16.msra.mxu1 %v5390_v31  ;;  %4470 = vmatprep.subr.bf16.mxu0 %v5391_v38  ;;  %v6004_v31 = vsel %vm5933_vm4, %v5969_v6, %v346_v22  ;;  %v233_v38 = vld [vmem:[%s5905_s30 + $0x70] sm:$0xff] }
  0x8b   : > { %4582 = vmatprep.subr.bf16.mxu1 %v5400_v12  ;;  %v6025_v49 = vpack.c.bf16 %v234_v39, %v233_v38  ;;  %v6037_v60 = vsel %vm5938_vm5, %v435_v42, %v5960_v0  ;;  %v244_v42 = vld [vmem:[%s5905_s30 + $0xc8] sm:$0xff]  ;;  %v446_v52 = vrot.slane %v6082_v29, 1 }
  0x8c   : > { %1122 = vmatmul.mubr.bf16.vlgmr.msra.gmra.mrb[0].mxu0 %v5949_v58 }
  0x8d   : > { %4471 = vmatpush3.bf16.msra.mxu0 %v5392_v54  ;;  %1283 = vmatmul.mubr.bf16.vlgmr.msra.gmra.mrb[0].mxu1 %v5953_v59  ;;  %v5409_v54 = vld [vmem:[#allocation5 + $0x130] sm:$0xff]   ;;  %v6054_v0 = vshrl.u32 %v6025_v49, 16 }
  0x8e   : > { %1129 = vmatprep.mubr.bf16.mxu0 %v5921_v37  ;;  %1290 = vmatprep.mubr.bf16.mxu1 %v5949_v58 }
  0x8f   : > { %4472 = vmatprep.subr.bf16.mxu0 %v5393_v61  ;;  %4583 = vmatpush3.bf16.msra.mxu1 %v5402_v19  ;;  %v6040_v61 = vshll.u32 %v6010_v34, 16  ;;  %v6067_v19 = vpack.c.bf16 %v238_v63, %v237_v57  ;;  %v359_v24 = vrot.slane %v6054_v0, 7  ;;  %v439_v63 = vor.u32 %v438_v56, %v5995_v23 }
  0x90   : > { %4584 = vmatprep.subr.bf16.mxu1 %v5404_v25  ;;  %v6074_v25 = vshll.u32 %v6025_v49, 16 }
  0x91   : > { %4473 = vmatpush3.bf16.msra.mxu0 %v5394_v2  ;;  %v5411_v2 = vld [vmem:[#allocation5 + $0x1d8] sm:$0xff]   ;;  %v440_v12 = vrot.slane %v6040_v61, 1  ;;  %v354_v22 = vor.u32 %v6040_v61, %v351_v4  ;;  %v6091_v39 = vshrl.u32 %v6067_v19, 16  ;;  %v6135_v56 = vsel %vm5938_vm5, %v439_v63, %v6008_v33 }
  0x92   : > { %4474 = vmatprep.subr.bf16.mxu0 %v5395_v3  ;;  %v6050_v3 = vsel %vm5933_vm4, %v5995_v23, %v350_v47  ;;  %v444_v38 = vrot.slane %v6074_v25, 1  ;;  %v5418_v47 = vld [vmem:[#allocation5 + $0x1a8] sm:$0xff]   ;;  %v6130_v23 = vld [vmem:[#allocation5 + $0x200] sm:$0xff]   ;;  %v246_v63 = vld [vmem:[%s5905_s30 + $0xd8] sm:$0xff] }
  0x93   : > { %4585 = vmatpush3.bf16.msra.mxu1 %v5406_v30  ;;  %v5416_v30 = vld [vmem:[#allocation5 + $0x1a0] sm:$0xff]   ;;  %v441_v33 = vor.u32 %v440_v12, %v6023_v48 }
  0x94   : > { %1130 = vmatmul.mubr.bf16.gmra.mrb[4].mxu0 %v415_v62  ;;  %4586 = vmatprep.subr.bf16.mxu1 %v5408_v44  ;;  %v6043_v62 = vshll.u32 %v6013_v36, 16  ;;  %v6102_v44 = vsel %vm5933_vm4, %v6023_v48, %v354_v22 }
  0x95   : > { %1137 = vmatprep.mubr.bf16.mxu0 %v5918_v35  ;;  %4475 = vmatpush3.bf16.msra.mxu0 %v5396_v9  ;;  %v355_v9 = vrot.slane %v6029_v53, 7 }
  0x96   : > { %1291 = vmatmul.mubr.bf16.gmra.mrb[4].mxu1 %v5975_v11  ;;  %4476 = vmatprep.subr.bf16.mxu0 %v5397_v10  ;;  %v5412_v10 = vld [vmem:[#allocation5 + $0x198] sm:$0xff]  }
  0x97   : > { %1298 = vmatprep.mubr.bf16.mxu1 %v5980_v13  ;;  %4587 = vmatpush3.bf16.msra.mxu1 %v5410_v55  ;;  %v6109_v55 = vshll.u32 %v6067_v19, 16  ;;  %v358_v8 = vor.u32 %v6043_v62, %v355_v9 }
  0x98   : > { %4588 = vmatprep.subr.bf16.mxu1 %v5411_v2  ;;  %v367_v2 = vrot.slane %v6091_v39, 7 }
  0x99   : > { %4477 = vmatpush3.bf16.msra.mxu0 %v5398_v17  ;;  %v437_v17 = vor.u32 %v436_v51, %v5969_v6  ;;  %v5415_v6 = vld [vmem:[#allocation5 + $0x1e0] sm:$0xff]   ;;  %v6112_v51 = vshll.u32 %v6069_v20, 16 }
  0x9a   : > { %4478 = vmatprep.subr.bf16.mxu0 %v5399_v18  ;;  %v442_v18 = vrot.slane %v6043_v62, 1 }
  0x9b   : > { %4589 = vmatpush3.bf16.msra.mxu1 %v5412_v10  ;;  %v6087_v32 = vsel %vm5938_vm5, %v437_v17, %v5984_v15  ;;  %v448_v10 = vrot.slane %v6109_v55, 1  ;;  %v450_v17 = vrot.slane %v6112_v51, 1 }
  0x9c   : > { %1138 = vmatmul.mubr.bf16.gmra.mrb[8].mxu0 %v5949_v58  ;;  %4590 = vmatprep.subr.bf16.mxu1 %v5415_v6  ;;  %v443_v48 = vor.u32 %v442_v18, %v6029_v53 }
  0x9d   : > { %1145 = vmatprep.mubr.bf16.mxu0 %v5930_v45  ;;  %4479 = vmatpush3.bf16.msra.mxu0 %v5401_v26  ;;  %v6077_v26 = vshrl.u32 %v6056_v5, 16 }
  0x9e   : > { %1299 = vmatmul.mubr.bf16.gmra.mrb[8].mxu1 %v5953_v59  ;;  %4480 = vmatprep.subr.bf16.mxu0 %v5403_v28  ;;  %v242_v28 = vld [vmem:[%s5905_s30 + $0xb8] sm:$0xff]  ;;  %v6183_v12 = vsel %vm5938_vm5, %v443_v48, %v6043_v62  ;;  %v370_v62 = vor.u32 %v6109_v55, %v367_v2 }
  0x9f   : > { %1306 = vmatprep.mubr.bf16.mxu1 %v6004_v31  ;;  %v363_v15 = vrot.slane %v6077_v26, 7  ;;  %4591 = vmatpush3.bf16.msra.mxu1 %v5416_v30  ;;  %v6114_v57 = vpack.c.bf16 %v242_v28, %v241_v27  ;;  %v6147_v27 = vsel %vm5933_vm4, %v6029_v53, %v358_v8  ;;  %v5422_v30 = vld [vmem:[#allocation5 + $0x1b8] sm:$0xff]   ;;  %v445_v53 = vor.u32 %v444_v38, %v6054_v0 }
  0xa0   : > { %4592 = vmatprep.subr.bf16.mxu1 %v5417_v43 }
  0xa1   : > { %4481 = vmatpush3.bf16.msra.mxu0 %v5405_v40  ;;  %v6094_v40 = vshrl.u32 %v6069_v20, 16  ;;  %v6128_v22 = vshrl.u32 %v6114_v57, 16  ;;  %v6138_v9 = vshll.u32 %v6114_v57, 16 }
  0xa2   : > { %4482 = vmatprep.subr.bf16.mxu0 %v5407_v41  ;;  %v243_v41 = vld [vmem:[%s5905_s30 + $0xc0] sm:$0xff] }
  0xa3   : > { %v371_v4 = vrot.slane %v6094_v40, 7  ;;  %v6122_v7 = vpack.c.bf16 %v244_v42, %v243_v41  ;;  %4593 = vmatpush3.bf16.msra.mxu1 %v5418_v47  ;;  %v362_v41 = vor.u32 %v6074_v25, %v359_v24  ;;  %v6163_v42 = vsel %vm5938_vm5, %v441_v33, %v6040_v61  ;;  %v245_v24 = vld [vmem:[%s5905_s30 + $0xd0] sm:$0xff] }
  0xa4   : > { %1146 = vmatmul.mubr.bf16.gmra.mrb[12].mxu0 %v5980_v13  ;;  %v375_v47 = vrot.slane %v6128_v22, 7  ;;  %v366_v61 = vor.u32 %v6082_v29, %v363_v15  ;;  %v6200_v18 = vpack.c.bf16 %v246_v63, %v245_v24  ;;  %v6205_v15 = vsel %vm5938_vm5, %v445_v53, %v6074_v25  ;;  %v250_v63 = vld [vmem:[%s5905_s30 + $0xf8] sm:$0xff] }
  0xa5   : > { %1153 = vmatprep.mubr.bf16.mxu0 %v5962_v1  ;;  %4483 = vmatpush3.bf16.msra.mxu0 %v5409_v54  ;;  %v5419_v54 = vld [vmem:[#allocation5 + $0x1f0] sm:$0xff]   ;;  %v6141_v6 = vshrl.u32 %v6122_v7, 16  ;;  %v6150_v28 = vshll.u32 %v6122_v7, 16  ;;  %v6169_v43 = vsel %vm5933_vm4, %v6054_v0, %v362_v41  ;;  %v447_v25 = vor.u32 %v446_v52, %v6077_v26 }
  0xa6   : > { %1307 = vmatmul.mubr.bf16.gmra.mrb[12].mxu1 %v6037_v60  ;;  %4484 = vmatprep.subr.bf16.mxu0 %v5413_v14  ;;  %v5420_v14 = vld [vmem:[#allocation5 + $0x1b0] sm:$0xff]   ;;  %v6191_v8 = vsel %vm5933_vm4, %v6077_v26, %v366_v61  ;;  %v307_v0 = vshrl.u32 %v6200_v18, 16  ;;  %v374_v38 = vor.u32 %v6112_v51, %v371_v4  ;;  %v449_v26 = vor.u32 %v448_v10, %v6091_v39  ;;  %v248_v10 = vld [vmem:[%s5905_s30 + $0xe8] sm:$0xff] }
  0xa7   : > { %1314 = vmatprep.mubr.bf16.mxu1 %v6050_v3  ;;  %4594 = vmatprep.subr.bf16.mxu1 %v5419_v54  ;;  %v379_v54 = vrot.slane %v6141_v6, 7  ;;  %v6225_v2 = vsel %vm5938_vm5, %v447_v25, %v6082_v29  ;;  %v378_v29 = vor.u32 %v6138_v9, %v375_v47  ;;  %v384_v41 = vshll.u32 %v6200_v18, 16 }
  0xa8   : > { %4595 = vmatpush3.bf16.msra.mxu1 %v5420_v14  ;;  %v6211_v14 = vsel %vm5933_vm4, %v6091_v39, %v370_v62  ;;  %v6241_v52 = vsel %vm5938_vm5, %v449_v26, %v6109_v55  ;;  %v383_v33 = vrot.slane %v307_v0, 7  ;;  %v451_v39 = vor.u32 %v450_v17, %v6094_v40  ;;  %v247_v55 = vld [vmem:[%s5905_s30 + $0xe0] sm:$0xff] }
  0xa9   : > { %4485 = vmatpush3.bf16.msra.mxu0 %v5414_v21  ;;  %v5421_v21 = vld [vmem:[#allocation5 + $0x1f8] sm:$0xff]   ;;  %v6247_v4 = vsel %vm5933_vm4, %v6128_v22, %v378_v29  ;;  %v382_v47 = vor.u32 %v6150_v28, %v379_v54  ;;  %v6270_v24 = vpack.c.bf16 %v248_v10, %v247_v55  ;;  %v249_v54 = vld [vmem:[%s5905_s30 + $0xf0] sm:$0xff]  ;;  %v454_v62 = vrot.slane %v6150_v28, 1 }
  0xaa   : > { %4596 = vmatprep.subr.bf16.mxu1 %v5421_v21  ;;  %5190 = vmatprep.subr.bf16.mxu0 %v6130_v23  ;;  %v452_v21 = vrot.slane %v6138_v9, 1  ;;  %v6262_v48 = vsel %vm5938_vm5, %v451_v39, %v6112_v51  ;;  %v386_v17 = vor.u32 %v384_v41, %v383_v33  ;;  %v456_v39 = vrot.slane %v384_v41, 1 }
  0xab   : > { %v6268_v61 = vsel %vm5933_vm4, %v6141_v6, %v382_v47  ;;  %v310_v51 = vshrl.u32 %v6270_v24, 16 }
  0xac   : > { %1154 = vmatmul.mubr.bf16.gmra.mrb[16].mxu0 %v6004_v31  ;;  %4597 = vmatpush3.bf16.msra.mxu1 %v5422_v30  ;;  %v6231_v30 = vsel %vm5933_vm4, %v6094_v40, %v374_v38  ;;  %v453_v40 = vor.u32 %v452_v21, %v6128_v22  ;;  %v6288_v25 = vsel %vm5933_vm4, %v307_v0, %v386_v17  ;;  %v388_v22 = vshll.u32 %v6270_v24, 16 }
  0xad   : > { %1161 = vmatprep.mubr.bf16.mxu0 %v5986_v16  ;;  %v387_v38 = vrot.slane %v310_v51, 7  ;;  %v6291_v21 = vpack.c.bf16 %v250_v63, %v249_v54 }
  0xae   : > { %1315 = vmatmul.mubr.bf16.gmra.mrb[16].mxu1 %v6087_v32  ;;  %v6282_v53 = vsel %vm5938_vm5, %v453_v40, %v6138_v9  ;;  %v455_v9 = vor.u32 %v454_v62, %v6141_v6  ;;  %v458_v17 = vrot.slane %v388_v22, 1 }
  0xaf   : > { %1322 = vmatprep.mubr.bf16.mxu1 %v6102_v44  ;;  %v390_v26 = vor.u32 %v388_v22, %v387_v38  ;;  %v6298_v29 = vshrl.u32 %v6291_v21, 16  ;;  %v6312_v6 = vshll.u32 %v6291_v21, 16 }
  0xb0   : > { %v6303_v33 = vsel %vm5938_vm5, %v455_v9, %v6150_v28  ;;  %v457_v28 = vor.u32 %v456_v39, %v307_v0  ;;  %v459_v0 = vor.u32 %v458_v17, %v310_v51 }
  0xb1   : > { %v6308_v55 = vsel %vm5933_vm4, %v310_v51, %v390_v26  ;;  %v391_v10 = vrot.slane %v6298_v29, 7  ;;  %v5425_v51 = vld [vmem:[#allocation5 + $0x210] sm:$0xff]  }
  0xb2   : > { %v6320_v40 = vsel %vm5938_vm5, %v457_v28, %v384_v41  ;;  %v6333_v63 = vsel %vm5938_vm5, %v459_v0, %v388_v22  ;;  %v5424_v41 = vld [vmem:[#allocation5 + $0x208] sm:$0xff]  }
  0xb3   : > { %v394_v47 = vor.u32 %v6312_v6, %v391_v10 }
  0xb4   : > { %1162 = vmatmul.mubr.bf16.gmra.mrb[20].mxu0 %v6050_v3 }
  0xb5   : > { %1169 = vmatprep.mubr.bf16.mxu0 %v6010_v34  ;;  %v6326_v54 = vsel %vm5933_vm4, %v6298_v29, %v394_v47 }
  0xb6   : > { %1323 = vmatmul.mubr.bf16.gmra.mrb[20].mxu1 %v6135_v56 }
  0xb7   : > { %1330 = vmatprep.mubr.bf16.mxu1 %v6147_v27 }
  0xbc   : > { %1170 = vmatmul.mubr.bf16.gmra.mrb[24].mxu0 %v6102_v44 }
  0xbd   : > { %1177 = vmatprep.mubr.bf16.mxu0 %v6013_v36 }
  0xbe   : > { %1331 = vmatmul.mubr.bf16.gmra.mrb[24].mxu1 %v6163_v42 }
  0xbf   : > { %1338 = vmatprep.mubr.bf16.mxu1 %v6169_v43 }
  0xc4   : > { %1178 = vmatmul.mubr.bf16.gmra.mrb[28].mxu0 %v6147_v27 }
  0xc5   : > { %1185 = vmatprep.mubr.bf16.mxu0 %v6025_v49 }
  0xc6   : > { %1339 = vmatmul.mubr.bf16.gmra.mrb[28].mxu1 %v6183_v12 }
  0xc7   : > { %1346 = vmatprep.mubr.bf16.mxu1 %v6191_v8 }
  0xcc   : > { %1186 = vmatmul.mubr.bf16.gmra.mrb[32].mxu0 %v6169_v43 }
  0xcd   : > { %1193 = vmatprep.mubr.bf16.mxu0 %v6056_v5 }
  0xce   : > { %1347 = vmatmul.mubr.bf16.gmra.mrb[32].mxu1 %v6205_v15 }
  0xcf   : > { %1354 = vmatprep.mubr.bf16.mxu1 %v6211_v14 }
  0xd4   : > { %1194 = vmatmul.mubr.bf16.gmra.mrb[36].mxu0 %v6191_v8 }
  0xd5   : > { %1201 = vmatprep.mubr.bf16.mxu0 %v6067_v19 }
  0xd6   : > { %1355 = vmatmul.mubr.bf16.gmra.mrb[36].mxu1 %v6225_v2 }
  0xd7   : > { %1362 = vmatprep.mubr.bf16.mxu1 %v6231_v30 }
  0xdc   : > { %1202 = vmatmul.mubr.bf16.gmra.mrb[40].mxu0 %v6211_v14 }
  0xdd   : > { %1209 = vmatprep.mubr.bf16.mxu0 %v6069_v20 }
  0xde   : > { %1363 = vmatmul.mubr.bf16.gmra.mrb[40].mxu1 %v6241_v52 }
  0xdf   : > { %1370 = vmatprep.mubr.bf16.mxu1 %v6247_v4 }
  0xe4   : > { %1210 = vmatmul.mubr.bf16.gmra.mrb[44].mxu0 %v6231_v30 }
  0xe5   : > { %1217 = vmatprep.mubr.bf16.mxu0 %v6114_v57 }
  0xe6   : > { %1371 = vmatmul.mubr.bf16.gmra.mrb[44].mxu1 %v6262_v48 }
  0xe7   : > { %1378 = vmatprep.mubr.bf16.mxu1 %v6268_v61 }
  0xec   : > { %1218 = vmatmul.mubr.bf16.gmra.mrb[48].mxu0 %v6247_v4 }
  0xed   : > { %1225 = vmatprep.mubr.bf16.mxu0 %v6122_v7 }
  0xee   : > { %1379 = vmatmul.mubr.bf16.gmra.mrb[48].mxu1 %v6282_v53 }
  0xef   : > { %1386 = vmatprep.mubr.bf16.mxu1 %v6288_v25 }
  0xf4   : > { %1226 = vmatmul.mubr.bf16.gmra.mrb[52].mxu0 %v6268_v61 }
  0xf5   : > { %1233 = vmatprep.mubr.bf16.mxu0 %v6200_v18 }
  0xf6   : > { %1387 = vmatmul.mubr.bf16.gmra.mrb[52].mxu1 %v6303_v33 }
  0xf7   : > { %1394 = vmatprep.mubr.bf16.mxu1 %v6308_v55 }
  0xfc   : > { %1234 = vmatmul.mubr.bf16.gmra.mrb[56].mxu0 %v6288_v25 }
  0xfd   : > { %1241 = vmatprep.mubr.bf16.mxu0 %v6270_v24 }
  0xfe   : > { %1395 = vmatmul.mubr.bf16.gmra.mrb[56].mxu1 %v6320_v40 }
  0xff   : > { %1402 = vmatprep.mubr.bf16.mxu1 %v6326_v54 }
 0x104   : > { %1242 = vmatmul.mubr.bf16.gmra.mrb[60].mxu0 %v6308_v55 }
 0x105   : > { %1443 = vmatprep.mubr.bf16.mxu0 %v5975_v11  ;;  %v5426_v11 = vld [vmem:[#allocation5 + $0x218] sm:$0xff]  }
 0x106   : > { %1403 = vmatmul.mubr.bf16.gmra.mrb[60].mxu1 %v6333_v63 }
 0x107   : > { %1604 = vmatprep.mubr.bf16.mxu1 %v5918_v35 }
 0x10c   : > { %1444 = vmatmul.mubr.bf16.vlgmr.msra.gmra.mrb[64].mxu0 %v5921_v37  ;;  %v5427_v37 = vld [vmem:[#allocation5 + $0x220] sm:$0xff]  }
 0x10d   : > { %5191 = vmatpush3.bf16.msra.mxu0 %v6130_v23  ;;  %1451 = vmatprep.mubr.bf16.mxu0 %v5953_v59 }
 0x10e   : > { %1605 = vmatmul.mubr.bf16.vlgmr.msra.gmra.mrb[64].mxu1 %v5949_v58  ;;  %5192 = vmatprep.subr.bf16.mxu0 %v5424_v41  ;;  %v5428_v58 = vld [vmem:[#allocation5 + $0x228] sm:$0xff]  }
 0x10f   : > { %1612 = vmatprep.mubr.bf16.mxu1 %v5930_v45 }
 0x111   : > { %5193 = vmatpush3.bf16.msra.mxu0 %v5424_v41 }
 0x112   : > { %5194 = vmatprep.subr.bf16.mxu0 %v5425_v51 }
 0x114   : > { %1452 = vmatmul.mubr.bf16.gmra.mrb[68].mxu0 %v5918_v35  ;;  %v5429_v35 = vld [vmem:[#allocation5 + $0x230] sm:$0xff]  }
 0x115   : > { %1459 = vmatprep.mubr.bf16.mxu0 %v6037_v60  ;;  %5195 = vmatpush3.bf16.msra.mxu0 %v5425_v51 }
 0x116   : > { %1613 = vmatmul.mubr.bf16.gmra.mrb[68].mxu1 %v5980_v13  ;;  %5196 = vmatprep.subr.bf16.mxu0 %v5426_v11  ;;  %v5430_v13 = vld [vmem:[#allocation5 + $0x238] sm:$0xff]  }
 0x117   : > { %1620 = vmatprep.mubr.bf16.mxu1 %v5962_v1 }
 0x119   : > { %5197 = vmatpush3.bf16.msra.mxu0 %v5426_v11 }
 0x11a   : > { %5198 = vmatprep.subr.bf16.mxu0 %v5427_v37 }
 0x11c   : > { %1460 = vmatmul.mubr.bf16.gmra.mrb[72].mxu0 %v5930_v45 }
 0x11d   : > { %1467 = vmatprep.mubr.bf16.mxu0 %v6087_v32  ;;  %5199 = vmatpush3.bf16.msra.mxu0 %v5427_v37 }
 0x11e   : > { %1621 = vmatmul.mubr.bf16.gmra.mrb[72].mxu1 %v6004_v31  ;;  %5200 = vmatprep.subr.bf16.mxu0 %v5428_v58 }
 0x11f   : > { %1628 = vmatprep.mubr.bf16.mxu1 %v5986_v16 }
 0x121   : > { %5201 = vmatpush3.bf16.msra.mxu0 %v5428_v58 }
 0x122   : > { %5202 = vmatprep.subr.bf16.mxu0 %v5429_v35 }
 0x124   : > { %1468 = vmatmul.mubr.bf16.gmra.mrb[76].mxu0 %v5962_v1 }
 0x125   : > { %1475 = vmatprep.mubr.bf16.mxu0 %v6135_v56  ;;  %5203 = vmatpush3.bf16.msra.mxu0 %v5429_v35 }
 0x126   : > { %1629 = vmatmul.mubr.bf16.gmra.mrb[76].mxu1 %v6050_v3  ;;  %5204 = vmatprep.subr.bf16.mxu0 %v5430_v13 }
 0x127   : > { %1636 = vmatprep.mubr.bf16.mxu1 %v6010_v34 }
 0x129   : > { %5205 = vmatpush3.bf16.msra.mxu0 %v5430_v13 }
 0x12c   : > { %1476 = vmatmul.mubr.bf16.gmra.mrb[80].mxu0 %v5986_v16 }
 0x12d   : > { %1483 = vmatprep.mubr.bf16.mxu0 %v6163_v42 }
 0x12e   : > { %1637 = vmatmul.mubr.bf16.gmra.mrb[80].mxu1 %v6102_v44 }
 0x12f   : > { %1644 = vmatprep.mubr.bf16.mxu1 %v6013_v36 }
 0x134   : > { %1484 = vmatmul.mubr.bf16.gmra.mrb[84].mxu0 %v6010_v34 }
 0x135   : > { %1491 = vmatprep.mubr.bf16.mxu0 %v6183_v12 }
 0x136   : > { %1645 = vmatmul.mubr.bf16.gmra.mrb[84].mxu1 %v6147_v27 }
 0x137   : > { %1652 = vmatprep.mubr.bf16.mxu1 %v6025_v49 }
 0x13c   : > { %1492 = vmatmul.mubr.bf16.gmra.mrb[88].mxu0 %v6013_v36 }
 0x13d   : > { %1499 = vmatprep.mubr.bf16.mxu0 %v6205_v15 }
 0x13e   : > { %1653 = vmatmul.mubr.bf16.gmra.mrb[88].mxu1 %v6169_v43 }
 0x13f   : > { %1660 = vmatprep.mubr.bf16.mxu1 %v6056_v5 }
 0x144   : > { %1500 = vmatmul.mubr.bf16.gmra.mrb[92].mxu0 %v6025_v49 }
 0x145   : > { %1507 = vmatprep.mubr.bf16.mxu0 %v6225_v2 }
 0x146   : > { %1661 = vmatmul.mubr.bf16.gmra.mrb[92].mxu1 %v6191_v8 }
 0x147   : > { %1668 = vmatprep.mubr.bf16.mxu1 %v6067_v19 }
 0x14c   : > { %1508 = vmatmul.mubr.bf16.gmra.mrb[96].mxu0 %v6056_v5 }
 0x14d   : > { %1515 = vmatprep.mubr.bf16.mxu0 %v6241_v52 }
 0x14e   : > { %1669 = vmatmul.mubr.bf16.gmra.mrb[96].mxu1 %v6211_v14 }
 0x14f   : > { %1676 = vmatprep.mubr.bf16.mxu1 %v6069_v20 }
 0x154   : > { %1516 = vmatmul.mubr.bf16.gmra.mrb[100].mxu0 %v6067_v19 }
 0x155   : > { %1523 = vmatprep.mubr.bf16.mxu0 %v6262_v48 }
 0x156   : > { %1677 = vmatmul.mubr.bf16.gmra.mrb[100].mxu1 %v6231_v30 }
 0x157   : > { %1684 = vmatprep.mubr.bf16.mxu1 %v6114_v57 }
 0x15c   : > { %1524 = vmatmul.mubr.bf16.gmra.mrb[104].mxu0 %v6069_v20 }
 0x15d   : > { %1531 = vmatprep.mubr.bf16.mxu0 %v6282_v53 }
 0x15e   : > { %1685 = vmatmul.mubr.bf16.gmra.mrb[104].mxu1 %v6247_v4 }
 0x15f   : > { %v4262_v45 = vpop.f32.mrb[0].mxu0  ;;  %1692 = vmatprep.mubr.bf16.mxu1 %v6122_v7 }
 0x160   : > { %v4263_v1 = vpop.f32.mrb[1].mxu0  ;;  %v4374_v16 = vpop.f32.mrb[0].mxu1 }
 0x161   : > { %v4264_v31 = vadd.f32 %v4263_v1, %v4262_v45  ;;  %v4265_v34 = vpop.f32.mrb[2].mxu0  ;;  %v4375_v36 = vpop.f32.mrb[1].mxu1 }
 0x162   : > { %v4266_v49 = vpop.f32.mrb[3].mxu0  ;;  %v4376_v3 = vadd.f32 %v4375_v36, %v4374_v16  ;;  %v4377_v5 = vpop.f32.mrb[2].mxu1 }
 0x163   : > { %v4267_v19 = vadd.f32 %v4266_v49, %v4265_v34  ;;  %v4378_v44 = vpop.f32.mrb[3].mxu1 }
 0x164   : > { %1532 = vmatmul.mubr.bf16.gmra.mrb[108].mxu0 %v6114_v57  ;;  %v4379_v20 = vadd.f32 %v4378_v44, %v4377_v5  ;;  %v6386_v23 = vadd.f32 %v4376_v3, %v4264_v31 }
 0x165   : > { %1539 = vmatprep.mubr.bf16.mxu0 %v6303_v33 }
 0x166   : > { %1693 = vmatmul.mubr.bf16.gmra.mrb[108].mxu1 %v6268_v61  ;;  %v6390_v43 = vadd.f32 %v4379_v20, %v4267_v19 }
 0x167   : > { %v4268_v27 = vpop.f32.mrb[4].mxu0  ;;  %1700 = vmatprep.mubr.bf16.mxu1 %v6200_v18 }
 0x168   : > { %v4269_v8 = vpop.f32.mrb[5].mxu0 }
 0x169   : > { %v4380_v14 = vpop.f32.mrb[4].mxu1  ;;  %v4270_v30 = vadd.f32 %v4269_v8, %v4268_v27  ;;  %v4271_v4 = vpop.f32.mrb[6].mxu0 }
 0x16a   : > { %v4381_v62 = vpop.f32.mrb[5].mxu1  ;;  %v4272_v38 = vpop.f32.mrb[7].mxu0 }
 0x16b   : > { %v4382_v22 = vadd.f32 %v4381_v62, %v4380_v14  ;;  %v4383_v57 = vpop.f32.mrb[6].mxu1  ;;  %v4273_v9 = vadd.f32 %v4272_v38, %v4271_v4 }
 0x16c   : > { %v4384_v26 = vpop.f32.mrb[7].mxu1  ;;  %1540 = vmatmul.mubr.bf16.gmra.mrb[112].mxu0 %v6122_v7  ;;  %v460_v7 = vrot.slane %v6312_v6, 1 }
 0x16d   : > { %v4385_v39 = vadd.f32 %v4384_v26, %v4383_v57  ;;  %1547 = vmatprep.mubr.bf16.mxu0 %v6320_v40  ;;  %v6394_v61 = vadd.f32 %v4382_v22, %v4270_v30 }
 0x16e   : > { %1701 = vmatmul.mubr.bf16.gmra.mrb[112].mxu1 %v6288_v25  ;;  %v461_v1 = vor.u32 %v460_v7, %v6298_v29 }
 0x16f   : > { %v4274_v10 = vpop.f32.mrb[8].mxu0  ;;  %1708 = vmatprep.mubr.bf16.mxu1 %v6270_v24  ;;  %v6398_v28 = vadd.f32 %v4385_v39, %v4273_v9 }
 0x170   : > { %v4275_v47 = vpop.f32.mrb[9].mxu0  ;;  %v6413_v19 = vsel %vm5938_vm5, %v461_v1, %v6312_v6 }
 0x171   : > { %v4386_v17 = vpop.f32.mrb[8].mxu1  ;;  %v4276_v0 = vadd.f32 %v4275_v47, %v4274_v10  ;;  %v4277_v41 = vpop.f32.mrb[10].mxu0 }
 0x172   : > { %v4387_v51 = vpop.f32.mrb[9].mxu1  ;;  %v4278_v11 = vpop.f32.mrb[11].mxu0 }
 0x173   : > { %v4388_v37 = vadd.f32 %v4387_v51, %v4386_v17  ;;  %v4389_v58 = vpop.f32.mrb[10].mxu1  ;;  %v4279_v35 = vadd.f32 %v4278_v11, %v4277_v41 }
 0x174   : > { %v4390_v13 = vpop.f32.mrb[11].mxu1  ;;  %1548 = vmatmul.mubr.bf16.gmra.mrb[116].mxu0 %v6200_v18 }
 0x175   : > { %v4391_v25 = vadd.f32 %v4390_v13, %v4389_v58  ;;  %1555 = vmatprep.mubr.bf16.mxu0 %v6333_v63  ;;  %v6403_v45 = vadd.f32 %v4388_v37, %v4276_v0 }
 0x176   : > { %1709 = vmatmul.mubr.bf16.gmra.mrb[116].mxu1 %v6308_v55 }
 0x177   : > { %v4280_v16 = vpop.f32.mrb[12].mxu0  ;;  %1716 = vmatprep.mubr.bf16.mxu1 %v6291_v21  ;;  %v6408_v31 = vadd.f32 %v4391_v25, %v4279_v35 }
 0x178   : > { %v4281_v34 = vpop.f32.mrb[13].mxu0 }
 0x179   : > { %v4392_v36 = vpop.f32.mrb[12].mxu1  ;;  %v4282_v49 = vadd.f32 %v4281_v34, %v4280_v16  ;;  %v4283_v3 = vpop.f32.mrb[14].mxu0 }
 0x17a   : > { %v4393_v5 = vpop.f32.mrb[13].mxu1  ;;  %v4284_v18 = vpop.f32.mrb[15].mxu0 }
 0x17b   : > { %v4394_v44 = vadd.f32 %v4393_v5, %v4392_v36  ;;  %v4395_v20 = vpop.f32.mrb[14].mxu1  ;;  %v4285_v27 = vadd.f32 %v4284_v18, %v4283_v3 }
 0x17c   : > { %v4396_v29 = vpop.f32.mrb[15].mxu1  ;;  %1556 = vmatmul.mubr.bf16.gmra.mrb[120].mxu0 %v6270_v24 }
 0x17d   : > { %v4397_v8 = vadd.f32 %v4396_v29, %v4395_v20  ;;  %1563 = vmatprep.mubr.bf16.mxu0 %v6413_v19  ;;  %v6417_v14 = vadd.f32 %v4394_v44, %v4282_v49 }
 0x17e   : > { %1717 = vmatmul.mubr.bf16.gmra.mrb[120].mxu1 %v6326_v54 }
 0x17f   : > { %v4286_v30 = vpop.f32.mrb[16].mxu0  ;;  %1724 = vmatprep.mubr.bf16.mxu1 %v6270_v24  ;;  %v6421_v4 = vadd.f32 %v4397_v8, %v4285_v27 }
 0x180   : > { %v4287_v6 = vpop.f32.mrb[17].mxu0 }
 0x181   : > { %v4398_v62 = vpop.f32.mrb[16].mxu1  ;;  %v4288_v38 = vadd.f32 %v4287_v6, %v4286_v30  ;;  %v4289_v22 = vpop.f32.mrb[18].mxu0 }
 0x182   : > { %v4399_v57 = vpop.f32.mrb[17].mxu1  ;;  %v4290_v9 = vpop.f32.mrb[19].mxu0 }
 0x183   : > { %v4400_v26 = vadd.f32 %v4399_v57, %v4398_v62  ;;  %v4401_v39 = vpop.f32.mrb[18].mxu1  ;;  %v4291_v10 = vadd.f32 %v4290_v9, %v4289_v22 }
 0x184   : > { %v4402_v47 = vpop.f32.mrb[19].mxu1  ;;  %1564 = vmatmul.mubr.bf16.gmra.mrb[124].mxu0 %v6291_v21 }
 0x185   : > { %v4403_v17 = vadd.f32 %v4402_v47, %v4401_v39  ;;  %5206 = vmatprep.mubr.bf16.mxu0 %v5953_v59  ;;  %v6425_v54 = vadd.f32 %v4400_v26, %v4288_v38 }
 0x186   : > { %1725 = vmatmul.mubr.bf16.gmra.mrb[124].mxu1 %v6308_v55 }
 0x187   : > { %v4292_v24 = vpop.f32.mrb[20].mxu0  ;;  %v6428_v0 = vadd.f32 %v4403_v17, %v4291_v10 }
 0x188   : > { %v4293_v41 = vpop.f32.mrb[21].mxu0 }
 0x189   : > { %v4404_v51 = vpop.f32.mrb[20].mxu1  ;;  %v4294_v11 = vadd.f32 %v4293_v41, %v4292_v24  ;;  %v4295_v7 = vpop.f32.mrb[22].mxu0 }
 0x18a   : > { %v4405_v37 = vpop.f32.mrb[21].mxu1  ;;  %v4296_v58 = vpop.f32.mrb[23].mxu0 }
 0x18b   : > { %v4406_v35 = vadd.f32 %v4405_v37, %v4404_v51  ;;  %v4407_v13 = vpop.f32.mrb[22].mxu1  ;;  %v4297_v25 = vadd.f32 %v4296_v58, %v4295_v7 }
 0x18c   : > { %v4408_v21 = vpop.f32.mrb[23].mxu1  ;;  %5207 = vmatmul.mubr.bf16.vlgmr.msra.gmra.mrb[128].mxu0 %v6037_v60 }
 0x18d   : > { %v4409_v59 = vadd.f32 %v4408_v21, %v4407_v13  ;;  %5210 = vmatprep.mubr.bf16.mxu0 %v6087_v32  ;;  %v6432_v1 = vadd.f32 %v4406_v35, %v4294_v11 }
 0x18f   : > { %v4298_v55 = vpop.f32.mrb[24].mxu0  ;;  %v6434_v16 = vadd.f32 %v4409_v59, %v4297_v25 }
 0x190   : > { %v4299_v34 = vpop.f32.mrb[25].mxu0 }
 0x191   : > { %v4410_v36 = vpop.f32.mrb[24].mxu1  ;;  %v4300_v49 = vadd.f32 %v4299_v34, %v4298_v55  ;;  %v4301_v3 = vpop.f32.mrb[26].mxu0 }
 0x192   : > { %v4411_v5 = vpop.f32.mrb[25].mxu1  ;;  %v4302_v18 = vpop.f32.mrb[27].mxu0 }
 0x193   : > { %v4412_v44 = vadd.f32 %v4411_v5, %v4410_v36  ;;  %v4413_v20 = vpop.f32.mrb[26].mxu1  ;;  %v4303_v27 = vadd.f32 %v4302_v18, %v4301_v3 }
 0x194   : > { %v4414_v29 = vpop.f32.mrb[27].mxu1  ;;  %5211 = vmatmul.mubr.bf16.gmra.mrb[132].mxu0 %v6135_v56 }
 0x195   : > { %v4415_v60 = vadd.f32 %v4414_v29, %v4413_v20  ;;  %5214 = vmatprep.mubr.bf16.mxu0 %v6163_v42  ;;  %v6438_v32 = vadd.f32 %v4412_v44, %v4300_v49 }
 0x197   : > { %v4304_v8 = vpop.f32.mrb[28].mxu0  ;;  %v6440_v30 = vadd.f32 %v4415_v60, %v4303_v27 }
 0x198   : > { %v4305_v6 = vpop.f32.mrb[29].mxu0 }
 0x199   : > { %v4416_v62 = vpop.f32.mrb[28].mxu1  ;;  %v4306_v38 = vadd.f32 %v4305_v6, %v4304_v8  ;;  %v4307_v22 = vpop.f32.mrb[30].mxu0 }
 0x19a   : > { %v4417_v57 = vpop.f32.mrb[29].mxu1  ;;  %v4308_v9 = vpop.f32.mrb[31].mxu0 }
 0x19b   : > { %v4418_v26 = vadd.f32 %v4417_v57, %v4416_v62  ;;  %v4419_v39 = vpop.f32.mrb[30].mxu1  ;;  %v4309_v10 = vadd.f32 %v4308_v9, %v4307_v22 }
 0x19c   : > { %v4420_v47 = vpop.f32.mrb[31].mxu1  ;;  %5215 = vmatmul.mubr.bf16.gmra.mrb[136].mxu0 %v6183_v12 }
 0x19d   : > { %v4421_v56 = vadd.f32 %v4420_v47, %v4419_v39  ;;  %5218 = vmatprep.mubr.bf16.mxu0 %v6205_v15  ;;  %v6444_v42 = vadd.f32 %v4418_v26, %v4306_v38 }
 0x19f   : > { %v4310_v17 = vpop.f32.mrb[32].mxu0  ;;  %v6446_v24 = vadd.f32 %v4421_v56, %v4309_v10 }
 0x1a0   : > { %v4311_v41 = vpop.f32.mrb[33].mxu0 }
 0x1a1   : > { %v4422_v51 = vpop.f32.mrb[32].mxu1  ;;  %v4312_v11 = vadd.f32 %v4311_v41, %v4310_v17  ;;  %v4313_v7 = vpop.f32.mrb[34].mxu0 }
 0x1a2   : > { %v4423_v37 = vpop.f32.mrb[33].mxu1  ;;  %v4314_v58 = vpop.f32.mrb[35].mxu0 }
 0x1a3   : > { %v4424_v35 = vadd.f32 %v4423_v37, %v4422_v51  ;;  %v4425_v13 = vpop.f32.mrb[34].mxu1  ;;  %v4315_v25 = vadd.f32 %v4314_v58, %v4313_v7 }
 0x1a4   : > { %v4426_v21 = vpop.f32.mrb[35].mxu1  ;;  %5219 = vmatmul.mubr.bf16.gmra.mrb[140].mxu0 %v6225_v2 }
 0x1a5   : > { %v6449_v12 = vadd.f32 %v4424_v35, %v4312_v11  ;;  %v4427_v15 = vadd.f32 %v4426_v21, %v4425_v13  ;;  %5222 = vmatprep.mubr.bf16.mxu0 %v6241_v52 }
 0x1a7   : > { %v6452_v59 = vadd.f32 %v4427_v15, %v4315_v25  ;;  %v4316_v55 = vpop.f32.mrb[36].mxu0 }
 0x1a8   : > { %v4317_v34 = vpop.f32.mrb[37].mxu0 }
 0x1a9   : > { %v4428_v36 = vpop.f32.mrb[36].mxu1  ;;  %v4318_v49 = vadd.f32 %v4317_v34, %v4316_v55  ;;  %v4319_v3 = vpop.f32.mrb[38].mxu0 }
 0x1aa   : > { %v4429_v5 = vpop.f32.mrb[37].mxu1  ;;  %v4320_v18 = vpop.f32.mrb[39].mxu0 }
 0x1ab   : > { %v4430_v44 = vadd.f32 %v4429_v5, %v4428_v36  ;;  %v4431_v20 = vpop.f32.mrb[38].mxu1  ;;  %v4321_v27 = vadd.f32 %v4320_v18, %v4319_v3 }
 0x1ac   : > { %v4432_v29 = vpop.f32.mrb[39].mxu1  ;;  %5223 = vmatmul.mubr.bf16.gmra.mrb[144].mxu0 %v6262_v48 }
 0x1ad   : > { %v6455_v2 = vadd.f32 %v4430_v44, %v4318_v49  ;;  %v4433_v60 = vadd.f32 %v4432_v29, %v4431_v20  ;;  %5226 = vmatprep.mubr.bf16.mxu0 %v6282_v53 }
 0x1af   : > { %v6458_v52 = vadd.f32 %v4433_v60, %v4321_v27  ;;  %v4322_v8 = vpop.f32.mrb[40].mxu0 }
 0x1b0   : > { %v4323_v6 = vpop.f32.mrb[41].mxu0 }
 0x1b1   : > { %v4434_v62 = vpop.f32.mrb[40].mxu1  ;;  %v4324_v38 = vadd.f32 %v4323_v6, %v4322_v8  ;;  %v4325_v22 = vpop.f32.mrb[42].mxu0 }
 0x1b2   : > { %v4435_v57 = vpop.f32.mrb[41].mxu1  ;;  %v4326_v9 = vpop.f32.mrb[43].mxu0 }
 0x1b3   : > { %v4436_v26 = vadd.f32 %v4435_v57, %v4434_v62  ;;  %v4437_v39 = vpop.f32.mrb[42].mxu1  ;;  %v4327_v10 = vadd.f32 %v4326_v9, %v4325_v22 }
 0x1b4   : > { %v4438_v47 = vpop.f32.mrb[43].mxu1  ;;  %5227 = vmatmul.mubr.bf16.gmra.mrb[148].mxu0 %v6303_v33 }
 0x1b5   : > { %v6461_v48 = vadd.f32 %v4436_v26, %v4324_v38  ;;  %v4439_v56 = vadd.f32 %v4438_v47, %v4437_v39  ;;  %5230 = vmatprep.mubr.bf16.mxu0 %v6320_v40 }
 0x1b7   : > { %v6464_v53 = vadd.f32 %v4439_v56, %v4327_v10  ;;  %v4328_v17 = vpop.f32.mrb[44].mxu0 }
 0x1b8   : > { %v4329_v41 = vpop.f32.mrb[45].mxu0 }
 0x1b9   : > { %v4440_v51 = vpop.f32.mrb[44].mxu1  ;;  %v4330_v11 = vadd.f32 %v4329_v41, %v4328_v17  ;;  %v4331_v7 = vpop.f32.mrb[46].mxu0 }
 0x1ba   : > { %v4441_v37 = vpop.f32.mrb[45].mxu1  ;;  %v4332_v58 = vpop.f32.mrb[47].mxu0 }
 0x1bb   : > { %v4442_v35 = vadd.f32 %v4441_v37, %v4440_v51  ;;  %v4443_v13 = vpop.f32.mrb[46].mxu1  ;;  %v4333_v25 = vadd.f32 %v4332_v58, %v4331_v7 }
 0x1bc   : > { %v4444_v21 = vpop.f32.mrb[47].mxu1  ;;  %5231 = vmatmul.mubr.bf16.gmra.mrb[152].mxu0 %v6333_v63 }
 0x1bd   : > { %v6467_v33 = vadd.f32 %v4442_v35, %v4330_v11  ;;  %v4445_v15 = vadd.f32 %v4444_v21, %v4443_v13  ;;  %5234 = vmatprep.mubr.bf16.mxu0 %v6413_v19 }
 0x1bf   : > { %v6470_v40 = vadd.f32 %v4445_v15, %v4333_v25  ;;  %v4334_v55 = vpop.f32.mrb[48].mxu0 }
 0x1c0   : > { %v4335_v34 = vpop.f32.mrb[49].mxu0 }
 0x1c1   : > { %v4446_v36 = vpop.f32.mrb[48].mxu1  ;;  %v4336_v49 = vadd.f32 %v4335_v34, %v4334_v55  ;;  %v4337_v3 = vpop.f32.mrb[50].mxu0 }
 0x1c2   : > { %v4447_v5 = vpop.f32.mrb[49].mxu1  ;;  %v4338_v18 = vpop.f32.mrb[51].mxu0 }
 0x1c3   : > { %v4448_v44 = vadd.f32 %v4447_v5, %v4446_v36  ;;  %v4449_v20 = vpop.f32.mrb[50].mxu1  ;;  %v4339_v27 = vadd.f32 %v4338_v18, %v4337_v3 }
 0x1c4   : > { %v4450_v29 = vpop.f32.mrb[51].mxu1  ;;  %5235 = vmatmul.mubr.bf16.gmra.mrb[156].mxu0 %v6333_v63 }
 0x1c5   : > { %v6473_v60 = vadd.f32 %v4448_v44, %v4336_v49  ;;  %v4451_v8 = vadd.f32 %v4450_v29, %v4449_v20 }
 0x1c7   : > { %v6475_v6 = vadd.f32 %v4451_v8, %v4339_v27  ;;  %v4340_v19 = vpop.f32.mrb[52].mxu0 }
 0x1c8   : > { %v4341_v62 = vpop.f32.mrb[53].mxu0 }
 0x1c9   : > { %v4452_v38 = vpop.f32.mrb[52].mxu1  ;;  %v4342_v22 = vadd.f32 %v4341_v62, %v4340_v19  ;;  %v4343_v57 = vpop.f32.mrb[54].mxu0 }
 0x1ca   : > { %v4453_v9 = vpop.f32.mrb[53].mxu1  ;;  %v4344_v26 = vpop.f32.mrb[55].mxu0 }
 0x1cb   : > { %v4454_v39 = vadd.f32 %v4453_v9, %v4452_v38  ;;  %v4455_v10 = vpop.f32.mrb[54].mxu1  ;;  %v4345_v47 = vadd.f32 %v4344_v26, %v4343_v57 }
 0x1cc   : > { %v4456_v56 = vpop.f32.mrb[55].mxu1 }
 0x1cd   : > { %v6477_v17 = vadd.f32 %v4454_v39, %v4342_v22  ;;  %v4457_v41 = vadd.f32 %v4456_v56, %v4455_v10 }
 0x1cf   : > { %v6479_v63 = vadd.f32 %v4457_v41, %v4345_v47  ;;  %v4346_v51 = vpop.f32.mrb[56].mxu0 }
 0x1d0   : > { %v4347_v11 = vpop.f32.mrb[57].mxu0 }
 0x1d1   : > { %v4458_v7 = vpop.f32.mrb[56].mxu1  ;;  %v4348_v37 = vadd.f32 %v4347_v11, %v4346_v51  ;;  %v4349_v58 = vpop.f32.mrb[58].mxu0 }
 0x1d2   : > { %v4459_v35 = vpop.f32.mrb[57].mxu1  ;;  %v4350_v13 = vpop.f32.mrb[59].mxu0 }
 0x1d3   : > { %v4460_v25 = vadd.f32 %v4459_v35, %v4458_v7  ;;  %v4461_v21 = vpop.f32.mrb[58].mxu1  ;;  %v4351_v15 = vadd.f32 %v4350_v13, %v4349_v58 }
 0x1d4   : > { %v4462_v55 = vpop.f32.mrb[59].mxu1 }
 0x1d5   : > { %v6481_v34 = vadd.f32 %v4460_v25, %v4348_v37  ;;  %v4463_v36 = vadd.f32 %v4462_v55, %v4461_v21 }
 0x1d7   : > { %v6483_v49 = vadd.f32 %v4463_v36, %v4351_v15  ;;  %v4352_v3 = vpop.f32.mrb[60].mxu0 }
 0x1d8   : > { %v4353_v5 = vpop.f32.mrb[61].mxu0 }
 0x1d9   : > { %v4464_v18 = vpop.f32.mrb[60].mxu1  ;;  %v4354_v44 = vadd.f32 %v4353_v5, %v4352_v3  ;;  %v4355_v20 = vpop.f32.mrb[62].mxu0 }
 0x1da   : > { %v4465_v27 = vpop.f32.mrb[61].mxu1  ;;  %v4356_v29 = vpop.f32.mrb[63].mxu0 }
 0x1db   : > { %v4466_v8 = vadd.f32 %v4465_v27, %v4464_v18  ;;  %v4467_v19 = vpop.f32.mrb[62].mxu1  ;;  %v4357_v62 = vadd.f32 %v4356_v29, %v4355_v20 }
 0x1dc   : > { %v4468_v38 = vpop.f32.mrb[63].mxu1 }
 0x1dd   : > { %v6485_v22 = vadd.f32 %v4466_v8, %v4354_v44  ;;  %v4469_v57 = vadd.f32 %v4468_v38, %v4467_v19 }
 0x1df   : > { %v6487_v9 = vadd.f32 %v4469_v57, %v4357_v62  ;;  %v4486_v26 = vpop.f32.mrb[64].mxu0 }
 0x1e0   : > { %v4487_v39 = vpop.f32.mrb[65].mxu0 }
 0x1e1   : > { %v4488_v10 = vadd.f32 %v4487_v39, %v4486_v26  ;;  %v4489_v47 = vpop.f32.mrb[66].mxu0  ;;  %v4598_v56 = vpop.f32.mrb[64].mxu1 }
 0x1e2   : > { %v4490_v41 = vpop.f32.mrb[67].mxu0  ;;  %v4599_v51 = vpop.f32.mrb[65].mxu1 }
 0x1e3   : > { %v1446_v11 = vadd.f32 %v4488_v10, %v6386_v23  ;;  %v4491_v7 = vadd.f32 %v4490_v41, %v4489_v47  ;;  %v4600_v37 = vadd.f32 %v4599_v51, %v4598_v56  ;;  %v4601_v58 = vpop.f32.mrb[66].mxu1 }
 0x1e4   : > { %v4602_v35 = vpop.f32.mrb[67].mxu1 }
 0x1e5   : > { %v1449_v13 = vadd.f32 %v4491_v7, %v6390_v43  ;;  %v4603_v25 = vadd.f32 %v4602_v35, %v4601_v58  ;;  %v6491_v21 = vadd.f32 %v4600_v37, %v1446_v11 }
 0x1e7   : > { %v4492_v15 = vpop.f32.mrb[68].mxu0  ;;  %v6493_v55 = vadd.f32 %v4603_v25, %v1449_v13 }
 0x1e8   : > { %v4493_v36 = vpop.f32.mrb[69].mxu0 }
 0x1e9   : > { %v4494_v3 = vadd.f32 %v4493_v36, %v4492_v15  ;;  %v4495_v5 = vpop.f32.mrb[70].mxu0  ;;  %v4604_v18 = vpop.f32.mrb[68].mxu1 }
 0x1ea   : > { %v4496_v44 = vpop.f32.mrb[71].mxu0  ;;  %v4605_v20 = vpop.f32.mrb[69].mxu1 }
 0x1eb   : > { %v1454_v23 = vadd.f32 %v4494_v3, %v6394_v61  ;;  %v4497_v27 = vadd.f32 %v4496_v44, %v4495_v5  ;;  %v4606_v29 = vadd.f32 %v4605_v20, %v4604_v18  ;;  %v4607_v8 = vpop.f32.mrb[70].mxu1 }
 0x1ec   : > { %v4608_v19 = vpop.f32.mrb[71].mxu1 }
 0x1ed   : > { %v1457_v43 = vadd.f32 %v4497_v27, %v6398_v28  ;;  %v4609_v62 = vadd.f32 %v4608_v19, %v4607_v8  ;;  %v6497_v38 = vadd.f32 %v4606_v29, %v1454_v23 }
 0x1ef   : > { %v4498_v57 = vpop.f32.mrb[72].mxu0  ;;  %v6499_v26 = vadd.f32 %v4609_v62, %v1457_v43 }
 0x1f0   : > { %v4499_v39 = vpop.f32.mrb[73].mxu0 }
 0x1f1   : > { %v4500_v10 = vadd.f32 %v4499_v39, %v4498_v57  ;;  %v4501_v47 = vpop.f32.mrb[74].mxu0  ;;  %v4610_v56 = vpop.f32.mrb[72].mxu1 }
 0x1f2   : > { %v4502_v41 = vpop.f32.mrb[75].mxu0  ;;  %v4611_v51 = vpop.f32.mrb[73].mxu1 }
 0x1f3   : > { %v1462_v61 = vadd.f32 %v4500_v10, %v6403_v45  ;;  %v4503_v11 = vadd.f32 %v4502_v41, %v4501_v47  ;;  %v4612_v7 = vadd.f32 %v4611_v51, %v4610_v56  ;;  %v4613_v37 = vpop.f32.mrb[74].mxu1 }
 0x1f4   : > { %v4614_v58 = vpop.f32.mrb[75].mxu1 }
 0x1f5   : > { %v1465_v28 = vadd.f32 %v4503_v11, %v6408_v31  ;;  %v4615_v35 = vadd.f32 %v4614_v58, %v4613_v37  ;;  %v6503_v13 = vadd.f32 %v4612_v7, %v1462_v61 }
 0x1f7   : > { %v4504_v25 = vpop.f32.mrb[76].mxu0  ;;  %v6505_v15 = vadd.f32 %v4615_v35, %v1465_v28 }
 0x1f8   : > { %v4505_v36 = vpop.f32.mrb[77].mxu0 }
 0x1f9   : > { %v4506_v3 = vadd.f32 %v4505_v36, %v4504_v25  ;;  %v4507_v5 = vpop.f32.mrb[78].mxu0  ;;  %v4616_v18 = vpop.f32.mrb[76].mxu1 }
 0x1fa   : > { %v4508_v44 = vpop.f32.mrb[79].mxu0  ;;  %v4617_v20 = vpop.f32.mrb[77].mxu1 }
 0x1fb   : > { %v1470_v45 = vadd.f32 %v4506_v3, %v6417_v14  ;;  %v4509_v23 = vadd.f32 %v4508_v44, %v4507_v5  ;;  %v4618_v27 = vadd.f32 %v4617_v20, %v4616_v18  ;;  %v4619_v29 = vpop.f32.mrb[78].mxu1 }
 0x1fc   : > { %v4620_v8 = vpop.f32.mrb[79].mxu1 }
 0x1fd   : > { %v1473_v31 = vadd.f32 %v4509_v23, %v6421_v4  ;;  %v4621_v19 = vadd.f32 %v4620_v8, %v4619_v29  ;;  %v6509_v43 = vadd.f32 %v4618_v27, %v1470_v45 }
 0x1ff   : > { %v4510_v62 = vpop.f32.mrb[80].mxu0  ;;  %v6511_v57 = vadd.f32 %v4621_v19, %v1473_v31 }
 0x200   : > { %v4511_v39 = vpop.f32.mrb[81].mxu0 }
 0x201   : > { %v4512_v10 = vadd.f32 %v4511_v39, %v4510_v62  ;;  %v4513_v47 = vpop.f32.mrb[82].mxu0  ;;  %v4622_v56 = vpop.f32.mrb[80].mxu1 }
 0x202   : > { %v4514_v41 = vpop.f32.mrb[83].mxu0  ;;  %v4623_v51 = vpop.f32.mrb[81].mxu1 }
 0x203   : > { %v1478_v14 = vadd.f32 %v4512_v10, %v6425_v54  ;;  %v4515_v61 = vadd.f32 %v4514_v41, %v4513_v47  ;;  %v4624_v11 = vadd.f32 %v4623_v51, %v4622_v56  ;;  %v4625_v7 = vpop.f32.mrb[82].mxu1 }
 0x204   : > { %v4626_v37 = vpop.f32.mrb[83].mxu1 }
 0x205   : > { %v1481_v4 = vadd.f32 %v4515_v61, %v6428_v0  ;;  %v4627_v58 = vadd.f32 %v4626_v37, %v4625_v7  ;;  %v6515_v28 = vadd.f32 %v4624_v11, %v1478_v14 }
 0x207   : > { %v4516_v35 = vpop.f32.mrb[84].mxu0  ;;  %v6517_v25 = vadd.f32 %v4627_v58, %v1481_v4 }
 0x208   : > { %v4517_v36 = vpop.f32.mrb[85].mxu0 }
 0x209   : > { %v4518_v3 = vadd.f32 %v4517_v36, %v4516_v35  ;;  %v4519_v5 = vpop.f32.mrb[86].mxu0  ;;  %v4628_v18 = vpop.f32.mrb[84].mxu1 }
 0x20a   : > { %v4520_v44 = vpop.f32.mrb[87].mxu0  ;;  %v4629_v20 = vpop.f32.mrb[85].mxu1 }
 0x20b   : > { %v1486_v54 = vadd.f32 %v4518_v3, %v6432_v1  ;;  %v4521_v45 = vadd.f32 %v4520_v44, %v4519_v5  ;;  %v4630_v23 = vadd.f32 %v4629_v20, %v4628_v18  ;;  %v4631_v27 = vpop.f32.mrb[86].mxu1 }
 0x20c   : > { %v4632_v29 = vpop.f32.mrb[87].mxu1 }
 0x20d   : > { %v1489_v0 = vadd.f32 %v4521_v45, %v6434_v16  ;;  %v4633_v8 = vadd.f32 %v4632_v29, %v4631_v27  ;;  %v6521_v31 = vadd.f32 %v4630_v23, %v1486_v54 }
 0x20f   : > { %v4522_v19 = vpop.f32.mrb[88].mxu0  ;;  %v6523_v62 = vadd.f32 %v4633_v8, %v1489_v0 }
 0x210   : > { %v4523_v39 = vpop.f32.mrb[89].mxu0 }
 0x211   : > { %v4524_v10 = vadd.f32 %v4523_v39, %v4522_v19  ;;  %v4525_v47 = vpop.f32.mrb[90].mxu0  ;;  %v4634_v56 = vpop.f32.mrb[88].mxu1 }
 0x212   : > { %v4526_v41 = vpop.f32.mrb[91].mxu0  ;;  %v4635_v51 = vpop.f32.mrb[89].mxu1 }
 0x213   : > { %v1494_v1 = vadd.f32 %v4524_v10, %v6438_v32  ;;  %v4527_v14 = vadd.f32 %v4526_v41, %v4525_v47  ;;  %v4636_v61 = vadd.f32 %v4635_v51, %v4634_v56  ;;  %v4637_v11 = vpop.f32.mrb[90].mxu1 }
 0x214   : > { %v4638_v7 = vpop.f32.mrb[91].mxu1 }
 0x215   : > { %v1497_v16 = vadd.f32 %v4527_v14, %v6440_v30  ;;  %v4639_v37 = vadd.f32 %v4638_v7, %v4637_v11  ;;  %v6527_v4 = vadd.f32 %v4636_v61, %v1494_v1 }
 0x217   : > { %v4528_v58 = vpop.f32.mrb[92].mxu0  ;;  %v6529_v35 = vadd.f32 %v4639_v37, %v1497_v16 }
 0x218   : > { %v4529_v36 = vpop.f32.mrb[93].mxu0 }
 0x219   : > { %v4530_v3 = vadd.f32 %v4529_v36, %v4528_v58  ;;  %v4531_v5 = vpop.f32.mrb[94].mxu0  ;;  %v4640_v18 = vpop.f32.mrb[92].mxu1 }
 0x21a   : > { %v4532_v44 = vpop.f32.mrb[95].mxu0  ;;  %v4641_v20 = vpop.f32.mrb[93].mxu1 }
 0x21b   : > { %v1502_v32 = vadd.f32 %v4530_v3, %v6444_v42  ;;  %v4533_v54 = vadd.f32 %v4532_v44, %v4531_v5  ;;  %v4642_v45 = vadd.f32 %v4641_v20, %v4640_v18  ;;  %v4643_v23 = vpop.f32.mrb[94].mxu1 }
 0x21c   : > { %v4644_v27 = vpop.f32.mrb[95].mxu1 }
 0x21d   : > { %v1505_v30 = vadd.f32 %v4533_v54, %v6446_v24  ;;  %v4645_v29 = vadd.f32 %v4644_v27, %v4643_v23  ;;  %v6533_v0 = vadd.f32 %v4642_v45, %v1502_v32 }
 0x21f   : > { %v4534_v8 = vpop.f32.mrb[96].mxu0  ;;  %v6535_v19 = vadd.f32 %v4645_v29, %v1505_v30 }
 0x220   : > { %v4535_v39 = vpop.f32.mrb[97].mxu0 }
 0x221   : > { %v4536_v10 = vadd.f32 %v4535_v39, %v4534_v8  ;;  %v4537_v47 = vpop.f32.mrb[98].mxu0  ;;  %v4646_v56 = vpop.f32.mrb[96].mxu1 }
 0x222   : > { %v4538_v41 = vpop.f32.mrb[99].mxu0  ;;  %v4647_v51 = vpop.f32.mrb[97].mxu1 }
 0x223   : > { %v1510_v42 = vadd.f32 %v4536_v10, %v6449_v12  ;;  %v4539_v1 = vadd.f32 %v4538_v41, %v4537_v47  ;;  %v4648_v14 = vadd.f32 %v4647_v51, %v4646_v56  ;;  %v4649_v61 = vpop.f32.mrb[98].mxu1 }
 0x224   : > { %v4650_v11 = vpop.f32.mrb[99].mxu1 }
 0x225   : > { %v1513_v24 = vadd.f32 %v4539_v1, %v6452_v59  ;;  %v4651_v7 = vadd.f32 %v4650_v11, %v4649_v61  ;;  %v6539_v16 = vadd.f32 %v4648_v14, %v1510_v42 }
 0x227   : > { %v4540_v37 = vpop.f32.mrb[100].mxu0  ;;  %v6541_v58 = vadd.f32 %v4651_v7, %v1513_v24 }
 0x228   : > { %v4541_v36 = vpop.f32.mrb[101].mxu0 }
 0x229   : > { %v4542_v3 = vadd.f32 %v4541_v36, %v4540_v37  ;;  %v4543_v5 = vpop.f32.mrb[102].mxu0  ;;  %v4652_v18 = vpop.f32.mrb[100].mxu1 }
 0x22a   : > { %v4544_v44 = vpop.f32.mrb[103].mxu0  ;;  %v4653_v20 = vpop.f32.mrb[101].mxu1 }
 0x22b   : > { %v1518_v12 = vadd.f32 %v4542_v3, %v6455_v2  ;;  %v4545_v32 = vadd.f32 %v4544_v44, %v4543_v5  ;;  %v4654_v54 = vadd.f32 %v4653_v20, %v4652_v18  ;;  %v4655_v45 = vpop.f32.mrb[102].mxu1 }
 0x22c   : > { %v4656_v23 = vpop.f32.mrb[103].mxu1 }
 0x22d   : > { %v1521_v59 = vadd.f32 %v4545_v32, %v6458_v52  ;;  %v4657_v27 = vadd.f32 %v4656_v23, %v4655_v45  ;;  %v6545_v30 = vadd.f32 %v4654_v54, %v1518_v12 }
 0x22f   : > { %v4546_v29 = vpop.f32.mrb[104].mxu0  ;;  %v6547_v8 = vadd.f32 %v4657_v27, %v1521_v59 }
 0x230   : > { %v4547_v39 = vpop.f32.mrb[105].mxu0 }
 0x231   : > { %v4548_v10 = vadd.f32 %v4547_v39, %v4546_v29  ;;  %v4549_v47 = vpop.f32.mrb[106].mxu0  ;;  %v4658_v56 = vpop.f32.mrb[104].mxu1 }
 0x232   : > { %v4550_v41 = vpop.f32.mrb[107].mxu0  ;;  %v4659_v51 = vpop.f32.mrb[105].mxu1 }
 0x233   : > { %v1526_v2 = vadd.f32 %v4548_v10, %v6461_v48  ;;  %v4551_v42 = vadd.f32 %v4550_v41, %v4549_v47  ;;  %v4660_v1 = vadd.f32 %v4659_v51, %v4658_v56  ;;  %v4661_v14 = vpop.f32.mrb[106].mxu1 }
 0x234   : > { %v4662_v61 = vpop.f32.mrb[107].mxu1 }
 0x235   : > { %v1529_v52 = vadd.f32 %v4551_v42, %v6464_v53  ;;  %v4663_v11 = vadd.f32 %v4662_v61, %v4661_v14  ;;  %v6551_v24 = vadd.f32 %v4660_v1, %v1526_v2 }
 0x237   : > { %v4552_v7 = vpop.f32.mrb[108].mxu0  ;;  %v6553_v37 = vadd.f32 %v4663_v11, %v1529_v52 }
 0x238   : > { %v4553_v36 = vpop.f32.mrb[109].mxu0 }
 0x239   : > { %v4554_v3 = vadd.f32 %v4553_v36, %v4552_v7  ;;  %v4555_v5 = vpop.f32.mrb[110].mxu0  ;;  %v4664_v18 = vpop.f32.mrb[108].mxu1 }
 0x23a   : > { %v4556_v44 = vpop.f32.mrb[111].mxu0  ;;  %v4665_v20 = vpop.f32.mrb[109].mxu1 }
 0x23b   : > { %v1534_v48 = vadd.f32 %v4554_v3, %v6467_v33  ;;  %v4557_v12 = vadd.f32 %v4556_v44, %v4555_v5  ;;  %v4666_v32 = vadd.f32 %v4665_v20, %v4664_v18  ;;  %v4667_v54 = vpop.f32.mrb[110].mxu1 }
 0x23c   : > { %v4668_v45 = vpop.f32.mrb[111].mxu1 }
 0x23d   : > { %v1537_v53 = vadd.f32 %v4557_v12, %v6470_v40  ;;  %v4669_v23 = vadd.f32 %v4668_v45, %v4667_v54  ;;  %v6557_v59 = vadd.f32 %v4666_v32, %v1534_v48 }
 0x23f   : > { %v4558_v27 = vpop.f32.mrb[112].mxu0  ;;  %v6559_v29 = vadd.f32 %v4669_v23, %v1537_v53 }
 0x240   : > { %v4559_v39 = vpop.f32.mrb[113].mxu0 }
 0x241   : > { %v4560_v10 = vadd.f32 %v4559_v39, %v4558_v27  ;;  %v4561_v47 = vpop.f32.mrb[114].mxu0  ;;  %v4670_v56 = vpop.f32.mrb[112].mxu1 }
 0x242   : > { %v4562_v41 = vpop.f32.mrb[115].mxu0  ;;  %v4671_v51 = vpop.f32.mrb[113].mxu1 }
 0x243   : > { %v1542_v33 = vadd.f32 %v4560_v10, %v6473_v60  ;;  %v4563_v2 = vadd.f32 %v4562_v41, %v4561_v47  ;;  %v4672_v42 = vadd.f32 %v4671_v51, %v4670_v56  ;;  %v4673_v1 = vpop.f32.mrb[114].mxu1 }
 0x244   : > { %v4674_v14 = vpop.f32.mrb[115].mxu1 }
 0x245   : > { %v1545_v40 = vadd.f32 %v4563_v2, %v6475_v6  ;;  %v4675_v61 = vadd.f32 %v4674_v14, %v4673_v1  ;;  %v6563_v52 = vadd.f32 %v4672_v42, %v1542_v33 }
 0x247   : > { %v4564_v11 = vpop.f32.mrb[116].mxu0  ;;  %v6565_v7 = vadd.f32 %v4675_v61, %v1545_v40 }
 0x248   : > { %v4565_v36 = vpop.f32.mrb[117].mxu0 }
 0x249   : > { %v4566_v3 = vadd.f32 %v4565_v36, %v4564_v11  ;;  %v4567_v5 = vpop.f32.mrb[118].mxu0  ;;  %v4676_v18 = vpop.f32.mrb[116].mxu1 }
 0x24a   : > { %v4568_v44 = vpop.f32.mrb[119].mxu0  ;;  %v4677_v20 = vpop.f32.mrb[117].mxu1 }
 0x24b   : > { %v1550_v60 = vadd.f32 %v4566_v3, %v6477_v17  ;;  %v4569_v48 = vadd.f32 %v4568_v44, %v4567_v5  ;;  %v4678_v12 = vadd.f32 %v4677_v20, %v4676_v18  ;;  %v4679_v32 = vpop.f32.mrb[118].mxu1 }
 0x24c   : > { %v4680_v54 = vpop.f32.mrb[119].mxu1 }
 0x24d   : > { %v1553_v6 = vadd.f32 %v4569_v48, %v6479_v63  ;;  %v4681_v45 = vadd.f32 %v4680_v54, %v4679_v32  ;;  %v6569_v53 = vadd.f32 %v4678_v12, %v1550_v60 }
 0x24f   : > { %v4570_v23 = vpop.f32.mrb[120].mxu0  ;;  %v6571_v27 = vadd.f32 %v4681_v45, %v1553_v6 }
 0x250   : > { %v4571_v39 = vpop.f32.mrb[121].mxu0 }
 0x251   : > { %v4572_v10 = vadd.f32 %v4571_v39, %v4570_v23  ;;  %v4573_v47 = vpop.f32.mrb[122].mxu0  ;;  %v4682_v56 = vpop.f32.mrb[120].mxu1 }
 0x252   : > { %v4574_v41 = vpop.f32.mrb[123].mxu0  ;;  %v4683_v51 = vpop.f32.mrb[121].mxu1 }
 0x253   : > { %v1558_v17 = vadd.f32 %v4572_v10, %v6481_v34  ;;  %v4575_v33 = vadd.f32 %v4574_v41, %v4573_v47  ;;  %v4684_v2 = vadd.f32 %v4683_v51, %v4682_v56  ;;  %v4685_v42 = vpop.f32.mrb[122].mxu1 }
 0x254   : > { %v4686_v1 = vpop.f32.mrb[123].mxu1 }
 0x255   : > { %v1561_v63 = vadd.f32 %v4575_v33, %v6483_v49  ;;  %v4687_v14 = vadd.f32 %v4686_v1, %v4685_v42  ;;  %v6575_v40 = vadd.f32 %v4684_v2, %v1558_v17 }
 0x257   : > { %v4576_v61 = vpop.f32.mrb[124].mxu0  ;;  %v6577_v11 = vadd.f32 %v4687_v14, %v1561_v63 }
 0x258   : > { %v4577_v36 = vpop.f32.mrb[125].mxu0 }
 0x259   : > { %v4578_v3 = vadd.f32 %v4577_v36, %v4576_v61  ;;  %v4579_v5 = vpop.f32.mrb[126].mxu0  ;;  %v4688_v18 = vpop.f32.mrb[124].mxu1 }
 0x25a   : > { %v4580_v44 = vpop.f32.mrb[127].mxu0  ;;  %v4689_v20 = vpop.f32.mrb[125].mxu1 }
 0x25b   : > { %v1566_v34 = vadd.f32 %v4578_v3, %v6485_v22  ;;  %v4581_v60 = vadd.f32 %v4580_v44, %v4579_v5  ;;  %v4690_v48 = vadd.f32 %v4689_v20, %v4688_v18  ;;  %v4691_v12 = vpop.f32.mrb[126].mxu1 }
 0x25c   : > { %v4692_v32 = vpop.f32.mrb[127].mxu1 }
 0x25d   : > { %v1569_v49 = vadd.f32 %v4581_v60, %v6487_v9  ;;  %v4693_v54 = vadd.f32 %v4692_v32, %v4691_v12  ;;  %v6581_v6 = vadd.f32 %v4690_v48, %v1566_v34 }
 0x25f   : > { %v5208_v45 = vpop.f32.mrb[128].mxu0  ;;  %v6583_v23 = vadd.f32 %v4693_v54, %v1569_v49 }
 0x260   : > { %v6586_v39 = vadd.f32 %v5208_v45, %v6497_v38  ;;  %v1767_v10 = vpop.f32.mrb[129].mxu0 }
 0x261   : > { %v6589_v47 = vadd.f32 %v1767_v10, %v6491_v21  ;;  %v5209_v22 = vpop.f32.mrb[130].mxu0 }
 0x262   : > { %v6592_v56 = vadd.f32 %v5209_v22, %v6499_v26  ;;  %v1770_v41 = vpop.f32.mrb[131].mxu0 }
 0x263   : > { %v6595_v9 = vadd.f32 %v1770_v41, %v6493_v55 }
 0x265   : > { %v1894_v51 = vadd.f32 %v6595_v9, %v6589_v47 }
 0x267   : > { %v1895_v17 = vadd.f32 %v1894_v51, %v6586_v39  ;;  %v5212_v33 = vpop.f32.mrb[132].mxu0 }
 0x268   : > { %v6601_v38 = vadd.f32 %v5212_v33, %v6509_v43  ;;  %v1783_v2 = vpop.f32.mrb[133].mxu0 }
 0x269   : > { %v6604_v21 = vadd.f32 %v1783_v2, %v6503_v13  ;;  %v1896_v26 = vadd.f32 %v1895_v17, %v6592_v56  ;;  %v5213_v42 = vpop.f32.mrb[134].mxu0 }
 0x26a   : > { %v6608_v1 = vadd.f32 %v5213_v42, %v6511_v57  ;;  %v1786_v55 = vpop.f32.mrb[135].mxu0 }
 0x26b   : > { %v1897_v63 = vadd.f32 %v1896_v26, %v6604_v21  ;;  %v6612_v14 = vadd.f32 %v1786_v55, %v6505_v15 }
 0x26d   : > { %v1898_v61 = vadd.f32 %v1897_v63, %v6612_v14 }
 0x26f   : > { %v1899_v43 = vadd.f32 %v1898_v61, %v6601_v38  ;;  %v5216_v36 = vpop.f32.mrb[136].mxu0 }
 0x270   : > { %v6617_v13 = vadd.f32 %v5216_v36, %v6521_v31  ;;  %v1799_v3 = vpop.f32.mrb[137].mxu0 }
 0x271   : > { %v6620_v5 = vadd.f32 %v1799_v3, %v6515_v28  ;;  %v1900_v57 = vadd.f32 %v1899_v43, %v6608_v1  ;;  %v5217_v18 = vpop.f32.mrb[138].mxu0 }
 0x272   : > { %v6624_v44 = vadd.f32 %v5217_v18, %v6523_v62  ;;  %v1802_v15 = vpop.f32.mrb[139].mxu0 }
 0x273   : > { %v1901_v20 = vadd.f32 %v1900_v57, %v6620_v5  ;;  %v6628_v34 = vadd.f32 %v1802_v15, %v6517_v25 }
 0x275   : > { %v1902_v60 = vadd.f32 %v1901_v20, %v6628_v34 }
 0x277   : > { %v1903_v31 = vadd.f32 %v1902_v60, %v6617_v13  ;;  %v5220_v48 = vpop.f32.mrb[140].mxu0 }
 0x278   : > { %v6633_v28 = vadd.f32 %v5220_v48, %v6533_v0  ;;  %v1815_v12 = vpop.f32.mrb[141].mxu0 }
 0x279   : > { %v6636_v32 = vadd.f32 %v1815_v12, %v6527_v4  ;;  %v1904_v62 = vadd.f32 %v1903_v31, %v6624_v44  ;;  %v5221_v49 = vpop.f32.mrb[142].mxu0 }
 0x27a   : > { %v6640_v54 = vadd.f32 %v5221_v49, %v6535_v19  ;;  %v1818_v25 = vpop.f32.mrb[143].mxu0 }
 0x27b   : > { %v1905_v45 = vadd.f32 %v1904_v62, %v6636_v32  ;;  %v6644_v10 = vadd.f32 %v1818_v25, %v6529_v35  ;;  %v5431_v25 = vld [vmem:[#allocation7 + $0x40] sm:$0xff]  }
 0x27c   : > { %4718 = vmatprep.subr.bf16.mxu1 %v5431_v25  ;;  %v5440_v25 = vld [vmem:[#allocation7 + $0x20] sm:$0xff]  }
 0x27d   : > { %v1906_v22 = vadd.f32 %v1905_v45, %v6644_v10  ;;  %v5432_v45 = vld [vmem:[#allocation7] sm:$0xff]  }
 0x27e   : > { %4719 = vmatpush3.bf16.msra.mxu1 %v5432_v45  ;;  %v5456_v45 = vld [vmem:[#allocation7 + $0xa0] sm:$0xff]  }
 0x27f   : > { %v1907_v0 = vadd.f32 %v1906_v22, %v6633_v28  ;;  %v5224_v41 = vpop.f32.mrb[144].mxu0  ;;  %v5445_v22 = vld [vmem:[#allocation7 + $0xc0] sm:$0xff]  }
 0x280   : > { %v6649_v4 = vadd.f32 %v5224_v41, %v6545_v30  ;;  %v1831_v51 = vpop.f32.mrb[145].mxu0  ;;  %4830 = vmatprep.subr.bf16.mxu0 %v5445_v22 }
 0x281   : > { %v6652_v17 = vadd.f32 %v1831_v51, %v6539_v16  ;;  %v1908_v19 = vadd.f32 %v1907_v0, %v6640_v54  ;;  %v5225_v33 = vpop.f32.mrb[146].mxu0 }
 0x282   : > { %v6656_v2 = vadd.f32 %v5225_v33, %v6547_v8  ;;  %v1834_v35 = vpop.f32.mrb[147].mxu0 }
 0x283   : > { %v1909_v26 = vadd.f32 %v1908_v19, %v6652_v17  ;;  %v6660_v42 = vadd.f32 %v1834_v35, %v6541_v58  ;;  %v5433_v19 = vld [vmem:[#allocation7 + $0x48] sm:$0xff]  }
 0x284   : > { %4720 = vmatprep.subr.bf16.mxu1 %v5433_v19  ;;  %v5458_v19 = vld [vmem:[#allocation7 + $0xa8] sm:$0xff]  }
 0x285   : > { %v1910_v55 = vadd.f32 %v1909_v26, %v6660_v42  ;;  %v5434_v26 = vld [vmem:[#allocation7 + $0x8] sm:$0xff]  }
 0x286   : > { %4721 = vmatpush3.bf16.msra.mxu1 %v5434_v26 }
 0x287   : > { %v1911_v30 = vadd.f32 %v1910_v55, %v6649_v4  ;;  %v5228_v63 = vpop.f32.mrb[148].mxu0  ;;  %v5447_v55 = vld [vmem:[#allocation7 + $0xc8] sm:$0xff]  }
 0x288   : > { %v6665_v16 = vadd.f32 %v5228_v63, %v6557_v59  ;;  %v1847_v61 = vpop.f32.mrb[149].mxu0 }
 0x289   : > { %v6668_v43 = vadd.f32 %v1847_v61, %v6551_v24  ;;  %v1912_v8 = vadd.f32 %v1911_v30, %v6656_v2  ;;  %v5229_v36 = vpop.f32.mrb[150].mxu0  ;;  %v5448_v61 = vld [vmem:[#allocation7 + $0x88] sm:$0xff]  }
 0x28a   : > { %v6672_v3 = vadd.f32 %v5229_v36, %v6559_v29  ;;  %v1850_v58 = vpop.f32.mrb[151].mxu0 }
 0x28b   : > { %v1913_v57 = vadd.f32 %v1912_v8, %v6668_v43  ;;  %v6676_v18 = vadd.f32 %v1850_v58, %v6553_v37  ;;  %v5436_v58 = vld [vmem:[#allocation7 + $0x10] sm:$0xff]  }
 0x28d   : > { %v1914_v15 = vadd.f32 %v1913_v57, %v6676_v18  ;;  %v5449_v57 = vld [vmem:[#allocation7 + $0xd0] sm:$0xff]  }
 0x28f   : > { %v1915_v59 = vadd.f32 %v1914_v15, %v6665_v16  ;;  %v5232_v20 = vpop.f32.mrb[152].mxu0  ;;  %v5450_v15 = vld [vmem:[#allocation7 + $0x90] sm:$0xff]  }
 0x290   : > { %v6681_v24 = vadd.f32 %v5232_v20, %v6569_v53  ;;  %v1863_v60 = vpop.f32.mrb[153].mxu0 }
 0x291   : > { %v6684_v31 = vadd.f32 %v1863_v60, %v6563_v52  ;;  %v1916_v29 = vadd.f32 %v1915_v59, %v6672_v3  ;;  %v5233_v48 = vpop.f32.mrb[154].mxu0  ;;  %v5446_v52 = vld [vmem:[#allocation7 + $0x80] sm:$0xff]   ;;  %v5437_v59 = vld [vmem:[#allocation7 + $0x58] sm:$0xff]  }
 0x292   : > { %v6688_v12 = vadd.f32 %v5233_v48, %v6571_v27  ;;  %v1866_v37 = vpop.f32.mrb[155].mxu0  ;;  %4831 = vmatpush3.bf16.msra.mxu0 %v5446_v52  ;;  %v5451_v60 = vld [vmem:[#allocation7 + $0xd8] sm:$0xff]   ;;  %v5441_v52 = vld [vmem:[#allocation7 + $0x68] sm:$0xff]  }
 0x293   : > { %v1917_v62 = vadd.f32 %v1916_v29, %v6684_v31  ;;  %v6692_v49 = vadd.f32 %v1866_v37, %v6565_v7  ;;  %4832 = vmatprep.subr.bf16.mxu0 %v5447_v55  ;;  %v5452_v29 = vld [vmem:[#allocation7 + $0x98] sm:$0xff]   ;;  %v5439_v37 = vld [vmem:[#allocation7 + $0x60] sm:$0xff]   ;;  %v5444_v55 = vld [vmem:[#allocation7 + $0x30] sm:$0xff]  }
 0x295   : > { %v1918_v53 = vadd.f32 %v1917_v62, %v6692_v49 }
 0x296   : > { %4833 = vmatpush3.bf16.msra.mxu0 %v5448_v61  ;;  %v5459_v61 = vld [vmem:[#allocation7 + $0xf0] sm:$0xff]  }
 0x297   : > { %v1919_v0 = vadd.f32 %v1918_v53, %v6681_v24  ;;  %v5236_v41 = vpop.f32.mrb[156].mxu0  ;;  %4834 = vmatprep.subr.bf16.mxu0 %v5449_v57  ;;  %v5455_v53 = vld [vmem:[#allocation7 + $0xe0] sm:$0xff]   ;;  %v5462_v57 = vld [vmem:[#allocation7 + $0xb8] sm:$0xff]  }
 0x298   : > { %v6697_v27 = vadd.f32 %v5236_v41, %v6581_v6  ;;  %v1879_v51 = vpop.f32.mrb[157].mxu0  ;;  %v5442_v41 = vld [vmem:[#allocation7 + $0x28] sm:$0xff]  }
 0x299   : > { %v6700_v7 = vadd.f32 %v1879_v51, %v6575_v40  ;;  %v1920_v33 = vadd.f32 %v1919_v0, %v6688_v12  ;;  %v5237_v35 = vpop.f32.mrb[158].mxu0  ;;  %v5435_v40 = vld [vmem:[#allocation7 + $0x50] sm:$0xff]   ;;  %v5457_v51 = vld [vmem:[#allocation7 + $0xe8] sm:$0xff]  }
 0x29a   : > { %v6704_v30 = vadd.f32 %v5237_v35, %v6583_v23  ;;  %v1882_v63 = vpop.f32.mrb[159].mxu0  ;;  %4722 = vmatprep.subr.bf16.mxu1 %v5435_v40  ;;  %4835 = vmatpush3.bf16.msra.mxu0 %v5450_v15  ;;  %v5443_v35 = vld [vmem:[#allocation7 + $0x70] sm:$0xff]   ;;  %v5461_v40 = vld [vmem:[#allocation7 + $0xf8] sm:$0xff]  }
 0x29b   : > { %v1921_v6 = vadd.f32 %v1920_v33, %v6700_v7  ;;  %v6708_v8 = vadd.f32 %v1882_v63, %v6577_v11  ;;  %4723 = vmatpush3.bf16.msra.mxu1 %v5436_v58  ;;  %v5438_v11 = vld [vmem:[#allocation7 + $0x18] sm:$0xff]   ;;  %4836 = vmatprep.subr.bf16.mxu0 %v5451_v60 }
 0x29c   : > { %4724 = vmatprep.subr.bf16.mxu1 %v5437_v59  ;;  %v5453_v63 = vld [vmem:[#allocation7 + $0x78] sm:$0xff]  }
 0x29d   : > { %v1922_v36 = vadd.f32 %v1921_v6, %v6708_v8  ;;  %v5460_v6 = vld [vmem:[#allocation7 + $0xb0] sm:$0xff]   ;;  %v5454_v58 = vld [vmem:[#allocation7 + $0x38] sm:$0xff]  }
 0x29e   : > { %4837 = vmatpush3.bf16.msra.mxu0 %v5452_v29 }
 0x29f   : > { %v1923_v23 = vadd.f32 %v1922_v36, %v6697_v27  ;;  %4725 = vmatpush3.bf16.msra.mxu1 %v5438_v11  ;;  %4838 = vmatprep.subr.bf16.mxu0 %v5455_v53 }
 0x2a0   : > { %4726 = vmatprep.subr.bf16.mxu1 %v5439_v37 }
 0x2a1   : > { %v1924_v20 = vadd.f32 %v1923_v23, %v6704_v30 }
 0x2a2   : > { %4839 = vmatpush3.bf16.msra.mxu0 %v5456_v45 }
 0x2a3   : > { %v1925_v48 = vrot.slane %v1924_v20, 4  ;;  %4727 = vmatpush3.bf16.msra.mxu1 %v5440_v25  ;;  %4840 = vmatprep.subr.bf16.mxu0 %v5457_v51 }
 0x2a4   : > { %4728 = vmatprep.subr.bf16.mxu1 %v5441_v52 }
 0x2a5   : > { %v1926_v62 = vadd.f32 %v1925_v48, %v1924_v20 }
 0x2a6   : > { %4841 = vmatpush3.bf16.msra.mxu0 %v5458_v19 }
 0x2a7   : > { %v1927_v22 = vrot.slane %v1926_v62, 2  ;;  %4729 = vmatpush3.bf16.msra.mxu1 %v5442_v41  ;;  %4842 = vmatprep.subr.bf16.mxu0 %v5459_v61 }
 0x2a8   : > { %4730 = vmatprep.subr.bf16.mxu1 %v5443_v35 }
 0x2a9   : > { %v1928_v0 = vadd.f32 %v1927_v22, %v1926_v62 }
 0x2aa   : > { %4843 = vmatpush3.bf16.msra.mxu0 %v5460_v6 }
 0x2ab   : > { %v1929_v33 = vrot.slane %v1928_v0, 1  ;;  %4731 = vmatpush3.bf16.msra.mxu1 %v5444_v55  ;;  %4844 = vmatprep.subr.bf16.mxu0 %v5461_v40 }
 0x2ac   : > { %4732 = vmatprep.subr.bf16.mxu1 %v5453_v63 }
 0x2ad   : > { %v1930_v26 = vadd.f32 %v1929_v33, %v1928_v0 }
 0x2ae   : > { %4845 = vmatpush3.bf16.msra.mxu0 %v5462_v57 }
 0x2af   : > { %v1932_v36 = vmul.f32 0.00390625, %v1930_v26  ;;  %4733 = vmatpush3.bf16.msra.mxu1 %v5454_v58 }
 0x2b1   : > { %v6714_v15 = vsub.f32 %v6620_v5, %v1932_v36  ;;  %v6717_v23 = vsub.f32 %v6628_v34, %v1932_v36  ;;  %v6720_v59 = vsub.f32 %v6617_v13, %v1932_v36  ;;  %v6723_v20 = vsub.f32 %v6624_v44, %v1932_v36 }
 0x2b2   : > { %v6726_v11 = vsub.f32 %v6636_v32, %v1932_v36  ;;  %v6729_v60 = vsub.f32 %v6644_v10, %v1932_v36  ;;  %v6732_v29 = vsub.f32 %v6633_v28, %v1932_v36  ;;  %v6735_v5 = vsub.f32 %v6640_v54, %v1932_v36  ;;  %v5463_v10 = vld [vmem:[#allocation7 + $0x140] sm:$0xff]  }
 0x2b3   : > { %v6738_v34 = vsub.f32 %v6652_v17, %v1932_v36  ;;  %v6741_v13 = vsub.f32 %v6660_v42, %v1932_v36  ;;  %v6744_v44 = vsub.f32 %v6649_v4, %v1932_v36  ;;  %v6747_v32 = vsub.f32 %v6656_v2, %v1932_v36  ;;  %4942 = vmatprep.subr.bf16.mxu1 %v5463_v10 }
 0x2b4   : > { %v6750_v28 = vsub.f32 %v6668_v43, %v1932_v36  ;;  %v6753_v54 = vsub.f32 %v6676_v18, %v1932_v36  ;;  %v6756_v17 = vsub.f32 %v6665_v16, %v1932_v36  ;;  %v6759_v42 = vsub.f32 %v6672_v3, %v1932_v36 }
 0x2b5   : > { %v6762_v4 = vsub.f32 %v6684_v31, %v1932_v36  ;;  %v6765_v2 = vsub.f32 %v6692_v49, %v1932_v36  ;;  %v6768_v48 = vsub.f32 %v6681_v24, %v1932_v36  ;;  %v6771_v43 = vsub.f32 %v6688_v12, %v1932_v36 }
 0x2b6   : > { %v6774_v18 = vsub.f32 %v6700_v7, %v1932_v36  ;;  %v6777_v16 = vsub.f32 %v6708_v8, %v1932_v36  ;;  %v6780_v3 = vsub.f32 %v6697_v27, %v1932_v36  ;;  %v6783_v31 = vsub.f32 %v6704_v30, %v1932_v36 }
 0x2b7   : > { %v6786_v49 = vsub.f32 %v6589_v47, %v1932_v36  ;;  %v6789_v24 = vsub.f32 %v6595_v9, %v1932_v36  ;;  %v6792_v12 = vsub.f32 %v6586_v39, %v1932_v36  ;;  %v6799_v27 = vsub.f32 %v6592_v56, %v1932_v36 }
 0x2b8   : > { %v6802_v30 = vsub.f32 %v6604_v21, %v1932_v36  ;;  %v6807_v37 = vsub.f32 %v6612_v14, %v1932_v36  ;;  %v6812_v25 = vsub.f32 %v6601_v38, %v1932_v36  ;;  %v6817_v21 = vsub.f32 %v6608_v1, %v1932_v36 }
 0x2b9   : > { %v1965_v7 = vmul.f32 %v6786_v49, %v6786_v49  ;;  %v1966_v8 = vmul.f32 %v6789_v24, %v6789_v24  ;;  %v1967_v47 = vmul.f32 %v6792_v12, %v6792_v12  ;;  %v1968_v39 = vmul.f32 %v6799_v27, %v6799_v27 }
 0x2ba   : > { %v1969_v56 = vmul.f32 %v6802_v30, %v6802_v30  ;;  %v1970_v45 = vmul.f32 %v6807_v37, %v6807_v37  ;;  %v1971_v14 = vmul.f32 %v6812_v25, %v6812_v25  ;;  %v1972_v0 = vmul.f32 %v6817_v21, %v6817_v21 }
 0x2bb   : > { %v1997_v9 = vadd.f32 %v1966_v8, %v1965_v7  ;;  %v1973_v41 = vmul.f32 %v6714_v15, %v6714_v15  ;;  %v1974_v1 = vmul.f32 %v6717_v23, %v6717_v23  ;;  %v1975_v33 = vmul.f32 %v6720_v59, %v6720_v59 }
 0x2bc   : > { %v1976_v26 = vmul.f32 %v6723_v20, %v6723_v20  ;;  %v1977_v63 = vmul.f32 %v6726_v11, %v6726_v11  ;;  %v1978_v6 = vmul.f32 %v6729_v60, %v6729_v60  ;;  %v1979_v36 = vmul.f32 %v6732_v29, %v6732_v29 }
 0x2bd   : > { %v1998_v62 = vadd.f32 %v1997_v9, %v1967_v47  ;;  %v1980_v57 = vmul.f32 %v6735_v5, %v6735_v5  ;;  %v1981_v7 = vmul.f32 %v6738_v34, %v6738_v34  ;;  %v1982_v47 = vmul.f32 %v6741_v13, %v6741_v13 }
 0x2bf   : > { %v1999_v53 = vadd.f32 %v1998_v62, %v1968_v39  ;;  %v1983_v39 = vmul.f32 %v6744_v44, %v6744_v44 }
 0x2c1   : > { %v2000_v22 = vadd.f32 %v1999_v53, %v1969_v56  ;;  %v1984_v56 = vmul.f32 %v6747_v32, %v6747_v32 }
 0x2c3   : > { %v2001_v52 = vadd.f32 %v2000_v22, %v1970_v45  ;;  %v1985_v45 = vmul.f32 %v6750_v28, %v6750_v28 }
 0x2c5   : > { %v2002_v38 = vadd.f32 %v2001_v52, %v1971_v14  ;;  %v1986_v14 = vmul.f32 %v6753_v54, %v6753_v54 }
 0x2c7   : > { %v2003_v51 = vadd.f32 %v2002_v38, %v1972_v0  ;;  %v1987_v0 = vmul.f32 %v6756_v17, %v6756_v17 }
 0x2c9   : > { %v2004_v19 = vadd.f32 %v2003_v51, %v1973_v41  ;;  %v1988_v41 = vmul.f32 %v6759_v42, %v6759_v42 }
 0x2cb   : > { %v2005_v35 = vadd.f32 %v2004_v19, %v1974_v1  ;;  %v1989_v1 = vmul.f32 %v6762_v4, %v6762_v4 }
 0x2cd   : > { %v2006_v55 = vadd.f32 %v2005_v35, %v1975_v33  ;;  %v1990_v33 = vmul.f32 %v6765_v2, %v6765_v2 }
 0x2cf   : > { %v2007_v61 = vadd.f32 %v2006_v55, %v1976_v26  ;;  %v1991_v26 = vmul.f32 %v6768_v48, %v6768_v48 }
 0x2d1   : > { %v2008_v40 = vadd.f32 %v2007_v61, %v1977_v63  ;;  %v1992_v63 = vmul.f32 %v6771_v43, %v6771_v43 }
 0x2d3   : > { %v2009_v58 = vadd.f32 %v2008_v40, %v1978_v6  ;;  %v1993_v6 = vmul.f32 %v6774_v18, %v6774_v18 }
 0x2d5   : > { %v2010_v10 = vadd.f32 %v2009_v58, %v1979_v36  ;;  %v5472_v36 = vld [vmem:[#allocation7 + $0x1c0] sm:$0xff]   ;;  %v1994_v58 = vmul.f32 %v6777_v16, %v6777_v16 }
 0x2d6   : > { %5054 = vmatprep.subr.bf16.mxu0 %v5472_v36 }
 0x2d7   : > { %v2011_v8 = vadd.f32 %v2010_v10, %v1980_v57  ;;  %v1995_v10 = vmul.f32 %v6780_v3, %v6780_v3 }
 0x2d9   : > { %v2012_v9 = vadd.f32 %v2011_v8, %v1981_v7  ;;  %v1996_v8 = vmul.f32 %v6783_v31, %v6783_v31 }
 0x2db   : > { %v2013_v62 = vadd.f32 %v2012_v9, %v1982_v47 }
 0x2dd   : > { %v2014_v53 = vadd.f32 %v2013_v62, %v1983_v39 }
 0x2df   : > { %v2015_v22 = vadd.f32 %v2014_v53, %v1984_v56 }
 0x2e1   : > { %v2016_v52 = vadd.f32 %v2015_v22, %v1985_v45 }
 0x2e3   : > { %v2017_v38 = vadd.f32 %v2016_v52, %v1986_v14 }
 0x2e5   : > { %v2018_v51 = vadd.f32 %v2017_v38, %v1987_v0 }
 0x2e7   : > { %v2019_v19 = vadd.f32 %v2018_v51, %v1988_v41 }
 0x2e9   : > { %v2020_v35 = vadd.f32 %v2019_v19, %v1989_v1 }
 0x2eb   : > { %v2021_v55 = vadd.f32 %v2020_v35, %v1990_v33 }
 0x2ed   : > { %v2022_v61 = vadd.f32 %v2021_v55, %v1991_v26 }
 0x2ef   : > { %v2023_v40 = vadd.f32 %v2022_v61, %v1992_v63 }
 0x2f1   : > { %v2024_v57 = vadd.f32 %v2023_v40, %v1993_v6 }
 0x2f3   : > { %v2025_v7 = vadd.f32 %v2024_v57, %v1994_v58 }
 0x2f5   : > { %v2026_v47 = vadd.f32 %v2025_v7, %v1995_v10 }
 0x2f7   : > { %v2027_v9 = vadd.f32 %v2026_v47, %v1996_v8 }
 0x2f9   : > { %v2028_v39 = vrot.slane %v2027_v9, 4 }
 0x2fb   : > { %v2029_v62 = vadd.f32 %v2028_v39, %v2027_v9 }
 0x2fd   : > { %v2030_v56 = vrot.slane %v2029_v62, 2 }
 0x2ff   : > { %v2031_v53 = vadd.f32 %v2030_v56, %v2029_v62  ;;  %v5464_v62 = vld [vmem:[#allocation7 + $0x100] sm:$0xff]  }
 0x301   : > { %v2032_v45 = vrot.slane %v2031_v53, 1 }
 0x303   : > { %v2033_v22 = vadd.f32 %v2032_v45, %v2031_v53 }
 0x305   : > { %v2034_v14 = vmul.f32 0.00390625, %v2033_v22  ;;  %v5465_v22 = vld [vmem:[#allocation7 + $0x148] sm:$0xff]  }
 0x307   : > { %v2035_v52 = vadd.f32 1e-05, %v2034_v14  ;;  %v5474_v14 = vld [vmem:[#allocation7 + $0x180] sm:$0xff]  }
 0x309   : > { %5503 = vrsqrt.f32 %v2035_v52 }
 0x313   : > { %v6873_v0 = vpop.eup %5503 }
 0x314   : > { %v2037_v38 = vmul.f32 %v6873_v0, %v6786_v49  ;;  %v2038_v41 = vmul.f32 %v6873_v0, %v6789_v24  ;;  %v2039_v51 = vmul.f32 %v6873_v0, %v6792_v12  ;;  %v2040_v1 = vmul.f32 %v6873_v0, %v6799_v27 }
 0x315   : > { %v2041_v19 = vmul.f32 %v6873_v0, %v6802_v30  ;;  %v2042_v33 = vmul.f32 %v6873_v0, %v6807_v37  ;;  %v2043_v12 = vmul.f32 %v6873_v0, %v6812_v25  ;;  %v2044_v27 = vmul.f32 %v6873_v0, %v6817_v21 }
 0x316   : > { %v2069_v35 = vmax.f32 %v2037_v38, 0.0  ;;  %v2070_v26 = vmax.f32 %v2038_v41, 0.0  ;;  %v2071_v55 = vmax.f32 %v2039_v51, 0.0  ;;  %v2072_v63 = vmax.f32 %v2040_v1, 0.0  ;;  %v5476_v38 = vld [vmem:[#allocation7 + $0x1c8] sm:$0xff]  }
 0x317   : > { %v2073_v49 = vmax.f32 %v2041_v19, 0.0  ;;  %v2074_v61 = vmax.f32 %v2042_v33, 0.0  ;;  %v2075_v8 = vmax.f32 %v2043_v12, 0.0  ;;  %v2076_v47 = vmax.f32 %v2044_v27, 0.0  ;;  %v5466_v33 = vld [vmem:[#allocation7 + $0x108] sm:$0xff]   ;;  %v5468_v27 = vld [vmem:[#allocation7 + $0x110] sm:$0xff]  }
 0x318   : > { %v6887_v6 = vpack.c.bf16 %v2070_v26, %v2069_v35  ;;  %v6889_v24 = vpack.c.bf16 %v2072_v63, %v2071_v55  ;;  %v2045_v41 = vmul.f32 %v6873_v0, %v6714_v15  ;;  %v2046_v51 = vmul.f32 %v6873_v0, %v6717_v23  ;;  %v5467_v15 = vld [vmem:[#allocation7 + $0x150] sm:$0xff]   ;;  %v5478_v26 = vld [vmem:[#allocation7 + $0x188] sm:$0xff]  }
 0x319   : > { %v6896_v30 = vpack.c.bf16 %v2074_v61, %v2073_v49  ;;  %v6920_v1 = vpack.c.bf16 %v2076_v47, %v2075_v8  ;;  %v5480_v55 = vld [vmem:[#allocation7 + $0x1d0] sm:$0xff]   ;;  %v5483_v8 = vld [vmem:[#allocation7 + $0x1d8] sm:$0xff]  }
 0x31a   : > { %2965 = vmatprep.mubr.bf16.mxu1 %v6889_v24  ;;  %v2118_v37 = vshrl.u32 %v6889_v24, 16  ;;  %v2182_v40 = vshll.u32 %v6889_v24, 16  ;;  %v2121_v36 = vshrl.u32 %v6887_v6, 16  ;;  %v2186_v10 = vshll.u32 %v6887_v6, 16 }
 0x31b   : > { %v6903_v21 = vshrl.u32 %v6896_v30, 16  ;;  %v6927_v35 = vshll.u32 %v6896_v30, 16  ;;  %v2077_v63 = vmax.f32 %v2045_v41, 0.0  ;;  %v2078_v49 = vmax.f32 %v2046_v51, 0.0  ;;  %v5473_v41 = vld [vmem:[#allocation7 + $0x120] sm:$0xff]   ;;  %v5475_v51 = vld [vmem:[#allocation7 + $0x168] sm:$0xff]  }
 0x31c   : > { %v2181_v58 = vrot.slane %v2118_v37, 7  ;;  %v2185_v57 = vrot.slane %v2121_v36, 7  ;;  %v2277_v7 = vrot.slane %v2182_v40, 1  ;;  %v2279_v52 = vrot.slane %v2186_v10, 1 }
 0x31d   : > { %v2189_v19 = vrot.slane %v6903_v21, 7  ;;  %v6931_v12 = vshrl.u32 %v6920_v1, 16  ;;  %v6945_v47 = vpack.c.bf16 %v2078_v49, %v2077_v63  ;;  %v5477_v49 = vld [vmem:[#allocation7 + $0x128] sm:$0xff]  }
 0x31e   : > { %v2184_v9 = vor.u32 %v2182_v40, %v2181_v58  ;;  %v2188_v25 = vor.u32 %v2186_v10, %v2185_v57  ;;  %v2278_v39 = vor.u32 %v2277_v7, %v2118_v37  ;;  %v2280_v23 = vor.u32 %v2279_v52, %v2121_v36  ;;  %v5482_v58 = vld [vmem:[#allocation7 + $0x190] sm:$0xff]  }
 0x31f   : > { %v2192_v61 = vor.u32 %v6927_v35, %v2189_v19  ;;  %v2067_v57 = vmul.f32 %v6873_v0, %v6780_v3  ;;  %v2193_v3 = vrot.slane %v6931_v12, 7  ;;  %v5488_v19 = vld [vmem:[#allocation7 + $0x1a0] sm:$0xff]  }
 0x320   : > { %v6907_v56 = vsel %vm5933_vm4, %v2118_v37, %v2184_v9  ;;  %v2262_v53 = vsel %vm5933_vm4, %v2121_v36, %v2188_v25  ;;  %v6913_v45 = vsel %vm5938_vm5, %v2278_v39, %v2182_v40  ;;  %v2047_v37 = vmul.f32 %v6873_v0, %v6720_v59  ;;  %v5469_v40 = vld [vmem:[#allocation7 + $0x158] sm:$0xff]  }
 0x321   : > { %2966 = vmatmul.mubr.bf16.vlgmr.msra.gmra.mrb[128].mxu1 %v6907_v56  ;;  %3126 = vmatprep.mubr.bf16.mxu0 %v2262_v53  ;;  %v2048_v36 = vmul.f32 %v6873_v0, %v6723_v20  ;;  %v6941_v7 = vsel %vm5938_vm5, %v2280_v23, %v2186_v10  ;;  %v2068_v59 = vmul.f32 %v6873_v0, %v6783_v31  ;;  %v5470_v10 = vld [vmem:[#allocation7 + $0x118] sm:$0xff]   ;;  %v6957_v9 = vshll.u32 %v6920_v1, 16  ;;  %v5471_v31 = vld [vmem:[#allocation7 + $0x160] sm:$0xff]   ;;  %v5489_v23 = vld [vmem:[#allocation7 + $0x1e8] sm:$0xff]  }
 0x322   : > { %2973 = vmatprep.mubr.bf16.mxu1 %v6887_v6  ;;  %3127 = vmatmul.mubr.bf16.vlgmr.msra.gmra.mrb[160].mxu0 %v6913_v45  ;;  %v6952_v20 = vsel %vm5933_vm4, %v6903_v21, %v2192_v61  ;;  %v5484_v25 = vld [vmem:[#allocation7 + $0x198] sm:$0xff]   ;;  %v2079_v39 = vmax.f32 %v2047_v37, 0.0  ;;  %v6983_v61 = vshll.u32 %v6945_v47, 16  ;;  %v5490_v37 = vld [vmem:[#allocation7 + $0x1a8] sm:$0xff]  }
 0x323   : > { %4943 = vmatpush3.bf16.msra.mxu1 %v5464_v62  ;;  %3134 = vmatprep.mubr.bf16.mxu0 %v6907_v56  ;;  %v2080_v62 = vmax.f32 %v2048_v36, 0.0  ;;  %v2196_v52 = vor.u32 %v6957_v9, %v2193_v3  ;;  %v5491_v36 = vld [vmem:[#allocation7 + $0x1f0] sm:$0xff]  }
 0x324   : > { %4944 = vmatprep.subr.bf16.mxu1 %v5465_v22  ;;  %5055 = vmatpush3.bf16.msra.mxu0 %v5474_v14  ;;  %v2099_v22 = vmax.f32 %v2067_v57, 0.0  ;;  %v2100_v14 = vmax.f32 %v2068_v59, 0.0 }
 0x325   : > { %5056 = vmatprep.subr.bf16.mxu0 %v5476_v38  ;;  %v6961_v38 = vshrl.u32 %v6945_v47, 16 }
 0x326   : > { %v6971_v63 = vpack.c.bf16 %v2100_v14, %v2099_v22  ;;  %v2283_v14 = vrot.slane %v6957_v9, 1 }
 0x327   : > { %4945 = vmatpush3.bf16.msra.mxu1 %v5466_v33  ;;  %v2049_v33 = vmul.f32 %v6873_v0, %v6726_v11  ;;  %v6978_v11 = vsel %vm5933_vm4, %v6931_v12, %v2196_v52  ;;  %v5493_v52 = vld [vmem:[#allocation7 + $0x1f8] sm:$0xff]  }
 0x328   : > { %4946 = vmatprep.subr.bf16.mxu1 %v5467_v15  ;;  %5057 = vmatpush3.bf16.msra.mxu0 %v5478_v26  ;;  %v2050_v15 = vmul.f32 %v6873_v0, %v6729_v60  ;;  %v2281_v26 = vrot.slane %v6927_v35, 1  ;;  %v2197_v60 = vrot.slane %v6961_v38, 7  ;;  %v6991_v3 = vshll.u32 %v6971_v63, 16 }
 0x329   : > { %2974 = vmatmul.mubr.bf16.gmra.mrb[132].mxu1 %v2262_v53  ;;  %5058 = vmatprep.subr.bf16.mxu0 %v5480_v55  ;;  %v5487_v53 = vld [vmem:[#allocation7 + $0x1e0] sm:$0xff]   ;;  %v6969_v55 = vpack.c.bf16 %v2080_v62, %v2079_v39  ;;  %v2051_v62 = vmul.f32 %v6873_v0, %v6732_v29 }
 0x32a   : > { %2981 = vmatprep.mubr.bf16.mxu1 %v6889_v24  ;;  %3135 = vmatmul.mubr.bf16.gmra.mrb[164].mxu0 %v6941_v7  ;;  %v2082_v57 = vmax.f32 %v2050_v15, 0.0  ;;  %v2307_v39 = vrot.slane %v6991_v3, 1  ;;  %v7021_v15 = vld [vmem:[#allocation7 + $0x200] sm:$0xff]  }
 0x32b   : > { %3142 = vmatprep.mubr.bf16.mxu0 %v6952_v20  ;;  %4947 = vmatpush3.bf16.msra.mxu1 %v5468_v27  ;;  %v5479_v27 = vld [vmem:[#allocation7 + $0x170] sm:$0xff]   ;;  %v6988_v59 = vshrl.u32 %v6969_v55, 16 }
 0x32c   : > { %4948 = vmatprep.subr.bf16.mxu1 %v5469_v40  ;;  %5059 = vmatpush3.bf16.msra.mxu0 %v5482_v58  ;;  %v2081_v40 = vmax.f32 %v2049_v33, 0.0  ;;  %v2282_v58 = vor.u32 %v2281_v26, %v6903_v21  ;;  %v5492_v21 = vld [vmem:[#allocation7 + $0x1b0] sm:$0xff]   ;;  %v5494_v33 = vld [vmem:[#allocation7 + $0x1b8] sm:$0xff]  }
 0x32d   : > { %5060 = vmatprep.subr.bf16.mxu0 %v5483_v8  ;;  %v2200_v8 = vor.u32 %v6983_v61, %v2197_v60  ;;  %v2083_v60 = vmax.f32 %v2051_v62, 0.0  ;;  %v2055_v62 = vmul.f32 %v6873_v0, %v6744_v44 }
 0x32e   : > { %v7005_v22 = vsel %vm5938_vm5, %v2282_v58, %v6927_v35 }
 0x32f   : > { %4949 = vmatpush3.bf16.msra.mxu1 %v5470_v10  ;;  %v5481_v10 = vld [vmem:[#allocation7 + $0x130] sm:$0xff]   ;;  %v7015_v29 = vsel %vm5933_vm4, %v6961_v38, %v2200_v8 }
 0x330   : > { %4950 = vmatprep.subr.bf16.mxu1 %v5471_v31  ;;  %5061 = vmatpush3.bf16.msra.mxu0 %v5484_v25  ;;  %v5485_v31 = vld [vmem:[#allocation7 + $0x178] sm:$0xff]   ;;  %v6994_v25 = vshrl.u32 %v6971_v63, 16 }
 0x331   : > { %2982 = vmatmul.mubr.bf16.gmra.mrb[136].mxu1 %v6907_v56  ;;  %5062 = vmatprep.subr.bf16.mxu0 %v5487_v53  ;;  %v2052_v53 = vmul.f32 %v6873_v0, %v6735_v5  ;;  %v2201_v5 = vrot.slane %v6988_v59, 7 }
 0x332   : > { %2989 = vmatprep.mubr.bf16.mxu1 %v6896_v30  ;;  %3143 = vmatmul.mubr.bf16.gmra.mrb[168].mxu0 %v6913_v45  ;;  %v2308_v35 = vor.u32 %v2307_v39, %v6994_v25 }
 0x333   : > { %3150 = vmatprep.mubr.bf16.mxu0 %v6978_v11  ;;  %4951 = vmatpush3.bf16.msra.mxu1 %v5473_v41  ;;  %v7008_v41 = vpack.c.bf16 %v2082_v57, %v2081_v40  ;;  %v2053_v40 = vmul.f32 %v6873_v0, %v6738_v34 }
 0x334   : > { %4952 = vmatprep.subr.bf16.mxu1 %v5475_v51  ;;  %5063 = vmatpush3.bf16.msra.mxu0 %v5488_v19  ;;  %v5486_v51 = vld [vmem:[#allocation7 + $0x138] sm:$0xff]   ;;  %v2202_v19 = vshll.u32 %v6969_v55, 16  ;;  %v7026_v26 = vsel %vm5938_vm5, %v2308_v35, %v6991_v3 }
 0x335   : > { %5064 = vmatprep.subr.bf16.mxu0 %v5489_v23  ;;  %v2284_v23 = vor.u32 %v2283_v14, %v6931_v12  ;;  %v2285_v12 = vrot.slane %v6983_v61, 1 }
 0x336   : > { %v2287_v14 = vrot.slane %v2202_v19, 1 }
 0x337   : > { %4953 = vmatpush3.bf16.msra.mxu1 %v5477_v49  ;;  %v2084_v49 = vmax.f32 %v2052_v53, 0.0  ;;  %v7037_v58 = vsel %vm5938_vm5, %v2284_v23, %v6957_v9  ;;  %v2206_v9 = vshll.u32 %v7008_v41, 16 }
 0x338   : > { %4954 = vmatprep.subr.bf16.mxu1 %v5479_v27  ;;  %5065 = vmatpush3.bf16.msra.mxu0 %v5490_v37  ;;  %v2204_v27 = vor.u32 %v2202_v19, %v2201_v5  ;;  %v2136_v37 = vshrl.u32 %v7008_v41, 16  ;;  %v2288_v35 = vor.u32 %v2287_v14, %v6988_v59  ;;  %v2060_v14 = vmul.f32 %v6873_v0, %v6759_v42 }
 0x339   : > { %2990 = vmatmul.mubr.bf16.gmra.mrb[140].mxu1 %v6952_v20  ;;  %5066 = vmatprep.subr.bf16.mxu0 %v5491_v36  ;;  %v2054_v36 = vmul.f32 %v6873_v0, %v6741_v13  ;;  %v7042_v57 = vpack.c.bf16 %v2084_v49, %v2083_v60  ;;  %v2057_v60 = vmul.f32 %v6873_v0, %v6750_v28 }
 0x33a   : > { %2997 = vmatprep.mubr.bf16.mxu1 %v6920_v1  ;;  %3151 = vmatmul.mubr.bf16.gmra.mrb[172].mxu0 %v7005_v22  ;;  %v7049_v34 = vsel %vm5933_vm4, %v6988_v59, %v2204_v27  ;;  %v2205_v8 = vrot.slane %v2136_v37, 7  ;;  %v7082_v49 = vsel %vm5938_vm5, %v2288_v35, %v2202_v19  ;;  %v2289_v27 = vrot.slane %v2206_v9, 1 }
 0x33b   : > { %3158 = vmatprep.mubr.bf16.mxu0 %v7015_v29  ;;  %4955 = vmatpush3.bf16.msra.mxu1 %v5481_v10  ;;  %v2286_v10 = vor.u32 %v2285_v12, %v6961_v38  ;;  %v2086_v13 = vmax.f32 %v2054_v36, 0.0  ;;  %v2139_v39 = vshrl.u32 %v7042_v57, 16 }
 0x33c   : > { %4956 = vmatprep.subr.bf16.mxu1 %v5485_v31  ;;  %5067 = vmatpush3.bf16.msra.mxu0 %v5492_v21  ;;  %v2085_v31 = vmax.f32 %v2053_v40, 0.0  ;;  %v2208_v21 = vor.u32 %v2206_v9, %v2205_v8  ;;  %v2058_v40 = vmul.f32 %v6873_v0, %v6753_v54  ;;  %v2290_v36 = vor.u32 %v2289_v27, %v2136_v37 }
 0x33d   : > { %5068 = vmatprep.subr.bf16.mxu0 %v5493_v52  ;;  %v7061_v53 = vsel %vm5938_vm5, %v2286_v10, %v6983_v61  ;;  %v2056_v52 = vmul.f32 %v6873_v0, %v6747_v32  ;;  %v2209_v5 = vrot.slane %v2139_v39, 7  ;;  %v2210_v61 = vshll.u32 %v7042_v57, 16 }
 0x33e   : > { %v7065_v38 = vpack.c.bf16 %v2086_v13, %v2085_v31  ;;  %v7071_v44 = vsel %vm5933_vm4, %v2136_v37, %v2208_v21  ;;  %v2089_v8 = vmax.f32 %v2057_v60, 0.0  ;;  %v2090_v10 = vmax.f32 %v2058_v40, 0.0 }
 0x33f   : > { %4957 = vmatpush3.bf16.msra.mxu1 %v5486_v51  ;;  %v2087_v51 = vmax.f32 %v2055_v62, 0.0  ;;  %v2212_v32 = vor.u32 %v2210_v61, %v2209_v5  ;;  %v2059_v13 = vmul.f32 %v6873_v0, %v6756_v17  ;;  %v7102_v21 = vsel %vm5938_vm5, %v2290_v36, %v2206_v9 }
 0x340   : > { %5069 = vmatpush3.bf16.msra.mxu0 %v5494_v33  ;;  %5238 = vmatprep.subr.bf16.mxu1 %v7021_v15  ;;  %v2088_v33 = vmax.f32 %v2056_v52, 0.0  ;;  %v2142_v23 = vshrl.u32 %v7065_v38, 16  ;;  %v2214_v19 = vshll.u32 %v7065_v38, 16  ;;  %v2291_v62 = vrot.slane %v2210_v61, 1 }
 0x341   : > { %2998 = vmatmul.mubr.bf16.gmra.mrb[144].mxu1 %v6978_v11  ;;  %v7092_v59 = vsel %vm5933_vm4, %v2139_v39, %v2212_v32  ;;  %v7106_v52 = vpack.c.bf16 %v2090_v10, %v2089_v8  ;;  %v2091_v35 = vmax.f32 %v2059_v13, 0.0  ;;  %v2061_v32 = vmul.f32 %v6873_v0, %v6762_v4 }
 0x342   : > { %3005 = vmatprep.mubr.bf16.mxu1 %v6945_v47  ;;  %3159 = vmatmul.mubr.bf16.gmra.mrb[176].mxu0 %v7037_v58  ;;  %v7086_v12 = vpack.c.bf16 %v2088_v33, %v2087_v51  ;;  %v2213_v28 = vrot.slane %v2142_v23, 7  ;;  %v2292_v5 = vor.u32 %v2291_v62, %v2139_v39  ;;  %v2092_v51 = vmax.f32 %v2060_v14, 0.0 }
 0x343   : > { %3166 = vmatprep.mubr.bf16.mxu0 %v7049_v34  ;;  %v2148_v42 = vshrl.u32 %v7106_v52, 16  ;;  %v2293_v27 = vrot.slane %v2214_v19, 1  ;;  %v2062_v40 = vmul.f32 %v6873_v0, %v6765_v2  ;;  %v2093_v8 = vmax.f32 %v2061_v32, 0.0 }
 0x344   : > { %v2216_v31 = vor.u32 %v2214_v19, %v2213_v28  ;;  %v2145_v54 = vshrl.u32 %v7086_v12, 16  ;;  %v2218_v9 = vshll.u32 %v7086_v12, 16  ;;  %v7122_v60 = vsel %vm5938_vm5, %v2292_v5, %v2210_v61 }
 0x345   : > { %v7126_v28 = vpack.c.bf16 %v2092_v51, %v2091_v35  ;;  %v2221_v4 = vrot.slane %v2148_v42, 7  ;;  %v2222_v61 = vshll.u32 %v7106_v52, 16  ;;  %v2294_v36 = vor.u32 %v2293_v27, %v2142_v23 }
 0x346   : > { %v7112_v37 = vsel %vm5933_vm4, %v2142_v23, %v2216_v31  ;;  %v2217_v17 = vrot.slane %v2145_v54, 7  ;;  %v2094_v10 = vmax.f32 %v2062_v40, 0.0  ;;  %v2063_v13 = vmul.f32 %v6873_v0, %v6768_v48 }
 0x347   : > { %v2224_v31 = vor.u32 %v2222_v61, %v2221_v4  ;;  %v2151_v2 = vshrl.u32 %v7126_v28, 16  ;;  %v7142_v62 = vsel %vm5938_vm5, %v2294_v36, %v2214_v19  ;;  %v2295_v14 = vrot.slane %v2218_v9, 1 }
 0x348   : > { %v2220_v33 = vor.u32 %v2218_v9, %v2217_v17  ;;  %v2064_v17 = vmul.f32 %v6873_v0, %v6771_v43  ;;  %v7146_v5 = vpack.c.bf16 %v2094_v10, %v2093_v8  ;;  %v2226_v19 = vshll.u32 %v7126_v28, 16 }
 0x349   : > { %3006 = vmatmul.mubr.bf16.gmra.mrb[148].mxu1 %v7015_v29  ;;  %v7152_v23 = vsel %vm5933_vm4, %v2148_v42, %v2224_v31  ;;  %v2225_v48 = vrot.slane %v2151_v2, 7  ;;  %v2296_v35 = vor.u32 %v2295_v14, %v2145_v54  ;;  %v2095_v51 = vmax.f32 %v2063_v13, 0.0 }
 0x34a   : > { %3013 = vmatprep.mubr.bf16.mxu1 %v6969_v55  ;;  %3167 = vmatmul.mubr.bf16.gmra.mrb[180].mxu0 %v7061_v53  ;;  %v7132_v39 = vsel %vm5933_vm4, %v2145_v54, %v2220_v33  ;;  %v2096_v33 = vmax.f32 %v2064_v17, 0.0  ;;  %v2154_v43 = vshrl.u32 %v7146_v5, 16  ;;  %v2065_v27 = vmul.f32 %v6873_v0, %v6774_v18 }
 0x34b   : > { %3174 = vmatprep.mubr.bf16.mxu0 %v7071_v44  ;;  %v2228_v32 = vor.u32 %v2226_v19, %v2225_v48  ;;  %v7162_v40 = vsel %vm5938_vm5, %v2296_v35, %v2218_v9  ;;  %v2297_v4 = vrot.slane %v2222_v61, 1  ;;  %v2066_v36 = vmul.f32 %v6873_v0, %v6777_v16 }
 0x34c   : > { %v7166_v8 = vpack.c.bf16 %v2096_v33, %v2095_v51  ;;  %v2229_v18 = vrot.slane %v2154_v43, 7  ;;  %v2230_v9 = vshll.u32 %v7146_v5, 16  ;;  %v2097_v31 = vmax.f32 %v2065_v27, 0.0 }
 0x34d   : > { %v7172_v54 = vsel %vm5933_vm4, %v2151_v2, %v2228_v32  ;;  %v2298_v10 = vor.u32 %v2297_v4, %v2148_v42  ;;  %v2098_v13 = vmax.f32 %v2066_v36, 0.0  ;;  %v2299_v17 = vrot.slane %v2226_v19, 1 }
 0x34e   : > { %v2232_v14 = vor.u32 %v2230_v9, %v2229_v18  ;;  %v2157_v16 = vshrl.u32 %v7166_v8, 16  ;;  %v2234_v51 = vshll.u32 %v7166_v8, 16  ;;  %v2301_v4 = vrot.slane %v2230_v9, 1 }
 0x34f   : > { %v7180_v0 = vsel %vm5938_vm5, %v2298_v10, %v2222_v61  ;;  %v7182_v48 = vpack.c.bf16 %v2098_v13, %v2097_v31  ;;  %v2300_v33 = vor.u32 %v2299_v17, %v2151_v2  ;;  %v2241_v17 = vrot.slane %v6994_v25, 7 }
 0x350   : > { %v7188_v42 = vsel %vm5933_vm4, %v2154_v43, %v2232_v14  ;;  %v2233_v35 = vrot.slane %v2157_v16, 7  ;;  %v2302_v10 = vor.u32 %v2301_v4, %v2154_v43  ;;  %v2303_v13 = vrot.slane %v2234_v51, 1 }
 0x351   : > { %3014 = vmatmul.mubr.bf16.gmra.mrb[152].mxu1 %v7049_v34  ;;  %v2160_v61 = vshrl.u32 %v7182_v48, 16  ;;  %v7196_v27 = vsel %vm5938_vm5, %v2300_v33, %v2226_v19  ;;  %v2238_v2 = vshll.u32 %v7182_v48, 16 }
 0x352   : > { %3021 = vmatprep.mubr.bf16.mxu1 %v7008_v41  ;;  %3175 = vmatmul.mubr.bf16.gmra.mrb[184].mxu0 %v7082_v49  ;;  %v2236_v32 = vor.u32 %v2234_v51, %v2233_v35  ;;  %v7209_v19 = vsel %vm5938_vm5, %v2302_v10, %v2230_v9  ;;  %v2304_v43 = vor.u32 %v2303_v13, %v2157_v16 }
 0x353   : > { %3182 = vmatprep.mubr.bf16.mxu0 %v7092_v59  ;;  %v2237_v18 = vrot.slane %v2160_v61, 7  ;;  %v2244_v35 = vor.u32 %v6991_v3, %v2241_v17  ;;  %v2305_v33 = vrot.slane %v2238_v2, 1 }
 0x354   : > { %v7202_v36 = vsel %vm5933_vm4, %v2157_v16, %v2236_v32  ;;  %v7223_v9 = vsel %vm5938_vm5, %v2304_v43, %v2234_v51  ;;  %v5496_v51 = vld [vmem:[#allocation7 + $0x208] sm:$0xff]  }
 0x355   : > { %v2240_v31 = vor.u32 %v2238_v2, %v2237_v18  ;;  %v7230_v32 = vsel %vm5933_vm4, %v6994_v25, %v2244_v35  ;;  %v2306_v16 = vor.u32 %v2305_v33, %v2160_v61 }
 0x357   : > { %v7215_v14 = vsel %vm5933_vm4, %v2160_v61, %v2240_v31  ;;  %v7236_v3 = vsel %vm5938_vm5, %v2306_v16, %v2238_v2 }
 0x359   : > { %3022 = vmatmul.mubr.bf16.gmra.mrb[156].mxu1 %v7071_v44 }
 0x35a   : > { %3029 = vmatprep.mubr.bf16.mxu1 %v7042_v57  ;;  %3183 = vmatmul.mubr.bf16.gmra.mrb[188].mxu0 %v7102_v21 }
 0x35b   : > { %3190 = vmatprep.mubr.bf16.mxu0 %v7112_v37 }
 0x361   : > { %3030 = vmatmul.mubr.bf16.gmra.mrb[160].mxu1 %v7092_v59 }
 0x362   : > { %3037 = vmatprep.mubr.bf16.mxu1 %v7065_v38  ;;  %3191 = vmatmul.mubr.bf16.gmra.mrb[192].mxu0 %v7122_v60 }
 0x363   : > { %3198 = vmatprep.mubr.bf16.mxu0 %v7132_v39 }
 0x369   : > { %3038 = vmatmul.mubr.bf16.gmra.mrb[164].mxu1 %v7112_v37 }
 0x36a   : > { %3045 = vmatprep.mubr.bf16.mxu1 %v7086_v12  ;;  %3199 = vmatmul.mubr.bf16.gmra.mrb[196].mxu0 %v7142_v62 }
 0x36b   : > { %3206 = vmatprep.mubr.bf16.mxu0 %v7152_v23 }
 0x371   : > { %3046 = vmatmul.mubr.bf16.gmra.mrb[168].mxu1 %v7132_v39 }
 0x372   : > { %3053 = vmatprep.mubr.bf16.mxu1 %v7106_v52  ;;  %3207 = vmatmul.mubr.bf16.gmra.mrb[200].mxu0 %v7162_v40 }
 0x373   : > { %3214 = vmatprep.mubr.bf16.mxu0 %v7172_v54 }
 0x379   : > { %3054 = vmatmul.mubr.bf16.gmra.mrb[172].mxu1 %v7152_v23 }
 0x37a   : > { %3061 = vmatprep.mubr.bf16.mxu1 %v7126_v28  ;;  %3215 = vmatmul.mubr.bf16.gmra.mrb[204].mxu0 %v7180_v0 }
 0x37b   : > { %3222 = vmatprep.mubr.bf16.mxu0 %v7188_v42 }
 0x381   : > { %3062 = vmatmul.mubr.bf16.gmra.mrb[176].mxu1 %v7172_v54 }
 0x382   : > { %3069 = vmatprep.mubr.bf16.mxu1 %v7146_v5  ;;  %3223 = vmatmul.mubr.bf16.gmra.mrb[208].mxu0 %v7196_v27 }
 0x383   : > { %3230 = vmatprep.mubr.bf16.mxu0 %v7202_v36 }
 0x389   : > { %3070 = vmatmul.mubr.bf16.gmra.mrb[180].mxu1 %v7188_v42 }
 0x38a   : > { %3077 = vmatprep.mubr.bf16.mxu1 %v7166_v8  ;;  %3231 = vmatmul.mubr.bf16.gmra.mrb[212].mxu0 %v7209_v19 }
 0x38b   : > { %3238 = vmatprep.mubr.bf16.mxu0 %v7215_v14 }
 0x391   : > { %3078 = vmatmul.mubr.bf16.gmra.mrb[184].mxu1 %v7202_v36 }
 0x392   : > { %3085 = vmatprep.mubr.bf16.mxu1 %v7182_v48  ;;  %3239 = vmatmul.mubr.bf16.gmra.mrb[216].mxu0 %v7223_v9 }
 0x393   : > { %3246 = vmatprep.mubr.bf16.mxu0 %v7230_v32 }
 0x399   : > { %3086 = vmatmul.mubr.bf16.gmra.mrb[188].mxu1 %v7215_v14 }
 0x39a   : > { %3247 = vmatmul.mubr.bf16.gmra.mrb[220].mxu0 %v7236_v3  ;;  %3287 = vmatprep.mubr.bf16.mxu1 %v6941_v7  ;;  %v5502_v7 = vld [vmem:[#allocation7 + $0x238] sm:$0xff]  }
 0x39b   : > { %3448 = vmatprep.mubr.bf16.mxu0 %v6889_v24 }
 0x3a1   : > { %3288 = vmatmul.mubr.bf16.vlgmr.msra.gmra.mrb[192].mxu1 %v6887_v6  ;;  %v5499_v6 = vld [vmem:[#allocation7 + $0x220] sm:$0xff]  }
 0x3a2   : > { %3295 = vmatprep.mubr.bf16.mxu1 %v6913_v45  ;;  %3449 = vmatmul.mubr.bf16.vlgmr.msra.gmra.mrb[224].mxu0 %v6907_v56  ;;  %v5500_v56 = vld [vmem:[#allocation7 + $0x228] sm:$0xff]  }
 0x3a3   : > { %5239 = vmatpush3.bf16.msra.mxu1 %v7021_v15  ;;  %3456 = vmatprep.mubr.bf16.mxu0 %v6896_v30 }
 0x3a4   : > { %5240 = vmatprep.subr.bf16.mxu1 %v5496_v51 }
 0x3a7   : > { %5241 = vmatpush3.bf16.msra.mxu1 %v5496_v51 }
 0x3a8   : > { %5242 = vmatprep.subr.bf16.mxu1 %v5497_v46 }
 0x3a9   : > { %3296 = vmatmul.mubr.bf16.gmra.mrb[196].mxu1 %v6889_v24  ;;  %v5501_v24 = vld [vmem:[#allocation7 + $0x230] sm:$0xff]  }
 0x3aa   : > { %3303 = vmatprep.mubr.bf16.mxu1 %v7005_v22  ;;  %3457 = vmatmul.mubr.bf16.gmra.mrb[228].mxu0 %v6952_v20 }
 0x3ab   : > { %3464 = vmatprep.mubr.bf16.mxu0 %v6920_v1  ;;  %5243 = vmatpush3.bf16.msra.mxu1 %v5497_v46 }
 0x3ac   : > { %5244 = vmatprep.subr.bf16.mxu1 %v5498_v50 }
 0x3af   : > { %5245 = vmatpush3.bf16.msra.mxu1 %v5498_v50 }
 0x3b0   : > { %5246 = vmatprep.subr.bf16.mxu1 %v5499_v6 }
 0x3b1   : > { %3304 = vmatmul.mubr.bf16.gmra.mrb[200].mxu1 %v6896_v30 }
 0x3b2   : > { %3311 = vmatprep.mubr.bf16.mxu1 %v7037_v58  ;;  %3465 = vmatmul.mubr.bf16.gmra.mrb[232].mxu0 %v6978_v11 }
 0x3b3   : > { %3472 = vmatprep.mubr.bf16.mxu0 %v6945_v47  ;;  %5247 = vmatpush3.bf16.msra.mxu1 %v5499_v6 }
 0x3b4   : > { %5248 = vmatprep.subr.bf16.mxu1 %v5500_v56 }
 0x3b7   : > { %5249 = vmatpush3.bf16.msra.mxu1 %v5500_v56 }
 0x3b8   : > { %5250 = vmatprep.subr.bf16.mxu1 %v5501_v24 }
 0x3b9   : > { %3312 = vmatmul.mubr.bf16.gmra.mrb[204].mxu1 %v6920_v1 }
 0x3ba   : > { %3319 = vmatprep.mubr.bf16.mxu1 %v7061_v53  ;;  %3473 = vmatmul.mubr.bf16.gmra.mrb[236].mxu0 %v7015_v29 }
 0x3bb   : > { %3480 = vmatprep.mubr.bf16.mxu0 %v6969_v55  ;;  %5251 = vmatpush3.bf16.msra.mxu1 %v5501_v24 }
 0x3bc   : > { %5252 = vmatprep.subr.bf16.mxu1 %v5502_v7 }
 0x3bf   : > { %5253 = vmatpush3.bf16.msra.mxu1 %v5502_v7 }
 0x3c1   : > { %3320 = vmatmul.mubr.bf16.gmra.mrb[208].mxu1 %v6945_v47 }
 0x3c2   : > { %3327 = vmatprep.mubr.bf16.mxu1 %v7082_v49  ;;  %3481 = vmatmul.mubr.bf16.gmra.mrb[240].mxu0 %v7049_v34 }
 0x3c3   : > { %3488 = vmatprep.mubr.bf16.mxu0 %v7008_v41 }
 0x3c9   : > { %3328 = vmatmul.mubr.bf16.gmra.mrb[212].mxu1 %v6969_v55 }
 0x3ca   : > { %3335 = vmatprep.mubr.bf16.mxu1 %v7102_v21  ;;  %3489 = vmatmul.mubr.bf16.gmra.mrb[244].mxu0 %v7071_v44 }
 0x3cb   : > { %3496 = vmatprep.mubr.bf16.mxu0 %v7042_v57 }
 0x3d1   : > { %3336 = vmatmul.mubr.bf16.gmra.mrb[216].mxu1 %v7008_v41 }
 0x3d2   : > { %3343 = vmatprep.mubr.bf16.mxu1 %v7122_v60  ;;  %3497 = vmatmul.mubr.bf16.gmra.mrb[248].mxu0 %v7092_v59 }
 0x3d3   : > { %3504 = vmatprep.mubr.bf16.mxu0 %v7065_v38 }
 0x3d9   : > { %3344 = vmatmul.mubr.bf16.gmra.mrb[220].mxu1 %v7042_v57 }
 0x3da   : > { %3351 = vmatprep.mubr.bf16.mxu1 %v7142_v62  ;;  %3505 = vmatmul.mubr.bf16.gmra.mrb[252].mxu0 %v7112_v37 }
 0x3db   : > { %3512 = vmatprep.mubr.bf16.mxu0 %v7086_v12 }
 0x3e1   : > { %3352 = vmatmul.mubr.bf16.gmra.mrb[224].mxu1 %v7065_v38 }
 0x3e2   : > { %3359 = vmatprep.mubr.bf16.mxu1 %v7162_v40  ;;  %3513 = vmatmul.mubr.bf16.gmra.mrb[0].mxu0 %v7132_v39 }
 0x3e3   : > { %3520 = vmatprep.mubr.bf16.mxu0 %v7106_v52 }
 0x3e9   : > { %3360 = vmatmul.mubr.bf16.gmra.mrb[228].mxu1 %v7086_v12 }
 0x3ea   : > { %3367 = vmatprep.mubr.bf16.mxu1 %v7180_v0  ;;  %3521 = vmatmul.mubr.bf16.gmra.mrb[4].mxu0 %v7152_v23 }
 0x3eb   : > { %3528 = vmatprep.mubr.bf16.mxu0 %v7126_v28 }
 0x3f1   : > { %3368 = vmatmul.mubr.bf16.gmra.mrb[232].mxu1 %v7106_v52 }
 0x3f2   : > { %3375 = vmatprep.mubr.bf16.mxu1 %v7196_v27  ;;  %3529 = vmatmul.mubr.bf16.gmra.mrb[8].mxu0 %v7172_v54 }
 0x3f3   : > { %3536 = vmatprep.mubr.bf16.mxu0 %v7146_v5 }
 0x3f4   : > { %v4734_v30 = vpop.f32.mrb[128].mxu1 }
 0x3f5   : > { %v4735_v1 = vpop.f32.mrb[129].mxu1  ;;  %v4846_v47 = vpop.f32.mrb[160].mxu0 }
 0x3f6   : > { %v4736_v20 = vadd.f32 %v4735_v1, %v4734_v30  ;;  %v4737_v55 = vpop.f32.mrb[130].mxu1  ;;  %v4847_v11 = vpop.f32.mrb[161].mxu0 }
 0x3f7   : > { %v4848_v25 = vadd.f32 %v4847_v11, %v4846_v47  ;;  %v4738_v41 = vpop.f32.mrb[131].mxu1  ;;  %v4849_v29 = vpop.f32.mrb[162].mxu0 }
 0x3f8   : > { %v4739_v15 = vadd.f32 %v4738_v41, %v4737_v55  ;;  %v4850_v57 = vpop.f32.mrb[163].mxu0 }
 0x3f9   : > { %v7286_v34 = vadd.f32 %v4848_v25, %v4736_v20  ;;  %v4851_v38 = vadd.f32 %v4850_v57, %v4849_v29  ;;  %3376 = vmatmul.mubr.bf16.gmra.mrb[236].mxu1 %v7126_v28 }
 0x3fa   : > { %3383 = vmatprep.mubr.bf16.mxu1 %v7209_v19  ;;  %3537 = vmatmul.mubr.bf16.gmra.mrb[12].mxu0 %v7188_v42 }
 0x3fb   : > { %v7291_v44 = vadd.f32 %v4851_v38, %v4739_v15  ;;  %3544 = vmatprep.mubr.bf16.mxu0 %v7166_v8 }
 0x3fc   : > { %v4740_v12 = vpop.f32.mrb[132].mxu1 }
 0x3fd   : > { %v4741_v59 = vpop.f32.mrb[133].mxu1  ;;  %v4852_v52 = vpop.f32.mrb[164].mxu0 }
 0x3fe   : > { %v4742_v37 = vadd.f32 %v4741_v59, %v4740_v12  ;;  %v4743_v39 = vpop.f32.mrb[134].mxu1  ;;  %v4853_v23 = vpop.f32.mrb[165].mxu0 }
 0x3ff   : > { %v4854_v54 = vadd.f32 %v4853_v23, %v4852_v52  ;;  %v4744_v61 = vpop.f32.mrb[135].mxu1  ;;  %v4855_v4 = vpop.f32.mrb[166].mxu0 }
 0x400   : > { %v4745_v18 = vadd.f32 %v4744_v61, %v4743_v39  ;;  %v4856_v2 = vpop.f32.mrb[167].mxu0 }
 0x401   : > { %v7294_v28 = vadd.f32 %v4854_v54, %v4742_v37  ;;  %v4857_v10 = vadd.f32 %v4856_v2, %v4855_v4  ;;  %3384 = vmatmul.mubr.bf16.gmra.mrb[240].mxu1 %v7146_v5 }
 0x402   : > { %3391 = vmatprep.mubr.bf16.mxu1 %v7223_v9  ;;  %3545 = vmatmul.mubr.bf16.gmra.mrb[16].mxu0 %v7202_v36 }
 0x403   : > { %v7299_v42 = vadd.f32 %v4857_v10, %v4745_v18  ;;  %3552 = vmatprep.mubr.bf16.mxu0 %v7182_v48 }
 0x404   : > { %v4746_v31 = vpop.f32.mrb[136].mxu1 }
 0x405   : > { %v4747_v13 = vpop.f32.mrb[137].mxu1  ;;  %v4858_v17 = vpop.f32.mrb[168].mxu0 }
 0x406   : > { %v4748_v43 = vadd.f32 %v4747_v13, %v4746_v31  ;;  %v4749_v35 = vpop.f32.mrb[138].mxu1  ;;  %v4859_v33 = vpop.f32.mrb[169].mxu0 }
 0x407   : > { %v4860_v16 = vadd.f32 %v4859_v33, %v4858_v17  ;;  %v4750_v51 = vpop.f32.mrb[139].mxu1  ;;  %v4861_v46 = vpop.f32.mrb[170].mxu0 }
 0x408   : > { %v4751_v50 = vadd.f32 %v4750_v51, %v4749_v35  ;;  %v4862_v6 = vpop.f32.mrb[171].mxu0 }
 0x409   : > { %v7302_v5 = vadd.f32 %v4860_v16, %v4748_v43  ;;  %v4863_v56 = vadd.f32 %v4862_v6, %v4861_v46  ;;  %3392 = vmatmul.mubr.bf16.gmra.mrb[244].mxu1 %v7166_v8 }
 0x40a   : > { %3399 = vmatprep.mubr.bf16.mxu1 %v7236_v3  ;;  %3553 = vmatmul.mubr.bf16.gmra.mrb[20].mxu0 %v7215_v14 }
 0x40b   : > { %v7307_v36 = vadd.f32 %v4863_v56, %v4751_v50  ;;  %3560 = vmatprep.mubr.bf16.mxu0 %v6971_v63 }
 0x40c   : > { %v4752_v24 = vpop.f32.mrb[140].mxu1 }
 0x40d   : > { %v4753_v7 = vpop.f32.mrb[141].mxu1  ;;  %v4864_v30 = vpop.f32.mrb[172].mxu0 }
 0x40e   : > { %v4754_v1 = vadd.f32 %v4753_v7, %v4752_v24  ;;  %v4755_v47 = vpop.f32.mrb[142].mxu1  ;;  %v4865_v20 = vpop.f32.mrb[173].mxu0 }
 0x40f   : > { %v4866_v55 = vadd.f32 %v4865_v20, %v4864_v30  ;;  %v4756_v11 = vpop.f32.mrb[143].mxu1  ;;  %v4867_v25 = vpop.f32.mrb[174].mxu0 }
 0x410   : > { %v4757_v41 = vadd.f32 %v4756_v11, %v4755_v47  ;;  %v4868_v29 = vpop.f32.mrb[175].mxu0 }
 0x411   : > { %v7310_v8 = vadd.f32 %v4866_v55, %v4754_v1  ;;  %v4869_v15 = vadd.f32 %v4868_v29, %v4867_v25  ;;  %3400 = vmatmul.mubr.bf16.gmra.mrb[248].mxu1 %v7182_v48 }
 0x412   : > { %3407 = vmatprep.mubr.bf16.mxu1 %v7026_v26  ;;  %3561 = vmatmul.mubr.bf16.gmra.mrb[24].mxu0 %v7230_v32 }
 0x413   : > { %v7315_v57 = vadd.f32 %v4869_v15, %v4757_v41  ;;  %3568 = vmatprep.mubr.bf16.mxu0 %v7182_v48 }
 0x414   : > { %v4758_v38 = vpop.f32.mrb[144].mxu1 }
 0x415   : > { %v4759_v12 = vpop.f32.mrb[145].mxu1  ;;  %v4870_v59 = vpop.f32.mrb[176].mxu0 }
 0x416   : > { %v4760_v52 = vadd.f32 %v4759_v12, %v4758_v38  ;;  %v4761_v37 = vpop.f32.mrb[146].mxu1  ;;  %v4871_v39 = vpop.f32.mrb[177].mxu0 }
 0x417   : > { %v4872_v23 = vadd.f32 %v4871_v39, %v4870_v59  ;;  %v4762_v54 = vpop.f32.mrb[147].mxu1  ;;  %v4873_v61 = vpop.f32.mrb[178].mxu0 }
 0x418   : > { %v4763_v4 = vadd.f32 %v4762_v54, %v4761_v37  ;;  %v4874_v18 = vpop.f32.mrb[179].mxu0 }
 0x419   : > { %v7318_v2 = vadd.f32 %v4872_v23, %v4760_v52  ;;  %v4875_v10 = vadd.f32 %v4874_v18, %v4873_v61  ;;  %3408 = vmatmul.mubr.bf16.gmra.mrb[252].mxu1 %v6971_v63 }
 0x41a   : > { %3569 = vmatmul.mubr.bf16.gmra.mrb[28].mxu0 %v7215_v14  ;;  %5254 = vmatprep.mubr.bf16.mxu1 %v6913_v45 }
 0x41b   : > { %v7323_v48 = vadd.f32 %v4875_v10, %v4763_v4 }
 0x41c   : > { %v4764_v32 = vpop.f32.mrb[148].mxu1 }
 0x41d   : > { %v4765_v31 = vpop.f32.mrb[149].mxu1  ;;  %v4876_v13 = vpop.f32.mrb[180].mxu0 }
 0x41e   : > { %v4766_v17 = vadd.f32 %v4765_v31, %v4764_v32  ;;  %v4767_v43 = vpop.f32.mrb[150].mxu1  ;;  %v4877_v35 = vpop.f32.mrb[181].mxu0 }
 0x41f   : > { %v4878_v33 = vadd.f32 %v4877_v35, %v4876_v13  ;;  %v4768_v16 = vpop.f32.mrb[151].mxu1  ;;  %v4879_v51 = vpop.f32.mrb[182].mxu0 }
 0x420   : > { %v4769_v46 = vadd.f32 %v4768_v16, %v4767_v43  ;;  %v4880_v50 = vpop.f32.mrb[183].mxu0 }
 0x421   : > { %v7325_v6 = vadd.f32 %v4878_v33, %v4766_v17  ;;  %v4881_v63 = vadd.f32 %v4880_v50, %v4879_v51  ;;  %5255 = vmatmul.mubr.bf16.vlgmr.msra.gmra.mrb[0].mxu1 %v7005_v22 }
 0x422   : > { %5258 = vmatprep.mubr.bf16.mxu1 %v7037_v58 }
 0x423   : > { %v7329_v45 = vadd.f32 %v4881_v63, %v4769_v46 }
 0x424   : > { %v4770_v14 = vpop.f32.mrb[152].mxu1 }
 0x425   : > { %v4771_v56 = vpop.f32.mrb[153].mxu1  ;;  %v4882_v24 = vpop.f32.mrb[184].mxu0 }
 0x426   : > { %v4772_v7 = vadd.f32 %v4771_v56, %v4770_v14  ;;  %v4773_v30 = vpop.f32.mrb[154].mxu1  ;;  %v4883_v1 = vpop.f32.mrb[185].mxu0 }
 0x427   : > { %v4884_v47 = vadd.f32 %v4883_v1, %v4882_v24  ;;  %v4774_v20 = vpop.f32.mrb[155].mxu1  ;;  %v4885_v55 = vpop.f32.mrb[186].mxu0 }
 0x428   : > { %v4775_v11 = vadd.f32 %v4774_v20, %v4773_v30  ;;  %v4886_v25 = vpop.f32.mrb[187].mxu0 }
 0x429   : > { %v7331_v41 = vadd.f32 %v4884_v47, %v4772_v7  ;;  %v4887_v29 = vadd.f32 %v4886_v25, %v4885_v55  ;;  %5259 = vmatmul.mubr.bf16.gmra.mrb[4].mxu1 %v7061_v53 }
 0x42a   : > { %5262 = vmatprep.mubr.bf16.mxu1 %v7082_v49 }
 0x42b   : > { %v7335_v22 = vadd.f32 %v4887_v29, %v4775_v11 }
 0x42c   : > { %v4776_v58 = vpop.f32.mrb[156].mxu1 }
 0x42d   : > { %v4777_v15 = vpop.f32.mrb[157].mxu1  ;;  %v4888_v38 = vpop.f32.mrb[188].mxu0 }
 0x42e   : > { %v4778_v12 = vadd.f32 %v4777_v15, %v4776_v58  ;;  %v4779_v59 = vpop.f32.mrb[158].mxu1  ;;  %v4889_v52 = vpop.f32.mrb[189].mxu0 }
 0x42f   : > { %v4890_v37 = vadd.f32 %v4889_v52, %v4888_v38  ;;  %v4780_v39 = vpop.f32.mrb[159].mxu1  ;;  %v4891_v23 = vpop.f32.mrb[190].mxu0 }
 0x430   : > { %v4781_v54 = vadd.f32 %v4780_v39, %v4779_v59  ;;  %v4892_v61 = vpop.f32.mrb[191].mxu0 }
 0x431   : > { %v7337_v4 = vadd.f32 %v4890_v37, %v4778_v12  ;;  %v4893_v18 = vadd.f32 %v4892_v61, %v4891_v23  ;;  %5263 = vmatmul.mubr.bf16.gmra.mrb[8].mxu1 %v7102_v21 }
 0x432   : > { %5266 = vmatprep.mubr.bf16.mxu1 %v7122_v60 }
 0x433   : > { %v7341_v53 = vadd.f32 %v4893_v18, %v4781_v54 }
 0x434   : > { %v4782_v49 = vpop.f32.mrb[160].mxu1 }
 0x435   : > { %v4783_v10 = vpop.f32.mrb[161].mxu1  ;;  %v4894_v32 = vpop.f32.mrb[192].mxu0 }
 0x436   : > { %v4784_v31 = vadd.f32 %v4783_v10, %v4782_v49  ;;  %v4785_v13 = vpop.f32.mrb[162].mxu1  ;;  %v4895_v17 = vpop.f32.mrb[193].mxu0 }
 0x437   : > { %v4896_v43 = vadd.f32 %v4895_v17, %v4894_v32  ;;  %v4786_v35 = vpop.f32.mrb[163].mxu1  ;;  %v4897_v33 = vpop.f32.mrb[194].mxu0 }
 0x438   : > { %v4787_v16 = vadd.f32 %v4786_v35, %v4785_v13  ;;  %v4898_v51 = vpop.f32.mrb[195].mxu0 }
 0x439   : > { %v7343_v46 = vadd.f32 %v4896_v43, %v4784_v31  ;;  %v4899_v50 = vadd.f32 %v4898_v51, %v4897_v33  ;;  %5267 = vmatmul.mubr.bf16.gmra.mrb[12].mxu1 %v7142_v62 }
 0x43a   : > { %5270 = vmatprep.mubr.bf16.mxu1 %v7162_v40 }
 0x43b   : > { %v7347_v21 = vadd.f32 %v4899_v50, %v4787_v16 }
 0x43c   : > { %v4788_v60 = vpop.f32.mrb[164].mxu1 }
 0x43d   : > { %v4789_v63 = vpop.f32.mrb[165].mxu1  ;;  %v4900_v14 = vpop.f32.mrb[196].mxu0 }
 0x43e   : > { %v4790_v56 = vadd.f32 %v4789_v63, %v4788_v60  ;;  %v4791_v24 = vpop.f32.mrb[166].mxu1  ;;  %v4901_v7 = vpop.f32.mrb[197].mxu0 }
 0x43f   : > { %v4902_v30 = vadd.f32 %v4901_v7, %v4900_v14  ;;  %v4792_v1 = vpop.f32.mrb[167].mxu1  ;;  %v4903_v47 = vpop.f32.mrb[198].mxu0 }
 0x440   : > { %v4793_v20 = vadd.f32 %v4792_v1, %v4791_v24  ;;  %v4904_v55 = vpop.f32.mrb[199].mxu0 }
 0x441   : > { %v7349_v11 = vadd.f32 %v4902_v30, %v4790_v56  ;;  %v4905_v25 = vadd.f32 %v4904_v55, %v4903_v47  ;;  %5271 = vmatmul.mubr.bf16.gmra.mrb[16].mxu1 %v7180_v0 }
 0x442   : > { %5274 = vmatprep.mubr.bf16.mxu1 %v7196_v27 }
 0x443   : > { %v7353_v62 = vadd.f32 %v4905_v25, %v4793_v20 }
 0x444   : > { %v4794_v40 = vpop.f32.mrb[168].mxu1 }
 0x445   : > { %v4795_v29 = vpop.f32.mrb[169].mxu1  ;;  %v4906_v58 = vpop.f32.mrb[200].mxu0 }
 0x446   : > { %v4796_v15 = vadd.f32 %v4795_v29, %v4794_v40  ;;  %v4797_v38 = vpop.f32.mrb[170].mxu1  ;;  %v4907_v12 = vpop.f32.mrb[201].mxu0 }
 0x447   : > { %v4908_v59 = vadd.f32 %v4907_v12, %v4906_v58  ;;  %v4798_v52 = vpop.f32.mrb[171].mxu1  ;;  %v4909_v37 = vpop.f32.mrb[202].mxu0 }
 0x448   : > { %v4799_v39 = vadd.f32 %v4798_v52, %v4797_v38  ;;  %v4910_v23 = vpop.f32.mrb[203].mxu0 }
 0x449   : > { %v7355_v54 = vadd.f32 %v4908_v59, %v4796_v15  ;;  %v4911_v61 = vadd.f32 %v4910_v23, %v4909_v37  ;;  %5275 = vmatmul.mubr.bf16.gmra.mrb[20].mxu1 %v7209_v19 }
 0x44a   : > { %5278 = vmatprep.mubr.bf16.mxu1 %v7223_v9 }
 0x44b   : > { %v7359_v0 = vadd.f32 %v4911_v61, %v4799_v39 }
 0x44c   : > { %v4800_v27 = vpop.f32.mrb[172].mxu1 }
 0x44d   : > { %v4801_v18 = vpop.f32.mrb[173].mxu1  ;;  %v4912_v49 = vpop.f32.mrb[204].mxu0 }
 0x44e   : > { %v4802_v10 = vadd.f32 %v4801_v18, %v4800_v27  ;;  %v4803_v32 = vpop.f32.mrb[174].mxu1  ;;  %v4913_v31 = vpop.f32.mrb[205].mxu0 }
 0x44f   : > { %v4914_v13 = vadd.f32 %v4913_v31, %v4912_v49  ;;  %v4804_v17 = vpop.f32.mrb[175].mxu1  ;;  %v4915_v43 = vpop.f32.mrb[206].mxu0 }
 0x450   : > { %v4805_v35 = vadd.f32 %v4804_v17, %v4803_v32  ;;  %v4916_v33 = vpop.f32.mrb[207].mxu0 }
 0x451   : > { %v7361_v16 = vadd.f32 %v4914_v13, %v4802_v10  ;;  %v4917_v51 = vadd.f32 %v4916_v33, %v4915_v43  ;;  %5279 = vmatmul.mubr.bf16.gmra.mrb[24].mxu1 %v7236_v3 }
 0x452   : > { %5282 = vmatprep.mubr.bf16.mxu1 %v7026_v26 }
 0x453   : > { %v7365_v19 = vadd.f32 %v4917_v51, %v4805_v35 }
 0x454   : > { %v4806_v9 = vpop.f32.mrb[176].mxu1 }
 0x455   : > { %v4807_v50 = vpop.f32.mrb[177].mxu1  ;;  %v4918_v60 = vpop.f32.mrb[208].mxu0 }
 0x456   : > { %v4808_v63 = vadd.f32 %v4807_v50, %v4806_v9  ;;  %v4809_v14 = vpop.f32.mrb[178].mxu1  ;;  %v4919_v56 = vpop.f32.mrb[209].mxu0 }
 0x457   : > { %v4920_v24 = vadd.f32 %v4919_v56, %v4918_v60  ;;  %v4810_v7 = vpop.f32.mrb[179].mxu1  ;;  %v4921_v30 = vpop.f32.mrb[210].mxu0 }
 0x458   : > { %v4811_v1 = vadd.f32 %v4810_v7, %v4809_v14  ;;  %v4922_v47 = vpop.f32.mrb[211].mxu0 }
 0x459   : > { %v7367_v20 = vadd.f32 %v4920_v24, %v4808_v63  ;;  %v4923_v55 = vadd.f32 %v4922_v47, %v4921_v30  ;;  %5283 = vmatmul.mubr.bf16.gmra.mrb[28].mxu1 %v7236_v3 }
 0x45b   : > { %v7370_v25 = vadd.f32 %v4923_v55, %v4811_v1 }
 0x45c   : > { %v4812_v26 = vpop.f32.mrb[180].mxu1 }
 0x45d   : > { %v4813_v40 = vpop.f32.mrb[181].mxu1  ;;  %v4924_v29 = vpop.f32.mrb[212].mxu0 }
 0x45e   : > { %v4814_v58 = vadd.f32 %v4813_v40, %v4812_v26  ;;  %v4815_v15 = vpop.f32.mrb[182].mxu1  ;;  %v4925_v38 = vpop.f32.mrb[213].mxu0 }
 0x45f   : > { %v4926_v12 = vadd.f32 %v4925_v38, %v4924_v29  ;;  %v4816_v59 = vpop.f32.mrb[183].mxu1  ;;  %v4927_v52 = vpop.f32.mrb[214].mxu0 }
 0x460   : > { %v4817_v37 = vadd.f32 %v4816_v59, %v4815_v15  ;;  %v4928_v39 = vpop.f32.mrb[215].mxu0 }
 0x461   : > { %v7372_v23 = vadd.f32 %v4926_v12, %v4814_v58  ;;  %v4929_v61 = vadd.f32 %v4928_v39, %v4927_v52 }
 0x463   : > { %v7374_v27 = vadd.f32 %v4929_v61, %v4817_v37 }
 0x464   : > { %v4818_v18 = vpop.f32.mrb[184].mxu1 }
 0x465   : > { %v4819_v3 = vpop.f32.mrb[185].mxu1  ;;  %v4930_v49 = vpop.f32.mrb[216].mxu0 }
 0x466   : > { %v4820_v10 = vadd.f32 %v4819_v3, %v4818_v18  ;;  %v4821_v32 = vpop.f32.mrb[186].mxu1  ;;  %v4931_v31 = vpop.f32.mrb[217].mxu0 }
 0x467   : > { %v4932_v13 = vadd.f32 %v4931_v31, %v4930_v49  ;;  %v4822_v17 = vpop.f32.mrb[187].mxu1  ;;  %v4933_v43 = vpop.f32.mrb[218].mxu0 }
 0x468   : > { %v4823_v35 = vadd.f32 %v4822_v17, %v4821_v32  ;;  %v4934_v33 = vpop.f32.mrb[219].mxu0 }
 0x469   : > { %v7376_v51 = vadd.f32 %v4932_v13, %v4820_v10  ;;  %v4935_v9 = vadd.f32 %v4934_v33, %v4933_v43 }
 0x46b   : > { %v7378_v50 = vadd.f32 %v4935_v9, %v4823_v35 }
 0x46c   : > { %v4824_v60 = vpop.f32.mrb[188].mxu1 }
 0x46d   : > { %v4825_v63 = vpop.f32.mrb[189].mxu1  ;;  %v4936_v14 = vpop.f32.mrb[220].mxu0 }
 0x46e   : > { %v4826_v56 = vadd.f32 %v4825_v63, %v4824_v60  ;;  %v4827_v24 = vpop.f32.mrb[190].mxu1  ;;  %v4937_v7 = vpop.f32.mrb[221].mxu0 }
 0x46f   : > { %v4938_v30 = vadd.f32 %v4937_v7, %v4936_v14  ;;  %v4828_v1 = vpop.f32.mrb[191].mxu1  ;;  %v4939_v47 = vpop.f32.mrb[222].mxu0 }
 0x470   : > { %v4829_v55 = vadd.f32 %v4828_v1, %v4827_v24  ;;  %v4940_v26 = vpop.f32.mrb[223].mxu0 }
 0x471   : > { %v7380_v40 = vadd.f32 %v4938_v30, %v4826_v56  ;;  %v4941_v29 = vadd.f32 %v4940_v26, %v4939_v47 }
 0x473   : > { %v7382_v58 = vadd.f32 %v4941_v29, %v4829_v55 }
 0x474   : > { %v4958_v15 = vpop.f32.mrb[192].mxu1 }
 0x475   : > { %v4959_v38 = vpop.f32.mrb[193].mxu1  ;;  %v5070_v12 = vpop.f32.mrb[224].mxu0 }
 0x476   : > { %v4960_v59 = vadd.f32 %v4959_v38, %v4958_v15  ;;  %v4961_v52 = vpop.f32.mrb[194].mxu1  ;;  %v5071_v37 = vpop.f32.mrb[225].mxu0 }
 0x477   : > { %v5072_v39 = vadd.f32 %v5071_v37, %v5070_v12  ;;  %v4962_v61 = vpop.f32.mrb[195].mxu1  ;;  %v5073_v18 = vpop.f32.mrb[226].mxu0 }
 0x478   : > { %v3290_v3 = vadd.f32 %v4960_v59, %v7286_v34  ;;  %v4963_v49 = vadd.f32 %v4962_v61, %v4961_v52  ;;  %v5074_v10 = vpop.f32.mrb[227].mxu0 }
 0x479   : > { %v5075_v32 = vadd.f32 %v5074_v10, %v5073_v18 }
 0x47a   : > { %v3293_v31 = vadd.f32 %v4963_v49, %v7291_v44  ;;  %v7386_v13 = vadd.f32 %v5072_v39, %v3290_v3 }
 0x47c   : > { %v4964_v17 = vpop.f32.mrb[196].mxu1  ;;  %v7388_v43 = vadd.f32 %v5075_v32, %v3293_v31 }
 0x47d   : > { %v4965_v35 = vpop.f32.mrb[197].mxu1  ;;  %v5076_v33 = vpop.f32.mrb[228].mxu0 }
 0x47e   : > { %v4966_v9 = vadd.f32 %v4965_v35, %v4964_v17  ;;  %v4967_v60 = vpop.f32.mrb[198].mxu1  ;;  %v5077_v63 = vpop.f32.mrb[229].mxu0 }
 0x47f   : > { %v5078_v14 = vadd.f32 %v5077_v63, %v5076_v33  ;;  %v4968_v56 = vpop.f32.mrb[199].mxu1  ;;  %v5079_v24 = vpop.f32.mrb[230].mxu0 }
 0x480   : > { %v3298_v34 = vadd.f32 %v4966_v9, %v7294_v28  ;;  %v4969_v7 = vadd.f32 %v4968_v56, %v4967_v60  ;;  %v5080_v30 = vpop.f32.mrb[231].mxu0 }
 0x481   : > { %v5081_v1 = vadd.f32 %v5080_v30, %v5079_v24 }
 0x482   : > { %v3301_v44 = vadd.f32 %v4969_v7, %v7299_v42  ;;  %v7392_v47 = vadd.f32 %v5078_v14, %v3298_v34 }
 0x484   : > { %v4970_v55 = vpop.f32.mrb[200].mxu1  ;;  %v7394_v26 = vadd.f32 %v5081_v1, %v3301_v44 }
 0x485   : > { %v4971_v29 = vpop.f32.mrb[201].mxu1  ;;  %v5082_v15 = vpop.f32.mrb[232].mxu0 }
 0x486   : > { %v4972_v38 = vadd.f32 %v4971_v29, %v4970_v55  ;;  %v4973_v12 = vpop.f32.mrb[202].mxu1  ;;  %v5083_v59 = vpop.f32.mrb[233].mxu0 }
 0x487   : > { %v5084_v52 = vadd.f32 %v5083_v59, %v5082_v15  ;;  %v4974_v37 = vpop.f32.mrb[203].mxu1  ;;  %v5085_v39 = vpop.f32.mrb[234].mxu0 }
 0x488   : > { %v3306_v28 = vadd.f32 %v4972_v38, %v7302_v5  ;;  %v4975_v61 = vadd.f32 %v4974_v37, %v4973_v12  ;;  %v5086_v18 = vpop.f32.mrb[235].mxu0 }
 0x489   : > { %v5087_v3 = vadd.f32 %v5086_v18, %v5085_v39 }
 0x48a   : > { %v3309_v42 = vadd.f32 %v4975_v61, %v7307_v36  ;;  %v7398_v49 = vadd.f32 %v5084_v52, %v3306_v28 }
 0x48c   : > { %v4976_v10 = vpop.f32.mrb[204].mxu1  ;;  %v7400_v32 = vadd.f32 %v5087_v3, %v3309_v42 }
 0x48d   : > { %v4977_v31 = vpop.f32.mrb[205].mxu1  ;;  %v5088_v17 = vpop.f32.mrb[236].mxu0 }
 0x48e   : > { %v4978_v35 = vadd.f32 %v4977_v31, %v4976_v10  ;;  %v4979_v33 = vpop.f32.mrb[206].mxu1  ;;  %v5089_v9 = vpop.f32.mrb[237].mxu0 }
 0x48f   : > { %v5090_v60 = vadd.f32 %v5089_v9, %v5088_v17  ;;  %v4980_v63 = vpop.f32.mrb[207].mxu1  ;;  %v5091_v14 = vpop.f32.mrb[238].mxu0 }
 0x490   : > { %v3314_v5 = vadd.f32 %v4978_v35, %v7310_v8  ;;  %v4981_v56 = vadd.f32 %v4980_v63, %v4979_v33  ;;  %v5092_v24 = vpop.f32.mrb[239].mxu0 }
 0x491   : > { %v5093_v34 = vadd.f32 %v5092_v24, %v5091_v14 }
 0x492   : > { %v3317_v36 = vadd.f32 %v4981_v56, %v7315_v57  ;;  %v7404_v7 = vadd.f32 %v5090_v60, %v3314_v5 }
 0x494   : > { %v4982_v30 = vpop.f32.mrb[208].mxu1  ;;  %v7406_v1 = vadd.f32 %v5093_v34, %v3317_v36 }
 0x495   : > { %v4983_v44 = vpop.f32.mrb[209].mxu1  ;;  %v5094_v55 = vpop.f32.mrb[240].mxu0 }
 0x496   : > { %v4984_v29 = vadd.f32 %v4983_v44, %v4982_v30  ;;  %v4985_v15 = vpop.f32.mrb[210].mxu1  ;;  %v5095_v38 = vpop.f32.mrb[241].mxu0 }
 0x497   : > { %v5096_v12 = vadd.f32 %v5095_v38, %v5094_v55  ;;  %v4986_v59 = vpop.f32.mrb[211].mxu1  ;;  %v5097_v52 = vpop.f32.mrb[242].mxu0 }
 0x498   : > { %v3322_v8 = vadd.f32 %v4984_v29, %v7318_v2  ;;  %v4987_v37 = vadd.f32 %v4986_v59, %v4985_v15  ;;  %v5098_v39 = vpop.f32.mrb[243].mxu0 }
 0x499   : > { %v5099_v28 = vadd.f32 %v5098_v39, %v5097_v52 }
 0x49a   : > { %v3325_v57 = vadd.f32 %v4987_v37, %v7323_v48  ;;  %v7410_v61 = vadd.f32 %v5096_v12, %v3322_v8 }
 0x49c   : > { %v4988_v18 = vpop.f32.mrb[212].mxu1  ;;  %v7412_v3 = vadd.f32 %v5099_v28, %v3325_v57 }
 0x49d   : > { %v4989_v42 = vpop.f32.mrb[213].mxu1  ;;  %v5100_v10 = vpop.f32.mrb[244].mxu0 }
 0x49e   : > { %v4990_v31 = vadd.f32 %v4989_v42, %v4988_v18  ;;  %v4991_v17 = vpop.f32.mrb[214].mxu1  ;;  %v5101_v35 = vpop.f32.mrb[245].mxu0 }
 0x49f   : > { %v5102_v33 = vadd.f32 %v5101_v35, %v5100_v10  ;;  %v4992_v9 = vpop.f32.mrb[215].mxu1  ;;  %v5103_v60 = vpop.f32.mrb[246].mxu0 }
 0x4a0   : > { %v3330_v2 = vadd.f32 %v4990_v31, %v7325_v6  ;;  %v4993_v63 = vadd.f32 %v4992_v9, %v4991_v17  ;;  %v5104_v14 = vpop.f32.mrb[247].mxu0 }
 0x4a1   : > { %v5105_v5 = vadd.f32 %v5104_v14, %v5103_v60 }
 0x4a2   : > { %v3333_v48 = vadd.f32 %v4993_v63, %v7329_v45  ;;  %v7416_v56 = vadd.f32 %v5102_v33, %v3330_v2 }
 0x4a4   : > { %v4994_v24 = vpop.f32.mrb[216].mxu1  ;;  %v7418_v34 = vadd.f32 %v5105_v5, %v3333_v48 }
 0x4a5   : > { %v4995_v36 = vpop.f32.mrb[217].mxu1  ;;  %v5106_v30 = vpop.f32.mrb[248].mxu0 }
 0x4a6   : > { %v4996_v44 = vadd.f32 %v4995_v36, %v4994_v24  ;;  %v4997_v55 = vpop.f32.mrb[218].mxu1  ;;  %v5107_v29 = vpop.f32.mrb[249].mxu0 }
 0x4a7   : > { %v5108_v15 = vadd.f32 %v5107_v29, %v5106_v30  ;;  %v4998_v38 = vpop.f32.mrb[219].mxu1  ;;  %v5109_v12 = vpop.f32.mrb[250].mxu0 }
 0x4a8   : > { %v3338_v6 = vadd.f32 %v4996_v44, %v7331_v41  ;;  %v4999_v59 = vadd.f32 %v4998_v38, %v4997_v55  ;;  %v5110_v52 = vpop.f32.mrb[251].mxu0 }
 0x4a9   : > { %v5111_v8 = vadd.f32 %v5110_v52, %v5109_v12 }
 0x4aa   : > { %v3341_v45 = vadd.f32 %v4999_v59, %v7335_v22  ;;  %v7422_v37 = vadd.f32 %v5108_v15, %v3338_v6 }
 0x4ac   : > { %v5000_v39 = vpop.f32.mrb[220].mxu1  ;;  %v7424_v28 = vadd.f32 %v5111_v8, %v3341_v45 }
 0x4ad   : > { %v5001_v57 = vpop.f32.mrb[221].mxu1  ;;  %v5112_v18 = vpop.f32.mrb[252].mxu0 }
 0x4ae   : > { %v5002_v42 = vadd.f32 %v5001_v57, %v5000_v39  ;;  %v5003_v10 = vpop.f32.mrb[222].mxu1  ;;  %v5113_v31 = vpop.f32.mrb[253].mxu0 }
 0x4af   : > { %v5114_v17 = vadd.f32 %v5113_v31, %v5112_v18  ;;  %v5004_v35 = vpop.f32.mrb[223].mxu1  ;;  %v5115_v33 = vpop.f32.mrb[254].mxu0 }
 0x4b0   : > { %v3346_v41 = vadd.f32 %v5002_v42, %v7337_v4  ;;  %v5005_v9 = vadd.f32 %v5004_v35, %v5003_v10  ;;  %v5116_v60 = vpop.f32.mrb[255].mxu0 }
 0x4b1   : > { %v5117_v2 = vadd.f32 %v5116_v60, %v5115_v33 }
 0x4b2   : > { %v3349_v22 = vadd.f32 %v5005_v9, %v7341_v53  ;;  %v7428_v63 = vadd.f32 %v5114_v17, %v3346_v41 }
 0x4b4   : > { %v5006_v14 = vpop.f32.mrb[224].mxu1  ;;  %v7430_v5 = vadd.f32 %v5117_v2, %v3349_v22 }
 0x4b5   : > { %v5007_v48 = vpop.f32.mrb[225].mxu1  ;;  %v5118_v24 = vpop.f32.mrb[0].mxu0 }
 0x4b6   : > { %v5008_v36 = vadd.f32 %v5007_v48, %v5006_v14  ;;  %v5009_v30 = vpop.f32.mrb[226].mxu1  ;;  %v5119_v44 = vpop.f32.mrb[1].mxu0 }
 0x4b7   : > { %v5120_v55 = vadd.f32 %v5119_v44, %v5118_v24  ;;  %v5010_v29 = vpop.f32.mrb[227].mxu1  ;;  %v5121_v15 = vpop.f32.mrb[2].mxu0 }
 0x4b8   : > { %v3354_v4 = vadd.f32 %v5008_v36, %v7343_v46  ;;  %v5011_v38 = vadd.f32 %v5010_v29, %v5009_v30  ;;  %v5122_v12 = vpop.f32.mrb[3].mxu0 }
 0x4b9   : > { %v5123_v6 = vadd.f32 %v5122_v12, %v5121_v15 }
 0x4ba   : > { %v3357_v53 = vadd.f32 %v5011_v38, %v7347_v21  ;;  %v7434_v59 = vadd.f32 %v5120_v55, %v3354_v4 }
 0x4bc   : > { %v5012_v52 = vpop.f32.mrb[228].mxu1  ;;  %v7436_v8 = vadd.f32 %v5123_v6, %v3357_v53 }
 0x4bd   : > { %v5013_v45 = vpop.f32.mrb[229].mxu1  ;;  %v5124_v39 = vpop.f32.mrb[4].mxu0 }
 0x4be   : > { %v5014_v57 = vadd.f32 %v5013_v45, %v5012_v52  ;;  %v5015_v18 = vpop.f32.mrb[230].mxu1  ;;  %v5125_v42 = vpop.f32.mrb[5].mxu0 }
 0x4bf   : > { %v5126_v10 = vadd.f32 %v5125_v42, %v5124_v39  ;;  %v5016_v31 = vpop.f32.mrb[231].mxu1  ;;  %v5127_v17 = vpop.f32.mrb[6].mxu0 }
 0x4c0   : > { %v3362_v46 = vadd.f32 %v5014_v57, %v7349_v11  ;;  %v5017_v35 = vadd.f32 %v5016_v31, %v5015_v18  ;;  %v5128_v33 = vpop.f32.mrb[7].mxu0 }
 0x4c1   : > { %v5129_v41 = vadd.f32 %v5128_v33, %v5127_v17 }
 0x4c2   : > { %v3365_v21 = vadd.f32 %v5017_v35, %v7353_v62  ;;  %v7440_v9 = vadd.f32 %v5126_v10, %v3362_v46 }
 0x4c4   : > { %v5018_v60 = vpop.f32.mrb[232].mxu1  ;;  %v7442_v2 = vadd.f32 %v5129_v41, %v3365_v21 }
 0x4c5   : > { %v5019_v22 = vpop.f32.mrb[233].mxu1  ;;  %v5130_v14 = vpop.f32.mrb[8].mxu0 }
 0x4c6   : > { %v5020_v48 = vadd.f32 %v5019_v22, %v5018_v60  ;;  %v5021_v24 = vpop.f32.mrb[234].mxu1  ;;  %v5131_v36 = vpop.f32.mrb[9].mxu0 }
 0x4c7   : > { %v5132_v30 = vadd.f32 %v5131_v36, %v5130_v14  ;;  %v5022_v44 = vpop.f32.mrb[235].mxu1  ;;  %v5133_v55 = vpop.f32.mrb[10].mxu0 }
 0x4c8   : > { %v3370_v11 = vadd.f32 %v5020_v48, %v7355_v54  ;;  %v5023_v29 = vadd.f32 %v5022_v44, %v5021_v24  ;;  %v5134_v15 = vpop.f32.mrb[11].mxu0 }
 0x4c9   : > { %v5135_v4 = vadd.f32 %v5134_v15, %v5133_v55 }
 0x4ca   : > { %v3373_v62 = vadd.f32 %v5023_v29, %v7359_v0  ;;  %v7446_v38 = vadd.f32 %v5132_v30, %v3370_v11 }
 0x4cc   : > { %v5024_v12 = vpop.f32.mrb[236].mxu1  ;;  %v7448_v6 = vadd.f32 %v5135_v4, %v3373_v62 }
 0x4cd   : > { %v5025_v53 = vpop.f32.mrb[237].mxu1  ;;  %v5136_v52 = vpop.f32.mrb[12].mxu0 }
 0x4ce   : > { %v5026_v45 = vadd.f32 %v5025_v53, %v5024_v12  ;;  %v5027_v39 = vpop.f32.mrb[238].mxu1  ;;  %v5137_v57 = vpop.f32.mrb[13].mxu0 }
 0x4cf   : > { %v5138_v18 = vadd.f32 %v5137_v57, %v5136_v52  ;;  %v5028_v42 = vpop.f32.mrb[239].mxu1  ;;  %v5139_v10 = vpop.f32.mrb[14].mxu0 }
 0x4d0   : > { %v3378_v54 = vadd.f32 %v5026_v45, %v7361_v16  ;;  %v5029_v31 = vadd.f32 %v5028_v42, %v5027_v39  ;;  %v5140_v17 = vpop.f32.mrb[15].mxu0 }
 0x4d1   : > { %v5141_v46 = vadd.f32 %v5140_v17, %v5139_v10 }
 0x4d2   : > { %v3381_v0 = vadd.f32 %v5029_v31, %v7365_v19  ;;  %v7452_v35 = vadd.f32 %v5138_v18, %v3378_v54 }
 0x4d4   : > { %v5030_v33 = vpop.f32.mrb[240].mxu1  ;;  %v7454_v41 = vadd.f32 %v5141_v46, %v3381_v0 }
 0x4d5   : > { %v5031_v21 = vpop.f32.mrb[241].mxu1  ;;  %v5142_v60 = vpop.f32.mrb[16].mxu0 }
 0x4d6   : > { %v5032_v22 = vadd.f32 %v5031_v21, %v5030_v33  ;;  %v5033_v14 = vpop.f32.mrb[242].mxu1  ;;  %v5143_v48 = vpop.f32.mrb[17].mxu0 }
 0x4d7   : > { %v5144_v24 = vadd.f32 %v5143_v48, %v5142_v60  ;;  %v5034_v36 = vpop.f32.mrb[243].mxu1  ;;  %v5145_v30 = vpop.f32.mrb[18].mxu0 }
 0x4d8   : > { %v3386_v16 = vadd.f32 %v5032_v22, %v7367_v20  ;;  %v5035_v44 = vadd.f32 %v5034_v36, %v5033_v14  ;;  %v5146_v55 = vpop.f32.mrb[19].mxu0 }
 0x4d9   : > { %v5147_v11 = vadd.f32 %v5146_v55, %v5145_v30 }
 0x4da   : > { %v3389_v19 = vadd.f32 %v5035_v44, %v7370_v25  ;;  %v7458_v29 = vadd.f32 %v5144_v24, %v3386_v16 }
 0x4dc   : > { %v5036_v15 = vpop.f32.mrb[244].mxu1  ;;  %v7460_v4 = vadd.f32 %v5147_v11, %v3389_v19 }
 0x4dd   : > { %v5037_v62 = vpop.f32.mrb[245].mxu1  ;;  %v5148_v12 = vpop.f32.mrb[20].mxu0 }
 0x4de   : > { %v5038_v53 = vadd.f32 %v5037_v62, %v5036_v15  ;;  %v5039_v52 = vpop.f32.mrb[246].mxu1  ;;  %v5149_v45 = vpop.f32.mrb[21].mxu0 }
 0x4df   : > { %v5150_v39 = vadd.f32 %v5149_v45, %v5148_v12  ;;  %v5040_v57 = vpop.f32.mrb[247].mxu1  ;;  %v5151_v18 = vpop.f32.mrb[22].mxu0 }
 0x4e0   : > { %v3394_v20 = vadd.f32 %v5038_v53, %v7372_v23  ;;  %v5041_v42 = vadd.f32 %v5040_v57, %v5039_v52  ;;  %v5152_v10 = vpop.f32.mrb[23].mxu0 }
 0x4e1   : > { %v5153_v54 = vadd.f32 %v5152_v10, %v5151_v18 }
 0x4e2   : > { %v3397_v25 = vadd.f32 %v5041_v42, %v7374_v27  ;;  %v7464_v31 = vadd.f32 %v5150_v39, %v3394_v20 }
 0x4e4   : > { %v5042_v17 = vpop.f32.mrb[248].mxu1  ;;  %v7466_v46 = vadd.f32 %v5153_v54, %v3397_v25 }
 0x4e5   : > { %v5043_v0 = vpop.f32.mrb[249].mxu1  ;;  %v5154_v33 = vpop.f32.mrb[24].mxu0 }
 0x4e6   : > { %v5044_v21 = vadd.f32 %v5043_v0, %v5042_v17  ;;  %v5045_v60 = vpop.f32.mrb[250].mxu1  ;;  %v5155_v22 = vpop.f32.mrb[25].mxu0 }
 0x4e7   : > { %v5156_v14 = vadd.f32 %v5155_v22, %v5154_v33  ;;  %v5046_v48 = vpop.f32.mrb[251].mxu1  ;;  %v5157_v24 = vpop.f32.mrb[26].mxu0 }
 0x4e8   : > { %v3402_v23 = vadd.f32 %v5044_v21, %v7376_v51  ;;  %v5047_v36 = vadd.f32 %v5046_v48, %v5045_v60  ;;  %v5158_v30 = vpop.f32.mrb[27].mxu0 }
 0x4e9   : > { %v5159_v16 = vadd.f32 %v5158_v30, %v5157_v24 }
 0x4ea   : > { %v3405_v27 = vadd.f32 %v5047_v36, %v7378_v50  ;;  %v7470_v44 = vadd.f32 %v5156_v14, %v3402_v23 }
 0x4ec   : > { %v5048_v55 = vpop.f32.mrb[252].mxu1  ;;  %v7472_v11 = vadd.f32 %v5159_v16, %v3405_v27 }
 0x4ed   : > { %v5049_v19 = vpop.f32.mrb[253].mxu1  ;;  %v5160_v15 = vpop.f32.mrb[28].mxu0 }
 0x4ee   : > { %v5050_v62 = vadd.f32 %v5049_v19, %v5048_v55  ;;  %v5051_v12 = vpop.f32.mrb[254].mxu1  ;;  %v5161_v53 = vpop.f32.mrb[29].mxu0 }
 0x4ef   : > { %v5162_v52 = vadd.f32 %v5161_v53, %v5160_v15  ;;  %v5052_v45 = vpop.f32.mrb[255].mxu1  ;;  %v5163_v39 = vpop.f32.mrb[30].mxu0 }
 0x4f0   : > { %v3410_v51 = vadd.f32 %v5050_v62, %v7380_v40  ;;  %v5053_v57 = vadd.f32 %v5052_v45, %v5051_v12  ;;  %v5164_v18 = vpop.f32.mrb[31].mxu0 }
 0x4f1   : > { %v5165_v20 = vadd.f32 %v5164_v18, %v5163_v39 }
 0x4f2   : > { %v3413_v50 = vadd.f32 %v5053_v57, %v7382_v58  ;;  %v7476_v42 = vadd.f32 %v5162_v52, %v3410_v51 }
 0x4f4   : > { %v5256_v10 = vpop.f32.mrb[0].mxu1  ;;  %v7478_v54 = vadd.f32 %v5165_v20, %v3413_v50 }
 0x4f5   : > { %v7481_v25 = vadd.f32 %v5256_v10, %v7392_v47  ;;  %v3611_v17 = vpop.f32.mrb[1].mxu1 }
 0x4f6   : > { %v7484_v0 = vadd.f32 %v3611_v17, %v7386_v13  ;;  %v5257_v33 = vpop.f32.mrb[2].mxu1 }
 0x4f7   : > { %v7487_v40 = vadd.f32 %v5257_v33, %v7394_v26  ;;  %v3614_v21 = vpop.f32.mrb[3].mxu1 }
 0x4f8   : > { %v7490_v60 = vadd.f32 %v3614_v21, %v7388_v43 }
 0x4fa   : > { %v3738_v58 = vadd.f32 %v7490_v60, %v7484_v0 }
 0x4fc   : > { %v3739_v22 = vadd.f32 %v3738_v58, %v7481_v25  ;;  %v5260_v14 = vpop.f32.mrb[4].mxu1 }
 0x4fd   : > { %v7496_v47 = vadd.f32 %v5260_v14, %v7404_v7  ;;  %v3627_v48 = vpop.f32.mrb[5].mxu1 }
 0x4fe   : > { %v7499_v13 = vadd.f32 %v3627_v48, %v7398_v49  ;;  %v3740_v26 = vadd.f32 %v3739_v22, %v7487_v40  ;;  %v5261_v24 = vpop.f32.mrb[6].mxu1 }
 0x4ff   : > { %v7503_v23 = vadd.f32 %v5261_v24, %v7406_v1  ;;  %v3630_v43 = vpop.f32.mrb[7].mxu1 }
 0x500   : > { %v3741_v36 = vadd.f32 %v3740_v26, %v7499_v13  ;;  %v7507_v30 = vadd.f32 %v3630_v43, %v7400_v32 }
 0x502   : > { %v3742_v16 = vadd.f32 %v3741_v36, %v7507_v30 }
 0x504   : > { %v3743_v7 = vadd.f32 %v3742_v16, %v7496_v47  ;;  %v5264_v27 = vpop.f32.mrb[8].mxu1 }
 0x505   : > { %v7512_v49 = vadd.f32 %v5264_v27, %v7416_v56  ;;  %v3643_v55 = vpop.f32.mrb[9].mxu1 }
 0x506   : > { %v7515_v19 = vadd.f32 %v3643_v55, %v7410_v61  ;;  %v3744_v1 = vadd.f32 %v3743_v7, %v7503_v23  ;;  %v5265_v15 = vpop.f32.mrb[10].mxu1 }
 0x507   : > { %v7519_v62 = vadd.f32 %v5265_v15, %v7418_v34  ;;  %v3646_v32 = vpop.f32.mrb[11].mxu1 }
 0x508   : > { %v3745_v12 = vadd.f32 %v3744_v1, %v7515_v19  ;;  %v7523_v53 = vadd.f32 %v3646_v32, %v7412_v3 }
 0x50a   : > { %v3746_v52 = vadd.f32 %v3745_v12, %v7523_v53 }
 0x50c   : > { %v3747_v56 = vadd.f32 %v3746_v52, %v7512_v49  ;;  %v5268_v45 = vpop.f32.mrb[12].mxu1 }
 0x50d   : > { %v7528_v61 = vadd.f32 %v5268_v45, %v7428_v63  ;;  %v3659_v39 = vpop.f32.mrb[13].mxu1 }
 0x50e   : > { %v7531_v51 = vadd.f32 %v3659_v39, %v7422_v37  ;;  %v3748_v34 = vadd.f32 %v3747_v56, %v7519_v62  ;;  %v5269_v57 = vpop.f32.mrb[14].mxu1 }
 0x50f   : > { %v7535_v18 = vadd.f32 %v5269_v57, %v7430_v5  ;;  %v3662_v3 = vpop.f32.mrb[15].mxu1 }
 0x510   : > { %v3749_v20 = vadd.f32 %v3748_v34, %v7531_v51  ;;  %v7539_v50 = vadd.f32 %v3662_v3, %v7424_v28 }
 0x512   : > { %v3750_v10 = vadd.f32 %v3749_v20, %v7539_v50 }
 0x514   : > { %v3751_v63 = vadd.f32 %v3750_v10, %v7528_v61  ;;  %v5272_v17 = vpop.f32.mrb[16].mxu1 }
 0x515   : > { %v7544_v37 = vadd.f32 %v5272_v17, %v7440_v9  ;;  %v3675_v33 = vpop.f32.mrb[17].mxu1 }
 0x516   : > { %v3676_v21 = vadd.f32 %v3675_v33, %v7434_v59  ;;  %v3752_v5 = vadd.f32 %v3751_v63, %v7535_v18  ;;  %v5273_v58 = vpop.f32.mrb[18].mxu1 }
 0x517   : > { %v3687_v22 = vadd.f32 %v5273_v58, %v7442_v2  ;;  %v3678_v14 = vpop.f32.mrb[19].mxu1 }
 0x518   : > { %v3753_v48 = vadd.f32 %v3752_v5, %v3676_v21  ;;  %v3679_v28 = vadd.f32 %v3678_v14, %v7436_v8 }
 0x51a   : > { %v3754_v26 = vadd.f32 %v3753_v48, %v3679_v28 }
 0x51c   : > { %v3755_v24 = vadd.f32 %v3754_v26, %v7544_v37  ;;  %v5276_v43 = vpop.f32.mrb[20].mxu1 }
 0x51d   : > { %v3700_v36 = vadd.f32 %v5276_v43, %v7452_v35  ;;  %v3691_v9 = vpop.f32.mrb[21].mxu1 }
 0x51e   : > { %v3692_v16 = vadd.f32 %v3691_v9, %v7446_v38  ;;  %v3756_v7 = vadd.f32 %v3755_v24, %v3687_v22  ;;  %v5277_v59 = vpop.f32.mrb[22].mxu1 }
 0x51f   : > { %v3703_v27 = vadd.f32 %v5277_v59, %v7454_v41  ;;  %v3694_v55 = vpop.f32.mrb[23].mxu1 }
 0x520   : > { %v3757_v1 = vadd.f32 %v3756_v7, %v3692_v16  ;;  %v3695_v2 = vadd.f32 %v3694_v55, %v7448_v6 }
 0x522   : > { %v3758_v15 = vadd.f32 %v3757_v1, %v3695_v2 }
 0x524   : > { %v3759_v32 = vadd.f32 %v3758_v15, %v3700_v36  ;;  %v5280_v8 = vpop.f32.mrb[24].mxu1 }
 0x525   : > { %v3716_v12 = vadd.f32 %v5280_v8, %v7464_v31  ;;  %v3707_v52 = vpop.f32.mrb[25].mxu1 }
 0x526   : > { %v3708_v56 = vadd.f32 %v3707_v52, %v7458_v29  ;;  %v3760_v35 = vadd.f32 %v3759_v32, %v3703_v27  ;;  %v5281_v45 = vpop.f32.mrb[26].mxu1 }
 0x527   : > { %v3719_v38 = vadd.f32 %v5281_v45, %v7466_v46  ;;  %v3710_v39 = vpop.f32.mrb[27].mxu1 }
 0x528   : > { %v3761_v34 = vadd.f32 %v3760_v35, %v3708_v56  ;;  %v3711_v41 = vadd.f32 %v3710_v39, %v7460_v4 }
 0x52a   : > { %v3762_v57 = vadd.f32 %v3761_v34, %v3711_v41 }
 0x52c   : > { %v3763_v3 = vadd.f32 %v3762_v57, %v3716_v12  ;;  %v5284_v20 = vpop.f32.mrb[28].mxu1 }
 0x52d   : > { %v3732_v6 = vadd.f32 %v5284_v20, %v7476_v42  ;;  %v3723_v10 = vpop.f32.mrb[29].mxu1 }
 0x52e   : > { %v3724_v63 = vadd.f32 %v3723_v10, %v7470_v44  ;;  %v3764_v31 = vadd.f32 %v3763_v3, %v3719_v38  ;;  %v5285_v17 = vpop.f32.mrb[30].mxu1 }
 0x52f   : > { %v3735_v29 = vadd.f32 %v5285_v17, %v7478_v54  ;;  %v3726_v33 = vpop.f32.mrb[31].mxu1 }
 0x530   : > { %v3765_v5 = vadd.f32 %v3764_v31, %v3724_v63  ;;  %v3727_v46 = vadd.f32 %v3726_v33, %v7472_v11 }
 0x532   : > { %v3766_v58 = vadd.f32 %v3765_v5, %v3727_v46 }
 0x534   : > { %v3767_v14 = vadd.f32 %v3766_v58, %v3732_v6 }
 0x536   : > { %v3768_v48 = vadd.f32 %v3767_v14, %v3735_v29 }
 0x538   : > { %v3769_v4 = vrot.slane %v3768_v48, 4 }
 0x53a   : > { %v3770_v26 = vadd.f32 %v3769_v4, %v3768_v48 }
 0x53c   : > { %v3771_v24 = vrot.slane %v3770_v26, 2 }
 0x53e   : > { %v3772_v43 = vadd.f32 %v3771_v24, %v3770_v26 }
 0x540   : > { %v3773_v9 = vrot.slane %v3772_v43, 1 }
 0x542   : > { %v3774_v42 = vadd.f32 %v3773_v9, %v3772_v43 }
 0x544   : > { %v3775_v7 = vmul.f32 0.00390625, %v3774_v42 }
 0x546   : > { %v7564_v44 = vsub.f32 %v7515_v19, %v3775_v7  ;;  %v7567_v59 = vsub.f32 %v7523_v53, %v3775_v7  ;;  %v7570_v54 = vsub.f32 %v7512_v49, %v3775_v7  ;;  %v7573_v11 = vsub.f32 %v7519_v62, %v3775_v7 }
 0x547   : > { %v7576_v55 = vsub.f32 %v7531_v51, %v3775_v7  ;;  %v7579_v1 = vsub.f32 %v7539_v50, %v3775_v7  ;;  %v7582_v15 = vsub.f32 %v7528_v61, %v3775_v7  ;;  %v7585_v19 = vsub.f32 %v7535_v18, %v3775_v7 }
 0x548   : > { %v7587_v53 = vsub.f32 %v3676_v21, %v3775_v7  ;;  %v7589_v32 = vsub.f32 %v3679_v28, %v3775_v7  ;;  %v7592_v49 = vsub.f32 %v7544_v37, %v3775_v7  ;;  %v7594_v62 = vsub.f32 %v3687_v22, %v3775_v7 }
 0x549   : > { %v7596_v51 = vsub.f32 %v3692_v16, %v3775_v7  ;;  %v7598_v8 = vsub.f32 %v3695_v2, %v3775_v7  ;;  %v7600_v50 = vsub.f32 %v3700_v36, %v3775_v7  ;;  %v7602_v61 = vsub.f32 %v3703_v27, %v3775_v7 }
 0x54a   : > { %v7604_v52 = vsub.f32 %v3708_v56, %v3775_v7  ;;  %v7606_v18 = vsub.f32 %v3711_v41, %v3775_v7  ;;  %v7608_v21 = vsub.f32 %v3716_v12, %v3775_v7  ;;  %v7610_v28 = vsub.f32 %v3719_v38, %v3775_v7 }
 0x54b   : > { %v7612_v37 = vsub.f32 %v3724_v63, %v3775_v7  ;;  %v7614_v22 = vsub.f32 %v3727_v46, %v3775_v7  ;;  %v7616_v16 = vsub.f32 %v3732_v6, %v3775_v7  ;;  %v7618_v2 = vsub.f32 %v3735_v29, %v3775_v7 }
 0x54c   : > { %v7621_v36 = vsub.f32 %v7484_v0, %v3775_v7  ;;  %v7624_v27 = vsub.f32 %v7490_v60, %v3775_v7  ;;  %v7627_v56 = vsub.f32 %v7481_v25, %v3775_v7  ;;  %v7634_v45 = vsub.f32 %v7487_v40, %v3775_v7 }
 0x54d   : > { %v7637_v38 = vsub.f32 %v7499_v13, %v3775_v7  ;;  %v7642_v39 = vsub.f32 %v7507_v30, %v3775_v7  ;;  %v7647_v41 = vsub.f32 %v7496_v47, %v3775_v7  ;;  %v7652_v13 = vsub.f32 %v7503_v23, %v3775_v7 }
 0x54e   : > { %v3808_v12 = vmul.f32 %v7621_v36, %v7621_v36  ;;  %v3809_v35 = vmul.f32 %v7624_v27, %v7624_v27  ;;  %v3810_v0 = vmul.f32 %v7627_v56, %v7627_v56  ;;  %v3811_v25 = vmul.f32 %v7634_v45, %v7634_v45 }
 0x54f   : > { %v3812_v40 = vmul.f32 %v7637_v38, %v7637_v38  ;;  %v3813_v3 = vmul.f32 %v7642_v39, %v7642_v39  ;;  %v3814_v30 = vmul.f32 %v7647_v41, %v7647_v41  ;;  %v3815_v10 = vmul.f32 %v7652_v13, %v7652_v13 }
 0x550   : > { %v3840_v60 = vadd.f32 %v3809_v35, %v3808_v12  ;;  %v3816_v63 = vmul.f32 %v7564_v44, %v7564_v44  ;;  %v3817_v23 = vmul.f32 %v7567_v59, %v7567_v59  ;;  %v3818_v29 = vmul.f32 %v7570_v54, %v7570_v54 }
 0x551   : > { %v3819_v5 = vmul.f32 %v7573_v11, %v7573_v11  ;;  %v3820_v58 = vmul.f32 %v7576_v55, %v7576_v55  ;;  %v3821_v48 = vmul.f32 %v7579_v1, %v7579_v1  ;;  %v3822_v26 = vmul.f32 %v7582_v15, %v7582_v15 }
 0x552   : > { %v3841_v34 = vadd.f32 %v3840_v60, %v3810_v0  ;;  %v3823_v43 = vmul.f32 %v7585_v19, %v7585_v19  ;;  %v3824_v42 = vmul.f32 %v7587_v53, %v7587_v53  ;;  %v3825_v12 = vmul.f32 %v7589_v32, %v7589_v32 }
 0x553   : > { %v3826_v0 = vmul.f32 %v7592_v49, %v7592_v49 }
 0x554   : > { %v3842_v57 = vadd.f32 %v3841_v34, %v3811_v25  ;;  %v3827_v25 = vmul.f32 %v7594_v62, %v7594_v62 }
 0x556   : > { %v3843_v20 = vadd.f32 %v3842_v57, %v3812_v40  ;;  %v3828_v40 = vmul.f32 %v7596_v51, %v7596_v51 }
 0x558   : > { %v3844_v6 = vadd.f32 %v3843_v20, %v3813_v3  ;;  %v3829_v3 = vmul.f32 %v7598_v8, %v7598_v8 }
 0x55a   : > { %v3845_v47 = vadd.f32 %v3844_v6, %v3814_v30  ;;  %v3830_v30 = vmul.f32 %v7600_v50, %v7600_v50 }
 0x55c   : > { %v3846_v31 = vadd.f32 %v3845_v47, %v3815_v10  ;;  %v3831_v10 = vmul.f32 %v7602_v61, %v7602_v61 }
 0x55e   : > { %v3847_v17 = vadd.f32 %v3846_v31, %v3816_v63  ;;  %v3832_v63 = vmul.f32 %v7604_v52, %v7604_v52 }
 0x560   : > { %v3848_v33 = vadd.f32 %v3847_v17, %v3817_v23  ;;  %v3833_v23 = vmul.f32 %v7606_v18, %v7606_v18 }
 0x562   : > { %v3849_v46 = vadd.f32 %v3848_v33, %v3818_v29  ;;  %v3834_v29 = vmul.f32 %v7608_v21, %v7608_v21 }
 0x564   : > { %v3850_v14 = vadd.f32 %v3849_v46, %v3819_v5  ;;  %v3835_v5 = vmul.f32 %v7610_v28, %v7610_v28 }
 0x566   : > { %v3851_v4 = vadd.f32 %v3850_v14, %v3820_v58  ;;  %v3836_v58 = vmul.f32 %v7612_v37, %v7612_v37 }
 0x568   : > { %v3852_v24 = vadd.f32 %v3851_v4, %v3821_v48  ;;  %v3837_v48 = vmul.f32 %v7614_v22, %v7614_v22 }
 0x56a   : > { %v3853_v9 = vadd.f32 %v3852_v24, %v3822_v26  ;;  %v3838_v26 = vmul.f32 %v7616_v16, %v7616_v16 }
 0x56c   : > { %v3854_v7 = vadd.f32 %v3853_v9, %v3823_v43  ;;  %v3839_v43 = vmul.f32 %v7618_v2, %v7618_v2 }
 0x56e   : > { %v3855_v35 = vadd.f32 %v3854_v7, %v3824_v42 }
 0x570   : > { %v3856_v60 = vadd.f32 %v3855_v35, %v3825_v12 }
 0x572   : > { %v3857_v34 = vadd.f32 %v3856_v60, %v3826_v0 }
 0x574   : > { %v3858_v57 = vadd.f32 %v3857_v34, %v3827_v25 }
 0x576   : > { %v3859_v20 = vadd.f32 %v3858_v57, %v3828_v40 }
 0x578   : > { %v3860_v6 = vadd.f32 %v3859_v20, %v3829_v3 }
 0x57a   : > { %v3861_v47 = vadd.f32 %v3860_v6, %v3830_v30 }
 0x57c   : > { %v3862_v31 = vadd.f32 %v3861_v47, %v3831_v10 }
 0x57e   : > { %v3863_v17 = vadd.f32 %v3862_v31, %v3832_v63 }
 0x580   : > { %v3864_v33 = vadd.f32 %v3863_v17, %v3833_v23  ;;  %v5507_v23 = vld [vmem:[%s5905_s30 + $0xe8] sm:$0xff] }
 0x582   : > { %v3865_v46 = vadd.f32 %v3864_v33, %v3834_v29  ;;  %v5511_v33 = vld [vmem:[%s5905_s30 + $0x18] sm:$0xff] }
 0x584   : > { %v3866_v14 = vadd.f32 %v3865_v46, %v3835_v5  ;;  %v5512_v5 = vld [vmem:[%s5905_s30 + $0x20] sm:$0xff]  ;;  %v5513_v46 = vld [vmem:[%s5905_s30 + $0x28] sm:$0xff] }
 0x586   : > { %v3867_v4 = vadd.f32 %v3866_v14, %v3836_v58  ;;  %v5514_v58 = vld [vmem:[%s5905_s30 + $0x30] sm:$0xff] }
 0x588   : > { %v3868_v24 = vadd.f32 %v3867_v4, %v3837_v48  ;;  %v5515_v48 = vld [vmem:[%s5905_s30 + $0x38] sm:$0xff] }
 0x58a   : > { %v3869_v9 = vadd.f32 %v3868_v24, %v3838_v26  ;;  %v5516_v26 = vld [vmem:[%s5905_s30 + $0x40] sm:$0xff] }
 0x58c   : > { %v3870_v42 = vadd.f32 %v3869_v9, %v3839_v43  ;;  %v5517_v43 = vld [vmem:[%s5905_s30 + $0x48] sm:$0xff] }
 0x58e   : > { %v3871_v7 = vrot.slane %v3870_v42, 4 }
 0x590   : > { %v3872_v12 = vadd.f32 %v3871_v7, %v3870_v42  ;;  %v5518_v42 = vld [vmem:[%s5905_s30 + $0x50] sm:$0xff] }
 0x592   : > { %v3873_v35 = vrot.slane %v3872_v12, 2 }
 0x594   : > { %v3874_v0 = vadd.f32 %v3873_v35, %v3872_v12  ;;  %v5519_v12 = vld [vmem:[%s5905_s30 + $0x58] sm:$0xff] }
 0x596   : > { %v3875_v60 = vrot.slane %v3874_v0, 1 }
 0x598   : > { %v3876_v25 = vadd.f32 %v3875_v60, %v3874_v0  ;;  %v5520_v0 = vld [vmem:[%s5905_s30 + $0x60] sm:$0xff] }
 0x59a   : > { %v3877_v34 = vmul.f32 0.00390625, %v3876_v25  ;;  %v5521_v25 = vld [vmem:[%s5905_s30 + $0x68] sm:$0xff] }
 0x59c   : > { %v3878_v40 = vadd.f32 1e-05, %v3877_v34 }
 0x59e   : > { %5505 = vrsqrt.f32 %v3878_v40  ;;  %v5522_v40 = vld [vmem:[%s5905_s30 + $0x70] sm:$0xff] }
 0x5a8   : > { %v5506_v57 = vpop.eup %5505 }
 0x5a9   : > { %v3909_v3 = vmul.f32 %v5506_v57, %v7614_v22  ;;  %v3880_v20 = vmul.f32 %v5506_v57, %v7621_v36  ;;  %v3881_v30 = vmul.f32 %v5506_v57, %v7624_v27  ;;  %v3882_v6 = vmul.f32 %v5506_v57, %v7627_v56 }
 0x5aa   : > { %v3883_v10 = vmul.f32 %v5506_v57, %v7634_v45  ;;  %v3884_v47 = vmul.f32 %v5506_v57, %v7637_v38  ;;  %v3885_v63 = vmul.f32 %v5506_v57, %v7642_v39  ;;  %v3886_v31 = vmul.f32 %v5506_v57, %v7647_v41 }
 0x5ab   : > { %v3941_v17 = vadd.f32 %v5507_v23, %v3909_v3  ;;  %v3887_v29 = vmul.f32 %v5506_v57, %v7652_v13  ;;  %v3888_v22 = vmul.f32 %v5506_v57, %v7564_v44  ;;  %v3889_v36 = vmul.f32 %v5506_v57, %v7567_v59  ;;  %v5510_v13 = vld [vmem:[%s5905_s30 + $0x10] sm:$0xff]  ;;  %v5523_v3 = vld [vmem:[%s5905_s30 + $0x78] sm:$0xff] }
 0x5ac   : > { %v3890_v27 = vmul.f32 %v5506_v57, %v7570_v54  ;;  %v3891_v56 = vmul.f32 %v5506_v57, %v7573_v11  ;;  %v3892_v45 = vmul.f32 %v5506_v57, %v7576_v55  ;;  %v3893_v38 = vmul.f32 %v5506_v57, %v7579_v1  ;;  %v5527_v23 = vld [vmem:[%s5905_s30 + $0x98] sm:$0xff] }
 0x5ad   : > { %3973 = vst [vmem:[%s7726_s18 + $0xe8] sm:$0xff] %v3941_v17  ;;  %v3894_v39 = vmul.f32 %v5506_v57, %v7582_v15  ;;  %v3895_v41 = vmul.f32 %v5506_v57, %v7585_v19  ;;  %v3896_v44 = vmul.f32 %v5506_v57, %v7587_v53  ;;  %v3897_v59 = vmul.f32 %v5506_v57, %v7589_v32 }
 0x5ae   : > { %v3898_v54 = vmul.f32 %v5506_v57, %v7592_v49  ;;  %v7735_v11 = vmul.f32 %v5506_v57, %v7594_v62  ;;  %v7738_v55 = vmul.f32 %v5506_v57, %v7596_v51  ;;  %v7741_v1 = vmul.f32 %v5506_v57, %v7598_v8 }
 0x5af   : > { %v7744_v15 = vmul.f32 %v5506_v57, %v7600_v50  ;;  %v7747_v19 = vmul.f32 %v5506_v57, %v7602_v61  ;;  %v7750_v53 = vmul.f32 %v5506_v57, %v7604_v52  ;;  %v7753_v32 = vmul.f32 %v5506_v57, %v7606_v18  ;;  %v5508_v61 = vld [vmem:[%s5905_s30] sm:$0xff]  ;;  %v5509_v18 = vld [vmem:[%s5905_s30 + $0x8] sm:$0xff] }
 0x5b0   : > { %v7756_v49 = vmul.f32 %v5506_v57, %v7608_v21  ;;  %v7759_v62 = vmul.f32 %v5506_v57, %v7610_v28  ;;  %v7762_v51 = vmul.f32 %v5506_v57, %v7612_v37  ;;  %v7765_v8 = vmul.f32 %v5506_v57, %v7616_v16 }
 0x5b1   : > { %v7768_v50 = vmul.f32 %v5506_v57, %v7618_v2  ;;  %v3912_v52 = vadd.f32 %v5508_v61, %v3880_v20  ;;  %v3913_v21 = vadd.f32 %v5509_v18, %v3881_v30  ;;  %v3914_v28 = vadd.f32 %v5510_v13, %v3882_v6  ;;  %v5524_v30 = vld [vmem:[%s5905_s30 + $0x80] sm:$0xff]  ;;  %v5538_v61 = vld [vmem:[%s5905_s30 + $0xf8] sm:$0xff] }
 0x5b2   : > { %v3915_v37 = vadd.f32 %v5511_v33, %v3883_v10  ;;  %v3916_v16 = vadd.f32 %v5512_v5, %v3884_v47  ;;  %v3917_v2 = vadd.f32 %v5513_v46, %v3885_v63  ;;  %v3918_v14 = vadd.f32 %v5514_v58, %v3886_v31  ;;  %v5525_v10 = vld [vmem:[%s5905_s30 + $0x88] sm:$0xff]  ;;  %v5526_v63 = vld [vmem:[%s5905_s30 + $0x90] sm:$0xff] }
 0x5b3   : > { %v3919_v4 = vadd.f32 %v5515_v48, %v3887_v29  ;;  %v3920_v24 = vadd.f32 %v5516_v26, %v3888_v22  ;;  %v3921_v9 = vadd.f32 %v5517_v43, %v3889_v36  ;;  %v3922_v7 = vadd.f32 %v5518_v42, %v3890_v27  ;;  %3944 = vst [vmem:[%s7726_s18] sm:$0xff] %v3912_v52  ;;  %v5528_v29 = vld [vmem:[%s5905_s30 + $0xa0] sm:$0xff]  ;;  %v5529_v36 = vld [vmem:[%s5905_s30 + $0xa8] sm:$0xff] }
 0x5b4   : > { %3945 = vst [vmem:[%s7726_s18 + $0x8] sm:$0xff] %v3913_v21  ;;  %3946 = vst [vmem:[%s7726_s18 + $0x10] sm:$0xff] %v3914_v28  ;;  %v3923_v35 = vadd.f32 %v5519_v12, %v3891_v56  ;;  %v3924_v60 = vadd.f32 %v5520_v0, %v3892_v45  ;;  %v3925_v34 = vadd.f32 %v5521_v25, %v3893_v38  ;;  %v5530_v56 = vld [vmem:[%s5905_s30 + $0xb0] sm:$0xff]  ;;  %v5531_v38 = vld [vmem:[%s5905_s30 + $0xb8] sm:$0xff] }
 0x5b5   : > { %v3926_v57 = vadd.f32 %v5522_v40, %v3894_v39  ;;  %3947 = vst [vmem:[%s7726_s18 + $0x18] sm:$0xff] %v3915_v37  ;;  %3948 = vst [vmem:[%s7726_s18 + $0x20] sm:$0xff] %v3916_v16  ;;  %v3927_v20 = vadd.f32 %v5523_v3, %v3895_v41  ;;  %v3928_v6 = vadd.f32 %v5524_v30, %v3896_v44  ;;  %v5532_v41 = vld [vmem:[%s5905_s30 + $0xc0] sm:$0xff] }
 0x5b6   : > { %3949 = vst [vmem:[%s7726_s18 + $0x28] sm:$0xff] %v3917_v2  ;;  %3950 = vst [vmem:[%s7726_s18 + $0x30] sm:$0xff] %v3918_v14  ;;  %v3929_v47 = vadd.f32 %v5525_v10, %v3897_v59  ;;  %v3930_v31 = vadd.f32 %v5526_v63, %v3898_v54  ;;  %v3931_v17 = vadd.f32 %v5527_v23, %v7735_v11  ;;  %v5533_v59 = vld [vmem:[%s5905_s30 + $0xc8] sm:$0xff]  ;;  %v5534_v11 = vld [vmem:[%s5905_s30 + $0xd0] sm:$0xff] }
 0x5b7   : > { %3951 = vst [vmem:[%s7726_s18 + $0x38] sm:$0xff] %v3919_v4  ;;  %3952 = vst [vmem:[%s7726_s18 + $0x40] sm:$0xff] %v3920_v24  ;;  %v3932_v22 = vadd.f32 %v5528_v29, %v7738_v55  ;;  %v3933_v27 = vadd.f32 %v5529_v36, %v7741_v1  ;;  %v3934_v45 = vadd.f32 %v5530_v56, %v7744_v15  ;;  %v5535_v1 = vld [vmem:[%s5905_s30 + $0xd8] sm:$0xff] }
 0x5b8   : > { %3953 = vst [vmem:[%s7726_s18 + $0x48] sm:$0xff] %v3921_v9  ;;  %3954 = vst [vmem:[%s7726_s18 + $0x50] sm:$0xff] %v3922_v7  ;;  %v3935_v39 = vadd.f32 %v5531_v38, %v7747_v19  ;;  %v3936_v44 = vadd.f32 %v5532_v41, %v7750_v53  ;;  %v3937_v54 = vadd.f32 %v5533_v59, %v7753_v32  ;;  %v5536_v19 = vld [vmem:[%s5905_s30 + $0xe0] sm:$0xff]  ;;  %v5537_v32 = vld [vmem:[%s5905_s30 + $0xf0] sm:$0xff] }
 0x5b9   : > { %3955 = vst [vmem:[%s7726_s18 + $0x58] sm:$0xff] %v3923_v35  ;;  %3956 = vst [vmem:[%s7726_s18 + $0x60] sm:$0xff] %v3924_v60  ;;  %v3938_v55 = vadd.f32 %v5534_v11, %v7756_v49  ;;  %v3939_v15 = vadd.f32 %v5535_v1, %v7759_v62  ;;  %v3940_v53 = vadd.f32 %v5536_v19, %v7762_v51 }
 0x5ba   : > { %3957 = vst [vmem:[%s7726_s18 + $0x68] sm:$0xff] %v3925_v34  ;;  %3958 = vst [vmem:[%s7726_s18 + $0x70] sm:$0xff] %v3926_v57  ;;  %v3942_v49 = vadd.f32 %v5537_v32, %v7765_v8  ;;  %v3943_v52 = vadd.f32 %v5538_v61, %v7768_v50 }
 0x5bb   : > { %3959 = vst [vmem:[%s7726_s18 + $0x78] sm:$0xff] %v3927_v20  ;;  %3960 = vst [vmem:[%s7726_s18 + $0x80] sm:$0xff] %v3928_v6 }
 0x5bc   : > { %3961 = vst [vmem:[%s7726_s18 + $0x88] sm:$0xff] %v3929_v47  ;;  %3962 = vst [vmem:[%s7726_s18 + $0x90] sm:$0xff] %v3930_v31 }
 0x5bd   : > { %3963 = vst [vmem:[%s7726_s18 + $0x98] sm:$0xff] %v3931_v17  ;;  %3964 = vst [vmem:[%s7726_s18 + $0xa0] sm:$0xff] %v3932_v22 }
 0x5be   : > { %3965 = vst [vmem:[%s7726_s18 + $0xa8] sm:$0xff] %v3933_v27  ;;  %3966 = vst [vmem:[%s7726_s18 + $0xb0] sm:$0xff] %v3934_v45 }
 0x5bf   : > { %3967 = vst [vmem:[%s7726_s18 + $0xb8] sm:$0xff] %v3935_v39  ;;  %3968 = vst [vmem:[%s7726_s18 + $0xc0] sm:$0xff] %v3936_v44 }
 0x5c0   : > { %3969 = vst [vmem:[%s7726_s18 + $0xc8] sm:$0xff] %v3937_v54  ;;  %3970 = vst [vmem:[%s7726_s18 + $0xd0] sm:$0xff] %v3938_v55 }
 0x5c1   : > { %3971 = vst [vmem:[%s7726_s18 + $0xd8] sm:$0xff] %v3939_v15  ;;  %3972 = vst [vmem:[%s7726_s18 + $0xe0] sm:$0xff] %v3940_v53 }
 0x5c2   : > { %3974 = vst [vmem:[%s7726_s18 + $0xf0] sm:$0xff] %v3942_v49  ;;  %3975 = vst [vmem:[%s7726_s18 + $0xf8] sm:$0xff] %v3943_v52 }
 0x5c3   : > { %5638 = shalt.err (!%p5635_p2)
}
 0x5c4   : > { %s5639_s25 = scalar_lea.hbm %s7831_s27, 4096  ;;  %s5643_s21 = scalar_lea.hbm %s7902_s3, 8192 }
 0x5c5   : > { %p5640_p13 = scmp.ne.s32.totalorder %s7831_s27, %s5639_s25  ;;  %p5644_p4 = scmp.lt.u32.totalorder %s7831_s27, %s7902_s3 }
 0x5c6   : > { %p5645_p5 = scmp.lt.u32.totalorder %s5643_s21, %s5639_s25  ;;  %p5647_p11 = scmp.lt.u32.totalorder %s5639_s25, %s7831_s27 }
 0x5c7   : > { %p5641_p6 = pnand %p5640_p13, %p7920_p0 }
 0x5c8   : > { %p5646_p8 = por %p5645_p5, %p5644_p4 }
 0x5c9   : > { %p5642_p10 = pneg %p5641_p6 }
 0x5ca   : > { %p5648_p1 = por %p5647_p11, %p5646_p8 }
 0x5cc   : > { %p5649_p3 = pnand %p5648_p1, %p5642_p10 }
 0x5ce   : > { %5652 = shalt.err (!%p5649_p3)
}
 0x5cf   : > { %s5705_s30 = smov 128   ;;  %s5706_s18 = smov 8  }
 0x5d0   : > { %5296 = dma.vmem_to_hbm [thread:$0]  (%p7920_p0), %s7835_s17, 4096, %s7831_s27, %s3977_s16, %s5705_s30, %s5705_s30, %s5706_s18  }
 0x5d1 PF: > { %s4005_s20 = sand.u32 1, %s5683_s12   ;;  %p7921_p7 = scmp.ne.s32.totalorder %s7907_s19, 0 }
 0x5d2   : > { %p7922_p9 = scmp.ge.s32.totalorder %s5695_s15, 2  ;;  %s4006_s24 = scalar_lea.sflag [#allocation4], %s4005_s20 }
 0x5d4   : > { %p5310_p12 = pnand %p7922_p9, %p7921_p7 }
 0x5d6   : > { %5678 = dma.done.wait (!%p5310_p12), %s4006_s24, 4096  }
 0x5d7   : > { %5680 = vsyncadd (!%p5310_p12), %s4006_s24, 4294963200  ;;  %p17_p2 = scmp.ge.s32.totalorder %s5837_s4, 4   ;;  %s7923_s12 = smov %s5687_s13 }
 0x5d8   : > { %s7924_s13 = smov %s5691_s14  ;;  %s7925_s14 = smov %s5853_s9 }
 0x5d9   : > { %s7926_s15 = smov %s5837_s4  ;;  %19 = sbr.rel (!%p17_p2) target bundleno = 6 (0x6), region = 85 }
 0x5e0   :  { %4011 = vsyncpa [#allocation3], 1 }
 0x5e1   :  { %4013 = vsyncpa [#allocation3 + $0x1], 1 }
 0x5e2   :  { %4014 = vsyncpa [#allocation6], 1 }
 0x5e3   :  { %4015 = vsyncpa [#allocation4], 1 }
 0x5e4   :  { %4017 = vsyncpa [#allocation4 + $0x1], 1 }

</bundles_post_ra>
